<compile_context>
chip_gen: v6e
topology: v6e:2x2x1
jax: 0.10.0
libtpu: 0.0.40
codegen_flags: <defaults>
</compile_context>

<pallas_src>
import functools

import jax
import jax.numpy as jnp
from jax.experimental import pallas as pl
from jax.experimental.pallas import tpu as pltpu

_VMEM_LIMIT = 48 * 1024 * 1024  # safe on v5e/v6e (128 MiB) and v7x (64 MiB)


def _round_up(x, m):
    return ((x + m - 1) // m) * m


def _pick_tm(M):
    if M % 256 == 0 and M >= 512:
        return 256
    if M % 128 == 0:
        return 128
    if M <= 512:
        return M          # full-M block (allowed: block dim == full array dim)
    return 128            # large ragged M: pad path


def _pick_tk(K):
    if K <= 1024:
        return K
    for tk in (512, 384, 256, 128):
        if K % tk == 0:
            return tk
    return K


# ----------------------------------------------------------------------------
# Pallas kernels
# ----------------------------------------------------------------------------
def _mm_noacc_kernel(*refs, relu, has_res):
    """out = act(a @ b + shift [+ res]) — single-K-step fast path (no scratch)."""
    if has_res:
        a_ref, b_ref, shift_ref, res_ref, o_ref = refs
    else:
        a_ref, b_ref, shift_ref, o_ref = refs
        res_ref = None
    out = jnp.dot(a_ref[...], b_ref[...], preferred_element_type=jnp.float32)
    out = out + shift_ref[...]
    if has_res:
        out = out + res_ref[...].astype(jnp.float32)
    if relu:
        out = jnp.maximum(out, 0.0)
    o_ref[...] = out.astype(o_ref.dtype)


def _mm_acc_kernel(*refs, relu, has_res):
    """Same epilogue, but with a K-reduction grid axis and f32 VMEM accumulator."""
    if has_res:
        a_ref, b_ref, shift_ref, res_ref, o_ref, acc_ref = refs
    else:
        a_ref, b_ref, shift_ref, o_ref, acc_ref = refs
        res_ref = None

    kk = pl.program_id(2)

    @pl.when(kk == 0)
    def _():
        acc_ref[...] = jnp.zeros_like(acc_ref)

    acc_ref[...] += jnp.dot(a_ref[...], b_ref[...],
                            preferred_element_type=jnp.float32)

    @pl.when(kk == pl.num_programs(2) - 1)
    def _():
        out = acc_ref[...] + shift_ref[...]
        if has_res:
            out = out + res_ref[...].astype(jnp.float32)
        if relu:
            out = jnp.maximum(out, 0.0)
        o_ref[...] = out.astype(o_ref.dtype)


def fused_matmul(a, b_pad, shift_pad, *, residual=None, relu=False,
                 out_dtype=jnp.bfloat16):
    """a:[M,K] @ b_pad:[K,Npad] (bf16, lane-padded) + shift (+ res) -> [M, Npad].

    BN scale is pre-folded into b_pad; output keeps the padded N (carried to the
    next layer).  Output dtype is bf16 unless overridden."""
    M, K = a.shape
    Kb, Npad = b_pad.shape
    assert K == Kb and Npad % 128 == 0 and shift_pad.shape == (1, Npad)

    TM = _pick_tm(M)
    Mpad = _round_up(M, TM)
    TN = Npad if Npad <= 512 else (512 if Npad % 512 == 0 else 128)
    TK = _pick_tk(K)
    nk = K // TK

    a16 = a.astype(jnp.bfloat16)
    if Mpad != M:
        a16 = jnp.pad(a16, ((0, Mpad - M), (0, 0)))

    has_res = residual is not None
    inputs = [a16, b_pad, shift_pad]
    in_specs = [
        pl.BlockSpec((TM, TK), lambda i, j, k: (i, k)),
        pl.BlockSpec((TK, TN), lambda i, j, k: (k, j)),
        pl.BlockSpec((1, TN), lambda i, j, k: (0, j)),
    ]
    if has_res:
        r = residual.astype(jnp.bfloat16)
        if Mpad != M:
            r = jnp.pad(r, ((0, Mpad - M), (0, 0)))
        inputs.append(r)
        in_specs.append(pl.BlockSpec((TM, TN), lambda i, j, k: (i, j)))

    if nk == 1:
        kernel = functools.partial(_mm_noacc_kernel, relu=relu, has_res=has_res)
        scratch = []
    else:
        kernel = functools.partial(_mm_acc_kernel, relu=relu, has_res=has_res)
        scratch = [pltpu.VMEM((TM, TN), jnp.float32)]

    out = pl.pallas_call(
        kernel,
        out_shape=jax.ShapeDtypeStruct((Mpad, Npad), out_dtype),
        grid=(Mpad // TM, Npad // TN, nk),
        in_specs=in_specs,
        out_specs=pl.BlockSpec((TM, TN), lambda i, j, k: (i, j)),
        scratch_shapes=scratch,
        compiler_params=pltpu.CompilerParams(
            dimension_semantics=("parallel", "parallel", "arbitrary"),
            vmem_limit_bytes=_VMEM_LIMIT),
    )(*inputs)
    if Mpad != M:
        out = out[:M]
    return out


def _norm_logits_kernel(f_ref, w_ref, o_ref):
    """logits = (f / ||f||) @ W — CLIPModelWithLabels head."""
    f = f_ref[...].astype(jnp.float32)
    ssq = jnp.sum(f * f, axis=-1, keepdims=True)
    fn = f * jax.lax.rsqrt(ssq + 1e-12)
    o_ref[...] = jnp.dot(fn.astype(w_ref.dtype), w_ref[...],
                         preferred_element_type=jnp.float32)


def norm_logits(feats_pad, w_pad, n_classes):
    B, Dp = feats_pad.shape
    Dw, Cp = w_pad.shape
    assert Dp == Dw and Cp % 128 == 0
    if B <= 256:
        TB, Bpad = B, B
        f = feats_pad
    else:
        Bpad = _round_up(B, 128)
        TB = 128
        f = jnp.pad(feats_pad, ((0, Bpad - B), (0, 0)))
    out = pl.pallas_call(
        _norm_logits_kernel,
        out_shape=jax.ShapeDtypeStruct((Bpad, Cp), jnp.float32),
        grid=(Bpad // TB,),
        in_specs=[pl.BlockSpec((TB, Dp), lambda i: (i, 0)),
                  pl.BlockSpec((Dp, Cp), lambda i: (0, 0))],
        out_specs=pl.BlockSpec((TB, Cp), lambda i: (i, 0)),
        compiler_params=pltpu.CompilerParams(
            dimension_semantics=("parallel",),
            vmem_limit_bytes=_VMEM_LIMIT),
    )(f, w_pad)
    return out[:B, :n_classes]


# ----------------------------------------------------------------------------
# Parameter preparation (one-time): fold BN into weights, pre-transpose, cast
# to bf16, pad input channels (K rows, zero) and output channels (lane-dense).
# ----------------------------------------------------------------------------
def _fold_conv_bn(w, bn, *, pad_cin=True, eps=1e-5):
    cout, cin, kh, kw = w.shape
    scale = bn["gamma"] / jnp.sqrt(bn["var"] + eps)
    shift = bn["beta"] - bn["mean"] * scale
    cin_p = _round_up(cin, 128) if pad_cin else cin
    cout_p = _round_up(cout, 128)
    wt = jnp.transpose(w, (2, 3, 1, 0)) * scale[None, None, None, :]   # (kh,kw,cin,cout)
    wt = jnp.pad(wt, ((0, 0), (0, 0), (0, cin_p - cin), (0, cout_p - cout)))
    b = wt.reshape(kh * kw * cin_p, cout_p).astype(jnp.bfloat16)
    shift_p = jnp.pad(shift, (0, cout_p - cout)).astype(jnp.float32).reshape(1, cout_p)
    return dict(b=b, shift=shift_p, kh=kh, kw=kw,
                cin_pad=cin_p, cout=cout, cout_pad=cout_p)


def _fold_linear(lin):
    out_f, in_f = lin["w"].shape
    in_p = _round_up(in_f, 128)
    out_p = _round_up(out_f, 128)
    b = jnp.pad(lin["w"].T, ((0, in_p - in_f), (0, out_p - out_f))).astype(jnp.bfloat16)
    shift = jnp.pad(lin["b"], (0, out_p - out_f)).astype(jnp.float32).reshape(1, out_p)
    return dict(b=b, shift=shift, n_out=out_f, n_out_pad=out_p, n_in_pad=in_p)


def prepare_params(raw):
    p = {
        # stem conv1 sees the raw 3-channel image -> do NOT pad its K rows.
        "conv1": _fold_conv_bn(raw["conv1"], raw["bn1"], pad_cin=False),
        "conv2": _fold_conv_bn(raw["conv2"], raw["bn2"]),
        "conv3": _fold_conv_bn(raw["conv3"], raw["bn3"]),
    }
    for layer in ("layer1", "layer2", "layer3", "layer4"):
        blocks = []
        for blk in raw[layer]:
            b = dict(
                conv1=_fold_conv_bn(blk["conv1"], blk["bn1"]),
                conv2=_fold_conv_bn(blk["conv2"], blk["bn2"]),
                conv3=_fold_conv_bn(blk["conv3"], blk["bn3"]),
                stride=blk["stride"],
            )
            if "down_conv" in blk:
                b["down"] = _fold_conv_bn(blk["down_conv"], blk["down_bn"])
            blocks.append(b)
        p[layer] = blocks

    ap = raw["attnpool"]
    embed_dim = ap["q"]["w"].shape[1]
    cpad = _round_up(embed_dim, 128)
    pos = jnp.pad(ap["pos_emb"], ((0, 0), (0, cpad - embed_dim))).astype(jnp.float32)
    qf = _fold_linear(ap["q"])
    kf = _fold_linear(ap["k"])
    vf = _fold_linear(ap["v"])
    cf = _fold_linear(ap["c"])
    # Fuse k & v projections into one matmul (concatenate along N).
    kv = dict(b=jnp.concatenate([kf["b"], vf["b"]], axis=1),
              shift=jnp.concatenate([kf["shift"], vf["shift"]], axis=1),
              n_split=kf["n_out_pad"])
    p["attnpool"] = dict(pos_emb=pos, embed_dim=embed_dim, q=qf, kv=kv, c=cf)
    p["num_heads"] = raw["num_heads"]

    zw = raw["zeroshot_weights"]                       # (output_dim, num_classes)
    d, n_cls = zw.shape
    dpad = cf["n_out_pad"]                              # feature dim carried padded
    cls_pad = _round_up(n_cls, 128)
    p["zeroshot_weights"] = jnp.pad(
        zw, ((0, dpad - d), (0, cls_pad - n_cls))).astype(jnp.bfloat16)
    p["num_classes"] = n_cls
    return p


# ----------------------------------------------------------------------------
# JAX glue: im2col, pooling, layer wrappers (all matmuls go through Pallas);
# activations stay bf16 NHWC with padded channels end-to-end.
# ----------------------------------------------------------------------------
def conv_bn(x, cp, *, stride=1, pad=0, relu=True, residual=None):
    """Conv2d(bias=False) + folded BatchNorm(eval) + optional fused residual+ReLU."""
    N, H, W, Cin = x.shape
    kh, kw = cp["kh"], cp["kw"]
    assert Cin == cp["cin_pad"]
    Ho = (H + 2 * pad - kh) // stride + 1
    Wo = (W + 2 * pad - kw) // stride + 1
    if kh == 1 and kw == 1 and stride == 1 and pad == 0:
        a = x.reshape(N * H * W, Cin)
    else:
        # TODO(synk): fold this im2col into the kernel grid via shifted index_maps.
        xp = jnp.pad(x, ((0, 0), (pad, pad), (pad, pad), (0, 0)))
        cols = [xp[:, i:i + stride * Ho:stride, j:j + stride * Wo:stride, :]
                for i in range(kh) for j in range(kw)]
        a = jnp.concatenate(cols, axis=-1).reshape(N * Ho * Wo, kh * kw * Cin)
    res2d = None if residual is None else residual.reshape(N * Ho * Wo, cp["cout_pad"])
    y = fused_matmul(a, cp["b"], cp["shift"], residual=res2d, relu=relu)
    return y.reshape(N, Ho, Wo, cp["cout_pad"])


def avg_pool(x, k):
    # TODO(synk): fold into the consumer conv's index_map (stride trick).
    N, H, W, C = x.shape
    assert H % k == 0 and W % k == 0
    xr = x.reshape(N, H // k, k, W // k, k, C).astype(jnp.float32)
    return xr.mean(axis=(2, 4)).astype(x.dtype)


def bottleneck_forward(x, p):
    out = conv_bn(x, p["conv1"], relu=True)               # 1x1
    out = conv_bn(out, p["conv2"], pad=1, relu=True)       # 3x3, pad 1
    if p["stride"] > 1:
        out = avg_pool(out, p["stride"])
    idn = x
    if "down" in p:
        if p["stride"] > 1:
            idn = avg_pool(idn, p["stride"])
        idn = conv_bn(idn, p["down"], relu=False)
    # conv3 with the residual add + ReLU fused into the matmul epilogue.
    return conv_bn(out, p["conv3"], relu=True, residual=idn)


def attnpool_forward(x, p, num_heads):
    """CLIP AttentionPool2d: query = mean token, MHA over (HW+1) tokens."""
    N, H, W, Cp = x.shape
    C = p["embed_dim"]
    hd = C // num_heads

    xt = x.reshape(N, H * W, Cp).transpose(1, 0, 2).astype(jnp.float32)   # (HW,N,Cp)
    tokens = jnp.concatenate([jnp.mean(xt, axis=0, keepdims=True), xt], axis=0)
    tokens = (tokens + p["pos_emb"][:, None, :]).astype(jnp.bfloat16)     # (L,N,Cp)
    L = tokens.shape[0]

    # q only over the mean token; k & v fused into one matmul over all tokens.
    q = fused_matmul(tokens[0], p["q"]["b"], p["q"]["shift"])             # (N, Cp)
    kv = fused_matmul(tokens.reshape(L * N, Cp), p["kv"]["b"], p["kv"]["shift"])
    ns = p["kv"]["n_split"]
    k = kv[:, :ns].reshape(L, N, -1)
    v = kv[:, ns:].reshape(L, N, -1)

    # head split on the true embed dim (padding sliced; no-op when Cp == C)
    q = q[:, :C].astype(jnp.float32).reshape(N, num_heads, 1, hd) * (hd ** -0.5)
    k = k[:, :, :C].astype(jnp.float32).reshape(L, N, num_heads, hd).transpose(1, 2, 0, 3)
    v = v[:, :, :C].astype(jnp.float32).reshape(L, N, num_heads, hd).transpose(1, 2, 0, 3)

    # TODO(synk): attention core over L=HW+1 tokens is tiny; kept in plain JAX.
    scores = jnp.einsum("nhqd,nhkd->nhqk", q, k)
    attn = jax.nn.softmax(scores, axis=-1)
    ctx = jnp.einsum("nhqk,nhkd->nhqd", attn, v).reshape(N, C)

    ctx_p = jnp.pad(ctx, ((0, 0), (0, p["c"]["n_in_pad"] - C))).astype(jnp.bfloat16)
    return fused_matmul(ctx_p, p["c"]["b"], p["c"]["shift"])              # (N, out_pad)


def clip_with_labels_forward(params, x_nchw):
    """Forward pass of CLIPModelWithLabels (with_latent=False path)."""
    x = jnp.transpose(x_nchw, (0, 2, 3, 1)).astype(jnp.bfloat16)   # NCHW -> NHWC
    # --- ModifiedResNet stem ---
    x = conv_bn(x, params["conv1"], stride=2, pad=1, relu=True)
    x = conv_bn(x, params["conv2"], stride=1, pad=1, relu=True)
    x = conv_bn(x, params["conv3"], stride=1, pad=1, relu=True)
    x = avg_pool(x, 2)
    # --- residual layers ---
    for layer in ("layer1", "layer2", "layer3", "layer4"):
        for blk in params[layer]:
            x = bottleneck_forward(x, blk)
    # --- attention pool -> image features (channel-padded bf16) ---
    feats = attnpool_forward(x, params["attnpool"], params["num_heads"])
    # --- CLIPModelWithLabels head: L2-normalize + zeroshot matmul (Pallas) ---
    return norm_logits(feats, params["zeroshot_weights"], params["num_classes"])


# ----------------------------------------------------------------------------
# Deterministic parameter initialization (synthetic, no checkpoint)
# ----------------------------------------------------------------------------
def _make_bn(key, c):
    k1, k2, k3, k4 = jax.random.split(key, 4)
    return dict(
        gamma=1.0 + 0.1 * jax.random.normal(k1, (c,), jnp.float32),
        beta=0.05 * jax.random.normal(k2, (c,), jnp.float32),
        mean=0.1 * jax.random.normal(k3, (c,), jnp.float32),
        var=1.0 + 0.1 * jnp.abs(jax.random.normal(k4, (c,), jnp.float32)),
    )


def _make_conv(key, cout, cin, k):
    fan_in = cin * k * k
    return jax.random.normal(key, (cout, cin, k, k), jnp.float32) / jnp.sqrt(fan_in)


def _make_linear(key, out_f, in_f):
    k1, k2 = jax.random.split(key)
    return dict(
        w=jax.random.normal(k1, (out_f, in_f), jnp.float32) / jnp.sqrt(in_f),
        b=0.02 * jax.random.normal(k2, (out_f,), jnp.float32),
    )


def _make_bottleneck(key, inplanes, planes, stride):
    keys = jax.random.split(key, 8)
    p = dict(
        conv1=_make_conv(keys[0], planes, inplanes, 1), bn1=_make_bn(keys[1], planes),
        conv2=_make_conv(keys[2], planes, planes, 3), bn2=_make_bn(keys[3], planes),
        conv3=_make_conv(keys[4], planes * 4, planes, 1), bn3=_make_bn(keys[5], planes * 4),
        stride=stride,
    )
    if stride > 1 or inplanes != planes * 4:
        p["down_conv"] = _make_conv(keys[6], planes * 4, inplanes, 1)
        p["down_bn"] = _make_bn(keys[7], planes * 4)
    return p


def init_params(key, *, width=8, layers=(1, 1, 1, 1), output_dim=64,
                heads=4, input_resolution=32, num_classes=16):
    """Scaled-down CLIP ModifiedResNet (RN50 topology) + zeroshot weights."""
    keys = jax.random.split(key, 16)
    p = {}
    p["conv1"] = _make_conv(keys[0], width // 2, 3, 3)
    p["bn1"] = _make_bn(keys[1], width // 2)
    p["conv2"] = _make_conv(keys[2], width // 2, width // 2, 3)
    p["bn2"] = _make_bn(keys[3], width // 2)
    p["conv3"] = _make_conv(keys[4], width, width // 2, 3)
    p["bn3"] = _make_bn(keys[5], width)

    inplanes = width
    layer_keys = jax.random.split(keys[6], 4)
    for li, (mult, nblocks, stride) in enumerate(zip((1, 2, 4, 8), layers, (1, 2, 2, 2))):
        planes = width * mult
        bkeys = jax.random.split(layer_keys[li], nblocks)
        blocks = []
        for bi in range(nblocks):
            s = stride if bi == 0 else 1
            blocks.append(_make_bottleneck(bkeys[bi], inplanes, planes, s))
            inplanes = planes * 4
        p[f"layer{li + 1}"] = blocks

    embed_dim = width * 32
    spacial = input_resolution // 32
    akeys = jax.random.split(keys[7], 5)
    p["attnpool"] = dict(
        pos_emb=jax.random.normal(akeys[0], (spacial * spacial + 1, embed_dim),
                                  jnp.float32) / (embed_dim ** 0.5),
        q=_make_linear(akeys[1], embed_dim, embed_dim),
        k=_make_linear(akeys[2], embed_dim, embed_dim),
        v=_make_linear(akeys[3], embed_dim, embed_dim),
        c=_make_linear(akeys[4], output_dim, embed_dim),
    )
    p["num_heads"] = heads

    # zeroshot_weights: (embed_output_dim, num_classes), unit-norm columns,
    # mimicking normalized text class embeddings stacked along dim=1.
    zw = jax.random.normal(keys[8], (output_dim, num_classes), jnp.float32)
    p["zeroshot_weights"] = zw / jnp.linalg.norm(zw, axis=0, keepdims=True)
    return p


# ----------------------------------------------------------------------------
if __name__ == "__main__":
    key = jax.random.PRNGKey(0)
    pkey, xkey = jax.random.split(key)
    raw_params = init_params(pkey)
    params = prepare_params(raw_params)          # fold BN, transpose, bf16, pad
    # PyTorch-style NCHW image batch (small: batch=2, 3 channels, 32x32).
    x = jax.random.normal(xkey, (2, 3, 32, 32), jnp.float32)
    fwd = jax.jit(functools.partial(clip_with_labels_forward, params))
    logits = fwd(x)
    jax.block_until_ready(logits)
    assert logits.shape == (2, 16), logits.shape
    assert bool(jnp.all(jnp.isfinite(logits)))
    print("KERNEL_OK")
</pallas_src>

<mosaic_0001>
module attributes {stable_mosaic.version = 11 : i64} {
  func.func @_mm_noacc_kernel(%arg0: i32, %arg1: i32, %arg2: i32, %arg3: memref<256x27xbf16, #tpu.memory_space<vmem>>, %arg4: memref<27x128xbf16, #tpu.memory_space<vmem>>, %arg5: memref<1x128xf32, #tpu.memory_space<vmem>>, %arg6: memref<256x128xbf16, #tpu.memory_space<vmem>>) attributes {dimension_semantics = [#tpu.dimension_semantics<parallel>, #tpu.dimension_semantics<parallel>, #tpu.dimension_semantics<arbitrary>], iteration_bounds = array<i64: 2, 1, 1>, scalar_prefetch = 0 : i64, scratch_operands = 0 : i64, tpu.core_type = #tpu.core_type<tc>, window_params = [{transform_indices = @transform_0, window_bounds = array<i64: 256, 27>}, {transform_indices = @transform_1, window_bounds = array<i64: 27, 128>}, {transform_indices = @transform_2, window_bounds = array<i64: 1, 128>}, {transform_indices = @transform_3, window_bounds = array<i64: 256, 128>}]} {
    %c0 = arith.constant 0 : index
    %c0_0 = arith.constant 0 : index
    %0 = vector.load %arg3[%c0, %c0_0] : memref<256x27xbf16, #tpu.memory_space<vmem>>, vector<256x27xbf16>
    %c0_1 = arith.constant 0 : index
    %c0_2 = arith.constant 0 : index
    %1 = vector.load %arg4[%c0_1, %c0_2] : memref<27x128xbf16, #tpu.memory_space<vmem>>, vector<27x128xbf16>
    %cst = arith.constant dense<0.000000e+00> : vector<256x128xf32>
    %2 = tpu.matmul %0, %1, %cst {dimension_numbers = #tpu.dot_dimension_numbers<[1], [0], [0], [1], [0, 0, 1, 1], [], []>} : vector<256x27xbf16>, vector<27x128xbf16>, vector<256x128xf32> -> vector<256x128xf32>
    %c0_3 = arith.constant 0 : index
    %c0_4 = arith.constant 0 : index
    %3 = vector.load %arg5[%c0_3, %c0_4] : memref<1x128xf32, #tpu.memory_space<vmem>>, vector<1x128xf32>
    %4 = vector.broadcast %3 : vector<1x128xf32> to vector<256x128xf32>
    %5 = arith.addf %2, %4 : vector<256x128xf32>
    %cst_5 = arith.constant 0.000000e+00 : f32
    %6 = vector.broadcast %cst_5 : f32 to vector<256x128xf32>
    %7 = arith.maximumf %5, %6 : vector<256x128xf32>
    %8 = arith.truncf %7 : vector<256x128xf32> to vector<256x128xbf16>
    %c0_6 = arith.constant 0 : index
    %c0_7 = arith.constant 0 : index
    %9 = vector.load %arg6[%c0_6, %c0_7] : memref<256x128xbf16, #tpu.memory_space<vmem>>, vector<256x128xbf16>
    tpu.vector_store %arg6[%c0_6, %c0_7], %8 {strides = array<i32>} : memref<256x128xbf16, #tpu.memory_space<vmem>>, vector<256x128xbf16>,
    return
  }
  func.func @transform_0(%arg0: i32, %arg1: i32, %arg2: i32) -> (i32, i32) {
    %c0_i32 = arith.constant 0 : i32
    return %arg0, %arg2 : i32, i32
  }
  func.func @transform_1(%arg0: i32, %arg1: i32, %arg2: i32) -> (i32, i32) {
    %c0_i32 = arith.constant 0 : i32
    return %arg2, %arg1 : i32, i32
  }
  func.func @transform_2(%arg0: i32, %arg1: i32, %arg2: i32) -> (i32, i32) {
    %c0_i32 = arith.constant 0 : i32
    %c0_i32_0 = arith.constant 0 : i32
    return %c0_i32, %arg1 : i32, i32
  }
  func.func @transform_3(%arg0: i32, %arg1: i32, %arg2: i32) -> (i32, i32) {
    %c0_i32 = arith.constant 0 : i32
    return %arg0, %arg1 : i32, i32
  }
}

module attributes {stable_mosaic.version = 11 : i64} {
  func.func @_mm_acc_kernel(%arg0: i32, %arg1: i32, %arg2: i32, %arg3: memref<256x384xbf16, #tpu.memory_space<vmem>>, %arg4: memref<384x128xbf16, #tpu.memory_space<vmem>>, %arg5: memref<1x128xf32, #tpu.memory_space<vmem>>, %arg6: memref<256x128xbf16, #tpu.memory_space<vmem>>, %arg7: memref<256x128xf32, #tpu.memory_space<vmem>>) attributes {dimension_semantics = [#tpu.dimension_semantics<parallel>, #tpu.dimension_semantics<parallel>, #tpu.dimension_semantics<arbitrary>], iteration_bounds = array<i64: 2, 1, 3>, scalar_prefetch = 0 : i64, scratch_operands = 1 : i64, tpu.core_type = #tpu.core_type<tc>, window_params = [{transform_indices = @transform_0, window_bounds = array<i64: 256, 384>}, {transform_indices = @transform_1, window_bounds = array<i64: 384, 128>}, {transform_indices = @transform_2, window_bounds = array<i64: 1, 128>}, {transform_indices = @transform_3, window_bounds = array<i64: 256, 128>}]} {
    %c0_i32 = arith.constant 0 : i32
    %0 = arith.cmpi eq, %arg2, %c0_i32 : i32
    %1 = arith.extui %0 : i1 to i32
    %c0_i32_0 = arith.constant 0 : i32
    %2 = arith.cmpi ne, %1, %c0_i32_0 : i32
    scf.if %2 {
      %cst_9 = arith.constant 0.000000e+00 : f32
      %12 = vector.broadcast %cst_9 : f32 to vector<256x128xf32>
      %c0_10 = arith.constant 0 : index
      %c0_11 = arith.constant 0 : index
      %13 = vector.load %arg7[%c0_10, %c0_11] : memref<256x128xf32, #tpu.memory_space<vmem>>, vector<256x128xf32>
      tpu.vector_store %arg7[%c0_10, %c0_11], %12 {strides = array<i32>} : memref<256x128xf32, #tpu.memory_space<vmem>>, vector<256x128xf32>,
    } else {
    }
    %c0 = arith.constant 0 : index
    %c0_1 = arith.constant 0 : index
    %3 = vector.load %arg7[%c0, %c0_1] : memref<256x128xf32, #tpu.memory_space<vmem>>, vector<256x128xf32>
    %c0_2 = arith.constant 0 : index
    %c0_3 = arith.constant 0 : index
    %4 = vector.load %arg3[%c0_2, %c0_3] : memref<256x384xbf16, #tpu.memory_space<vmem>>, vector<256x384xbf16>
    %c0_4 = arith.constant 0 : index
    %c0_5 = arith.constant 0 : index
    %5 = vector.load %arg4[%c0_4, %c0_5] : memref<384x128xbf16, #tpu.memory_space<vmem>>, vector<384x128xbf16>
    %cst = arith.constant dense<0.000000e+00> : vector<256x128xf32>
    %6 = tpu.matmul %4, %5, %cst {dimension_numbers = #tpu.dot_dimension_numbers<[1], [0], [0], [1], [0, 0, 1, 1], [], []>} : vector<256x384xbf16>, vector<384x128xbf16>, vector<256x128xf32> -> vector<256x128xf32>
    %7 = arith.addf %3, %6 : vector<256x128xf32>
    %c0_6 = arith.constant 0 : index
    %c0_7 = arith.constant 0 : index
    %8 = vector.load %arg7[%c0_6, %c0_7] : memref<256x128xf32, #tpu.memory_space<vmem>>, vector<256x128xf32>
    tpu.vector_store %arg7[%c0_6, %c0_7], %7 {strides = array<i32>} : memref<256x128xf32, #tpu.memory_space<vmem>>, vector<256x128xf32>,
    %c2_i32 = arith.constant 2 : i32
    %9 = arith.cmpi eq, %arg2, %c2_i32 : i32
    %10 = arith.extui %9 : i1 to i32
    %c0_i32_8 = arith.constant 0 : i32
    %11 = arith.cmpi ne, %10, %c0_i32_8 : i32
    scf.if %11 {
      %c0_9 = arith.constant 0 : index
      %c0_10 = arith.constant 0 : index
      %12 = vector.load %arg7[%c0_9, %c0_10] : memref<256x128xf32, #tpu.memory_space<vmem>>, vector<256x128xf32>
      %c0_11 = arith.constant 0 : index
      %c0_12 = arith.constant 0 : index
      %13 = vector.load %arg5[%c0_11, %c0_12] : memref<1x128xf32, #tpu.memory_space<vmem>>, vector<1x128xf32>
      %14 = vector.broadcast %13 : vector<1x128xf32> to vector<256x128xf32>
      %15 = arith.addf %12, %14 : vector<256x128xf32>
      %cst_13 = arith.constant 0.000000e+00 : f32
      %16 = vector.broadcast %cst_13 : f32 to vector<256x128xf32>
      %17 = arith.maximumf %15, %16 : vector<256x128xf32>
      %18 = arith.truncf %17 : vector<256x128xf32> to vector<256x128xbf16>
      %c0_14 = arith.constant 0 : index
      %c0_15 = arith.constant 0 : index
      %19 = vector.load %arg6[%c0_14, %c0_15] : memref<256x128xbf16, #tpu.memory_space<vmem>>, vector<256x128xbf16>
      tpu.vector_store %arg6[%c0_14, %c0_15], %18 {strides = array<i32>} : memref<256x128xbf16, #tpu.memory_space<vmem>>, vector<256x128xbf16>,
    } else {
    }
    return
  }
  func.func @transform_0(%arg0: i32, %arg1: i32, %arg2: i32) -> (i32, i32) {
    %c0_i32 = arith.constant 0 : i32
    return %arg0, %arg2 : i32, i32
  }
  func.func @transform_1(%arg0: i32, %arg1: i32, %arg2: i32) -> (i32, i32) {
    %c0_i32 = arith.constant 0 : i32
    return %arg2, %arg1 : i32, i32
  }
  func.func @transform_2(%arg0: i32, %arg1: i32, %arg2: i32) -> (i32, i32) {
    %c0_i32 = arith.constant 0 : i32
    %c0_i32_0 = arith.constant 0 : i32
    return %c0_i32, %arg1 : i32, i32
  }
  func.func @transform_3(%arg0: i32, %arg1: i32, %arg2: i32) -> (i32, i32) {
    %c0_i32 = arith.constant 0 : i32
    return %arg0, %arg1 : i32, i32
  }
}

module attributes {stable_mosaic.version = 11 : i64} {
  func.func @_mm_noacc_kernel(%arg0: i32, %arg1: i32, %arg2: i32, %arg3: memref<128x128xbf16, #tpu.memory_space<vmem>>, %arg4: memref<128x128xbf16, #tpu.memory_space<vmem>>, %arg5: memref<1x128xf32, #tpu.memory_space<vmem>>, %arg6: memref<128x128xbf16, #tpu.memory_space<vmem>>) attributes {dimension_semantics = [#tpu.dimension_semantics<parallel>, #tpu.dimension_semantics<parallel>, #tpu.dimension_semantics<arbitrary>], iteration_bounds = array<i64: 1, 1, 1>, scalar_prefetch = 0 : i64, scratch_operands = 0 : i64, tpu.core_type = #tpu.core_type<tc>, window_params = [{transform_indices = @transform_0, window_bounds = array<i64: 128, 128>}, {transform_indices = @transform_1, window_bounds = array<i64: 128, 128>}, {transform_indices = @transform_2, window_bounds = array<i64: 1, 128>}, {transform_indices = @transform_3, window_bounds = array<i64: 128, 128>}]} {
    %c0 = arith.constant 0 : index
    %c0_0 = arith.constant 0 : index
    %0 = vector.load %arg3[%c0, %c0_0] : memref<128x128xbf16, #tpu.memory_space<vmem>>, vector<128x128xbf16>
    %c0_1 = arith.constant 0 : index
    %c0_2 = arith.constant 0 : index
    %1 = vector.load %arg4[%c0_1, %c0_2] : memref<128x128xbf16, #tpu.memory_space<vmem>>, vector<128x128xbf16>
    %cst = arith.constant dense<0.000000e+00> : vector<128x128xf32>
    %2 = tpu.matmul %0, %1, %cst {dimension_numbers = #tpu.dot_dimension_numbers<[1], [0], [0], [1], [0, 0, 1, 1], [], []>} : vector<128x128xbf16>, vector<128x128xbf16>, vector<128x128xf32> -> vector<128x128xf32>
    %c0_3 = arith.constant 0 : index
    %c0_4 = arith.constant 0 : index
    %3 = vector.load %arg5[%c0_3, %c0_4] : memref<1x128xf32, #tpu.memory_space<vmem>>, vector<1x128xf32>
    %4 = vector.broadcast %3 : vector<1x128xf32> to vector<128x128xf32>
    %5 = arith.addf %2, %4 : vector<128x128xf32>
    %6 = arith.truncf %5 : vector<128x128xf32> to vector<128x128xbf16>
    %c0_5 = arith.constant 0 : index
    %c0_6 = arith.constant 0 : index
    %7 = vector.load %arg6[%c0_5, %c0_6] : memref<128x128xbf16, #tpu.memory_space<vmem>>, vector<128x128xbf16>
    tpu.vector_store %arg6[%c0_5, %c0_6], %6 {strides = array<i32>} : memref<128x128xbf16, #tpu.memory_space<vmem>>, vector<128x128xbf16>,
    return
  }
  func.func @transform_0(%arg0: i32, %arg1: i32, %arg2: i32) -> (i32, i32) {
    %c0_i32 = arith.constant 0 : i32
    return %arg0, %arg2 : i32, i32
  }
  func.func @transform_1(%arg0: i32, %arg1: i32, %arg2: i32) -> (i32, i32) {
    %c0_i32 = arith.constant 0 : i32
    return %arg2, %arg1 : i32, i32
  }
  func.func @transform_2(%arg0: i32, %arg1: i32, %arg2: i32) -> (i32, i32) {
    %c0_i32 = arith.constant 0 : i32
    %c0_i32_0 = arith.constant 0 : i32
    return %c0_i32, %arg1 : i32, i32
  }
  func.func @transform_3(%arg0: i32, %arg1: i32, %arg2: i32) -> (i32, i32) {
    %c0_i32 = arith.constant 0 : i32
    return %arg0, %arg1 : i32, i32
  }
}

module attributes {stable_mosaic.version = 11 : i64} {
  func.func @_mm_noacc_kernel(%arg0: i32, %arg1: i32, %arg2: i32, %arg3: memref<128x128xbf16, #tpu.memory_space<vmem>>, %arg4: memref<128x128xbf16, #tpu.memory_space<vmem>>, %arg5: memref<1x128xf32, #tpu.memory_space<vmem>>, %arg6: memref<128x128xbf16, #tpu.memory_space<vmem>>) attributes {dimension_semantics = [#tpu.dimension_semantics<parallel>, #tpu.dimension_semantics<parallel>, #tpu.dimension_semantics<arbitrary>], iteration_bounds = array<i64: 1, 1, 1>, scalar_prefetch = 0 : i64, scratch_operands = 0 : i64, tpu.core_type = #tpu.core_type<tc>, window_params = [{transform_indices = @transform_0, window_bounds = array<i64: 128, 128>}, {transform_indices = @transform_1, window_bounds = array<i64: 128, 128>}, {transform_indices = @transform_2, window_bounds = array<i64: 1, 128>}, {transform_indices = @transform_3, window_bounds = array<i64: 128, 128>}]} {
    %c0 = arith.constant 0 : index
    %c0_0 = arith.constant 0 : index
    %0 = vector.load %arg3[%c0, %c0_0] : memref<128x128xbf16, #tpu.memory_space<vmem>>, vector<128x128xbf16>
    %c0_1 = arith.constant 0 : index
    %c0_2 = arith.constant 0 : index
    %1 = vector.load %arg4[%c0_1, %c0_2] : memref<128x128xbf16, #tpu.memory_space<vmem>>, vector<128x128xbf16>
    %cst = arith.constant dense<0.000000e+00> : vector<128x128xf32>
    %2 = tpu.matmul %0, %1, %cst {dimension_numbers = #tpu.dot_dimension_numbers<[1], [0], [0], [1], [0, 0, 1, 1], [], []>} : vector<128x128xbf16>, vector<128x128xbf16>, vector<128x128xf32> -> vector<128x128xf32>
    %c0_3 = arith.constant 0 : index
    %c0_4 = arith.constant 0 : index
    %3 = vector.load %arg5[%c0_3, %c0_4] : memref<1x128xf32, #tpu.memory_space<vmem>>, vector<1x128xf32>
    %4 = vector.broadcast %3 : vector<1x128xf32> to vector<128x128xf32>
    %5 = arith.addf %2, %4 : vector<128x128xf32>
    %cst_5 = arith.constant 0.000000e+00 : f32
    %6 = vector.broadcast %cst_5 : f32 to vector<128x128xf32>
    %7 = arith.maximumf %5, %6 : vector<128x128xf32>
    %8 = arith.truncf %7 : vector<128x128xf32> to vector<128x128xbf16>
    %c0_6 = arith.constant 0 : index
    %c0_7 = arith.constant 0 : index
    %9 = vector.load %arg6[%c0_6, %c0_7] : memref<128x128xbf16, #tpu.memory_space<vmem>>, vector<128x128xbf16>
    tpu.vector_store %arg6[%c0_6, %c0_7], %8 {strides = array<i32>} : memref<128x128xbf16, #tpu.memory_space<vmem>>, vector<128x128xbf16>,
    return
  }
  func.func @transform_0(%arg0: i32, %arg1: i32, %arg2: i32) -> (i32, i32) {
    %c0_i32 = arith.constant 0 : i32
    return %arg0, %arg2 : i32, i32
  }
  func.func @transform_1(%arg0: i32, %arg1: i32, %arg2: i32) -> (i32, i32) {
    %c0_i32 = arith.constant 0 : i32
    return %arg2, %arg1 : i32, i32
  }
  func.func @transform_2(%arg0: i32, %arg1: i32, %arg2: i32) -> (i32, i32) {
    %c0_i32 = arith.constant 0 : i32
    %c0_i32_0 = arith.constant 0 : i32
    return %c0_i32, %arg1 : i32, i32
  }
  func.func @transform_3(%arg0: i32, %arg1: i32, %arg2: i32) -> (i32, i32) {
    %c0_i32 = arith.constant 0 : i32
    return %arg0, %arg1 : i32, i32
  }
}

module attributes {stable_mosaic.version = 11 : i64} {
  func.func @_mm_noacc_kernel(%arg0: i32, %arg1: i32, %arg2: i32, %arg3: memref<128x128xbf16, #tpu.memory_space<vmem>>, %arg4: memref<128x128xbf16, #tpu.memory_space<vmem>>, %arg5: memref<1x128xf32, #tpu.memory_space<vmem>>, %arg6: memref<128x128xbf16, #tpu.memory_space<vmem>>, %arg7: memref<128x128xbf16, #tpu.memory_space<vmem>>) attributes {dimension_semantics = [#tpu.dimension_semantics<parallel>, #tpu.dimension_semantics<parallel>, #tpu.dimension_semantics<arbitrary>], iteration_bounds = array<i64: 1, 1, 1>, scalar_prefetch = 0 : i64, scratch_operands = 0 : i64, tpu.core_type = #tpu.core_type<tc>, window_params = [{transform_indices = @transform_0, window_bounds = array<i64: 128, 128>}, {transform_indices = @transform_1, window_bounds = array<i64: 128, 128>}, {transform_indices = @transform_2, window_bounds = array<i64: 1, 128>}, {transform_indices = @transform_3, window_bounds = array<i64: 128, 128>}, {transform_indices = @transform_4, window_bounds = array<i64: 128, 128>}]} {
    %c0 = arith.constant 0 : index
    %c0_0 = arith.constant 0 : index
    %0 = vector.load %arg3[%c0, %c0_0] : memref<128x128xbf16, #tpu.memory_space<vmem>>, vector<128x128xbf16>
    %c0_1 = arith.constant 0 : index
    %c0_2 = arith.constant 0 : index
    %1 = vector.load %arg4[%c0_1, %c0_2] : memref<128x128xbf16, #tpu.memory_space<vmem>>, vector<128x128xbf16>
    %cst = arith.constant dense<0.000000e+00> : vector<128x128xf32>
    %2 = tpu.matmul %0, %1, %cst {dimension_numbers = #tpu.dot_dimension_numbers<[1], [0], [0], [1], [0, 0, 1, 1], [], []>} : vector<128x128xbf16>, vector<128x128xbf16>, vector<128x128xf32> -> vector<128x128xf32>
    %c0_3 = arith.constant 0 : index
    %c0_4 = arith.constant 0 : index
    %3 = vector.load %arg5[%c0_3, %c0_4] : memref<1x128xf32, #tpu.memory_space<vmem>>, vector<1x128xf32>
    %4 = vector.broadcast %3 : vector<1x128xf32> to vector<128x128xf32>
    %5 = arith.addf %2, %4 : vector<128x128xf32>
    %c0_5 = arith.constant 0 : index
    %c0_6 = arith.constant 0 : index
    %6 = vector.load %arg6[%c0_5, %c0_6] : memref<128x128xbf16, #tpu.memory_space<vmem>>, vector<128x128xbf16>
    %7 = arith.extf %6 : vector<128x128xbf16> to vector<128x128xf32>
    %8 = arith.addf %5, %7 : vector<128x128xf32>
    %cst_7 = arith.constant 0.000000e+00 : f32
    %9 = vector.broadcast %cst_7 : f32 to vector<128x128xf32>
    %10 = arith.maximumf %8, %9 : vector<128x128xf32>
    %11 = arith.truncf %10 : vector<128x128xf32> to vector<128x128xbf16>
    %c0_8 = arith.constant 0 : index
    %c0_9 = arith.constant 0 : index
    %12 = vector.load %arg7[%c0_8, %c0_9] : memref<128x128xbf16, #tpu.memory_space<vmem>>, vector<128x128xbf16>
    tpu.vector_store %arg7[%c0_8, %c0_9], %11 {strides = array<i32>} : memref<128x128xbf16, #tpu.memory_space<vmem>>, vector<128x128xbf16>,
    return
  }
  func.func @transform_0(%arg0: i32, %arg1: i32, %arg2: i32) -> (i32, i32) {
    %c0_i32 = arith.constant 0 : i32
    return %arg0, %arg2 : i32, i32
  }
  func.func @transform_1(%arg0: i32, %arg1: i32, %arg2: i32) -> (i32, i32) {
    %c0_i32 = arith.constant 0 : i32
    return %arg2, %arg1 : i32, i32
  }
  func.func @transform_2(%arg0: i32, %arg1: i32, %arg2: i32) -> (i32, i32) {
    %c0_i32 = arith.constant 0 : i32
    %c0_i32_0 = arith.constant 0 : i32
    return %c0_i32, %arg1 : i32, i32
  }
  func.func @transform_3(%arg0: i32, %arg1: i32, %arg2: i32) -> (i32, i32) {
    %c0_i32 = arith.constant 0 : i32
    return %arg0, %arg1 : i32, i32
  }
  func.func @transform_4(%arg0: i32, %arg1: i32, %arg2: i32) -> (i32, i32) {
    %c0_i32 = arith.constant 0 : i32
    return %arg0, %arg1 : i32, i32
  }
}

module attributes {stable_mosaic.version = 11 : i64} {
  func.func @_mm_noacc_kernel(%arg0: i32, %arg1: i32, %arg2: i32, %arg3: memref<32x128xbf16, #tpu.memory_space<vmem>>, %arg4: memref<128x128xbf16, #tpu.memory_space<vmem>>, %arg5: memref<1x128xf32, #tpu.memory_space<vmem>>, %arg6: memref<32x128xbf16, #tpu.memory_space<vmem>>) attributes {dimension_semantics = [#tpu.dimension_semantics<parallel>, #tpu.dimension_semantics<parallel>, #tpu.dimension_semantics<arbitrary>], iteration_bounds = array<i64: 1, 1, 1>, scalar_prefetch = 0 : i64, scratch_operands = 0 : i64, tpu.core_type = #tpu.core_type<tc>, window_params = [{transform_indices = @transform_0, window_bounds = array<i64: 32, 128>}, {transform_indices = @transform_1, window_bounds = array<i64: 128, 128>}, {transform_indices = @transform_2, window_bounds = array<i64: 1, 128>}, {transform_indices = @transform_3, window_bounds = array<i64: 32, 128>}]} {
    %c0 = arith.constant 0 : index
    %c0_0 = arith.constant 0 : index
    %0 = vector.load %arg3[%c0, %c0_0] : memref<32x128xbf16, #tpu.memory_space<vmem>>, vector<32x128xbf16>
    %c0_1 = arith.constant 0 : index
    %c0_2 = arith.constant 0 : index
    %1 = vector.load %arg4[%c0_1, %c0_2] : memref<128x128xbf16, #tpu.memory_space<vmem>>, vector<128x128xbf16>
    %cst = arith.constant dense<0.000000e+00> : vector<32x128xf32>
    %2 = tpu.matmul %0, %1, %cst {dimension_numbers = #tpu.dot_dimension_numbers<[1], [0], [0], [1], [0, 0, 1, 1], [], []>} : vector<32x128xbf16>, vector<128x128xbf16>, vector<32x128xf32> -> vector<32x128xf32>
    %c0_3 = arith.constant 0 : index
    %c0_4 = arith.constant 0 : index
    %3 = vector.load %arg5[%c0_3, %c0_4] : memref<1x128xf32, #tpu.memory_space<vmem>>, vector<1x128xf32>
    %4 = vector.broadcast %3 : vector<1x128xf32> to vector<32x128xf32>
    %5 = arith.addf %2, %4 : vector<32x128xf32>
    %6 = arith.truncf %5 : vector<32x128xf32> to vector<32x128xbf16>
    %c0_5 = arith.constant 0 : index
    %c0_6 = arith.constant 0 : index
    %7 = vector.load %arg6[%c0_5, %c0_6] : memref<32x128xbf16, #tpu.memory_space<vmem>>, vector<32x128xbf16>
    tpu.vector_store %arg6[%c0_5, %c0_6], %6 {strides = array<i32>} : memref<32x128xbf16, #tpu.memory_space<vmem>>, vector<32x128xbf16>,
    return
  }
  func.func @transform_0(%arg0: i32, %arg1: i32, %arg2: i32) -> (i32, i32) {
    %c0_i32 = arith.constant 0 : i32
    return %arg0, %arg2 : i32, i32
  }
  func.func @transform_1(%arg0: i32, %arg1: i32, %arg2: i32) -> (i32, i32) {
    %c0_i32 = arith.constant 0 : i32
    return %arg2, %arg1 : i32, i32
  }
  func.func @transform_2(%arg0: i32, %arg1: i32, %arg2: i32) -> (i32, i32) {
    %c0_i32 = arith.constant 0 : i32
    %c0_i32_0 = arith.constant 0 : i32
    return %c0_i32, %arg1 : i32, i32
  }
  func.func @transform_3(%arg0: i32, %arg1: i32, %arg2: i32) -> (i32, i32) {
    %c0_i32 = arith.constant 0 : i32
    return %arg0, %arg1 : i32, i32
  }
}

module attributes {stable_mosaic.version = 11 : i64} {
  func.func @_mm_acc_kernel(%arg0: i32, %arg1: i32, %arg2: i32, %arg3: memref<128x384xbf16, #tpu.memory_space<vmem>>, %arg4: memref<384x128xbf16, #tpu.memory_space<vmem>>, %arg5: memref<1x128xf32, #tpu.memory_space<vmem>>, %arg6: memref<128x128xbf16, #tpu.memory_space<vmem>>, %arg7: memref<128x128xf32, #tpu.memory_space<vmem>>) attributes {dimension_semantics = [#tpu.dimension_semantics<parallel>, #tpu.dimension_semantics<parallel>, #tpu.dimension_semantics<arbitrary>], iteration_bounds = array<i64: 1, 1, 3>, scalar_prefetch = 0 : i64, scratch_operands = 1 : i64, tpu.core_type = #tpu.core_type<tc>, window_params = [{transform_indices = @transform_0, window_bounds = array<i64: 128, 384>}, {transform_indices = @transform_1, window_bounds = array<i64: 384, 128>}, {transform_indices = @transform_2, window_bounds = array<i64: 1, 128>}, {transform_indices = @transform_3, window_bounds = array<i64: 128, 128>}]} {
    %c0_i32 = arith.constant 0 : i32
    %0 = arith.cmpi eq, %arg2, %c0_i32 : i32
    %1 = arith.extui %0 : i1 to i32
    %c0_i32_0 = arith.constant 0 : i32
    %2 = arith.cmpi ne, %1, %c0_i32_0 : i32
    scf.if %2 {
      %cst_9 = arith.constant 0.000000e+00 : f32
      %12 = vector.broadcast %cst_9 : f32 to vector<128x128xf32>
      %c0_10 = arith.constant 0 : index
      %c0_11 = arith.constant 0 : index
      %13 = vector.load %arg7[%c0_10, %c0_11] : memref<128x128xf32, #tpu.memory_space<vmem>>, vector<128x128xf32>
      tpu.vector_store %arg7[%c0_10, %c0_11], %12 {strides = array<i32>} : memref<128x128xf32, #tpu.memory_space<vmem>>, vector<128x128xf32>,
    } else {
    }
    %c0 = arith.constant 0 : index
    %c0_1 = arith.constant 0 : index
    %3 = vector.load %arg7[%c0, %c0_1] : memref<128x128xf32, #tpu.memory_space<vmem>>, vector<128x128xf32>
    %c0_2 = arith.constant 0 : index
    %c0_3 = arith.constant 0 : index
    %4 = vector.load %arg3[%c0_2, %c0_3] : memref<128x384xbf16, #tpu.memory_space<vmem>>, vector<128x384xbf16>
    %c0_4 = arith.constant 0 : index
    %c0_5 = arith.constant 0 : index
    %5 = vector.load %arg4[%c0_4, %c0_5] : memref<384x128xbf16, #tpu.memory_space<vmem>>, vector<384x128xbf16>
    %cst = arith.constant dense<0.000000e+00> : vector<128x128xf32>
    %6 = tpu.matmul %4, %5, %cst {dimension_numbers = #tpu.dot_dimension_numbers<[1], [0], [0], [1], [0, 0, 1, 1], [], []>} : vector<128x384xbf16>, vector<384x128xbf16>, vector<128x128xf32> -> vector<128x128xf32>
    %7 = arith.addf %3, %6 : vector<128x128xf32>
    %c0_6 = arith.constant 0 : index
    %c0_7 = arith.constant 0 : index
    %8 = vector.load %arg7[%c0_6, %c0_7] : memref<128x128xf32, #tpu.memory_space<vmem>>, vector<128x128xf32>
    tpu.vector_store %arg7[%c0_6, %c0_7], %7 {strides = array<i32>} : memref<128x128xf32, #tpu.memory_space<vmem>>, vector<128x128xf32>,
    %c2_i32 = arith.constant 2 : i32
    %9 = arith.cmpi eq, %arg2, %c2_i32 : i32
    %10 = arith.extui %9 : i1 to i32
    %c0_i32_8 = arith.constant 0 : i32
    %11 = arith.cmpi ne, %10, %c0_i32_8 : i32
    scf.if %11 {
      %c0_9 = arith.constant 0 : index
      %c0_10 = arith.constant 0 : index
      %12 = vector.load %arg7[%c0_9, %c0_10] : memref<128x128xf32, #tpu.memory_space<vmem>>, vector<128x128xf32>
      %c0_11 = arith.constant 0 : index
      %c0_12 = arith.constant 0 : index
      %13 = vector.load %arg5[%c0_11, %c0_12] : memref<1x128xf32, #tpu.memory_space<vmem>>, vector<1x128xf32>
      %14 = vector.broadcast %13 : vector<1x128xf32> to vector<128x128xf32>
      %15 = arith.addf %12, %14 : vector<128x128xf32>
      %cst_13 = arith.constant 0.000000e+00 : f32
      %16 = vector.broadcast %cst_13 : f32 to vector<128x128xf32>
      %17 = arith.maximumf %15, %16 : vector<128x128xf32>
      %18 = arith.truncf %17 : vector<128x128xf32> to vector<128x128xbf16>
      %c0_14 = arith.constant 0 : index
      %c0_15 = arith.constant 0 : index
      %19 = vector.load %arg6[%c0_14, %c0_15] : memref<128x128xbf16, #tpu.memory_space<vmem>>, vector<128x128xbf16>
      tpu.vector_store %arg6[%c0_14, %c0_15], %18 {strides = array<i32>} : memref<128x128xbf16, #tpu.memory_space<vmem>>, vector<128x128xbf16>,
    } else {
    }
    return
  }
  func.func @transform_0(%arg0: i32, %arg1: i32, %arg2: i32) -> (i32, i32) {
    %c0_i32 = arith.constant 0 : i32
    return %arg0, %arg2 : i32, i32
  }
  func.func @transform_1(%arg0: i32, %arg1: i32, %arg2: i32) -> (i32, i32) {
    %c0_i32 = arith.constant 0 : i32
    return %arg2, %arg1 : i32, i32
  }
  func.func @transform_2(%arg0: i32, %arg1: i32, %arg2: i32) -> (i32, i32) {
    %c0_i32 = arith.constant 0 : i32
    %c0_i32_0 = arith.constant 0 : i32
    return %c0_i32, %arg1 : i32, i32
  }
  func.func @transform_3(%arg0: i32, %arg1: i32, %arg2: i32) -> (i32, i32) {
    %c0_i32 = arith.constant 0 : i32
    return %arg0, %arg1 : i32, i32
  }
}

module attributes {stable_mosaic.version = 11 : i64} {
  func.func @_mm_noacc_kernel(%arg0: i32, %arg1: i32, %arg2: i32, %arg3: memref<32x128xbf16, #tpu.memory_space<vmem>>, %arg4: memref<128x128xbf16, #tpu.memory_space<vmem>>, %arg5: memref<1x128xf32, #tpu.memory_space<vmem>>, %arg6: memref<32x128xbf16, #tpu.memory_space<vmem>>, %arg7: memref<32x128xbf16, #tpu.memory_space<vmem>>) attributes {dimension_semantics = [#tpu.dimension_semantics<parallel>, #tpu.dimension_semantics<parallel>, #tpu.dimension_semantics<arbitrary>], iteration_bounds = array<i64: 1, 1, 1>, scalar_prefetch = 0 : i64, scratch_operands = 0 : i64, tpu.core_type = #tpu.core_type<tc>, window_params = [{transform_indices = @transform_0, window_bounds = array<i64: 32, 128>}, {transform_indices = @transform_1, window_bounds = array<i64: 128, 128>}, {transform_indices = @transform_2, window_bounds = array<i64: 1, 128>}, {transform_indices = @transform_3, window_bounds = array<i64: 32, 128>}, {transform_indices = @transform_4, window_bounds = array<i64: 32, 128>}]} {
    %c0 = arith.constant 0 : index
    %c0_0 = arith.constant 0 : index
    %0 = vector.load %arg3[%c0, %c0_0] : memref<32x128xbf16, #tpu.memory_space<vmem>>, vector<32x128xbf16>
    %c0_1 = arith.constant 0 : index
    %c0_2 = arith.constant 0 : index
    %1 = vector.load %arg4[%c0_1, %c0_2] : memref<128x128xbf16, #tpu.memory_space<vmem>>, vector<128x128xbf16>
    %cst = arith.constant dense<0.000000e+00> : vector<32x128xf32>
    %2 = tpu.matmul %0, %1, %cst {dimension_numbers = #tpu.dot_dimension_numbers<[1], [0], [0], [1], [0, 0, 1, 1], [], []>} : vector<32x128xbf16>, vector<128x128xbf16>, vector<32x128xf32> -> vector<32x128xf32>
    %c0_3 = arith.constant 0 : index
    %c0_4 = arith.constant 0 : index
    %3 = vector.load %arg5[%c0_3, %c0_4] : memref<1x128xf32, #tpu.memory_space<vmem>>, vector<1x128xf32>
    %4 = vector.broadcast %3 : vector<1x128xf32> to vector<32x128xf32>
    %5 = arith.addf %2, %4 : vector<32x128xf32>
    %c0_5 = arith.constant 0 : index
    %c0_6 = arith.constant 0 : index
    %6 = vector.load %arg6[%c0_5, %c0_6] : memref<32x128xbf16, #tpu.memory_space<vmem>>, vector<32x128xbf16>
    %7 = arith.extf %6 : vector<32x128xbf16> to vector<32x128xf32>
    %8 = arith.addf %5, %7 : vector<32x128xf32>
    %cst_7 = arith.constant 0.000000e+00 : f32
    %9 = vector.broadcast %cst_7 : f32 to vector<32x128xf32>
    %10 = arith.maximumf %8, %9 : vector<32x128xf32>
    %11 = arith.truncf %10 : vector<32x128xf32> to vector<32x128xbf16>
    %c0_8 = arith.constant 0 : index
    %c0_9 = arith.constant 0 : index
    %12 = vector.load %arg7[%c0_8, %c0_9] : memref<32x128xbf16, #tpu.memory_space<vmem>>, vector<32x128xbf16>
    tpu.vector_store %arg7[%c0_8, %c0_9], %11 {strides = array<i32>} : memref<32x128xbf16, #tpu.memory_space<vmem>>, vector<32x128xbf16>,
    return
  }
  func.func @transform_0(%arg0: i32, %arg1: i32, %arg2: i32) -> (i32, i32) {
    %c0_i32 = arith.constant 0 : i32
    return %arg0, %arg2 : i32, i32
  }
  func.func @transform_1(%arg0: i32, %arg1: i32, %arg2: i32) -> (i32, i32) {
    %c0_i32 = arith.constant 0 : i32
    return %arg2, %arg1 : i32, i32
  }
  func.func @transform_2(%arg0: i32, %arg1: i32, %arg2: i32) -> (i32, i32) {
    %c0_i32 = arith.constant 0 : i32
    %c0_i32_0 = arith.constant 0 : i32
    return %c0_i32, %arg1 : i32, i32
  }
  func.func @transform_3(%arg0: i32, %arg1: i32, %arg2: i32) -> (i32, i32) {
    %c0_i32 = arith.constant 0 : i32
    return %arg0, %arg1 : i32, i32
  }
  func.func @transform_4(%arg0: i32, %arg1: i32, %arg2: i32) -> (i32, i32) {
    %c0_i32 = arith.constant 0 : i32
    return %arg0, %arg1 : i32, i32
  }
}

module attributes {stable_mosaic.version = 11 : i64} {
  func.func @_mm_noacc_kernel(%arg0: i32, %arg1: i32, %arg2: i32, %arg3: memref<32x128xbf16, #tpu.memory_space<vmem>>, %arg4: memref<128x128xbf16, #tpu.memory_space<vmem>>, %arg5: memref<1x128xf32, #tpu.memory_space<vmem>>, %arg6: memref<32x128xbf16, #tpu.memory_space<vmem>>) attributes {dimension_semantics = [#tpu.dimension_semantics<parallel>, #tpu.dimension_semantics<parallel>, #tpu.dimension_semantics<arbitrary>], iteration_bounds = array<i64: 1, 1, 1>, scalar_prefetch = 0 : i64, scratch_operands = 0 : i64, tpu.core_type = #tpu.core_type<tc>, window_params = [{transform_indices = @transform_0, window_bounds = array<i64: 32, 128>}, {transform_indices = @transform_1, window_bounds = array<i64: 128, 128>}, {transform_indices = @transform_2, window_bounds = array<i64: 1, 128>}, {transform_indices = @transform_3, window_bounds = array<i64: 32, 128>}]} {
    %c0 = arith.constant 0 : index
    %c0_0 = arith.constant 0 : index
    %0 = vector.load %arg3[%c0, %c0_0] : memref<32x128xbf16, #tpu.memory_space<vmem>>, vector<32x128xbf16>
    %c0_1 = arith.constant 0 : index
    %c0_2 = arith.constant 0 : index
    %1 = vector.load %arg4[%c0_1, %c0_2] : memref<128x128xbf16, #tpu.memory_space<vmem>>, vector<128x128xbf16>
    %cst = arith.constant dense<0.000000e+00> : vector<32x128xf32>
    %2 = tpu.matmul %0, %1, %cst {dimension_numbers = #tpu.dot_dimension_numbers<[1], [0], [0], [1], [0, 0, 1, 1], [], []>} : vector<32x128xbf16>, vector<128x128xbf16>, vector<32x128xf32> -> vector<32x128xf32>
    %c0_3 = arith.constant 0 : index
    %c0_4 = arith.constant 0 : index
    %3 = vector.load %arg5[%c0_3, %c0_4] : memref<1x128xf32, #tpu.memory_space<vmem>>, vector<1x128xf32>
    %4 = vector.broadcast %3 : vector<1x128xf32> to vector<32x128xf32>
    %5 = arith.addf %2, %4 : vector<32x128xf32>
    %cst_5 = arith.constant 0.000000e+00 : f32
    %6 = vector.broadcast %cst_5 : f32 to vector<32x128xf32>
    %7 = arith.maximumf %5, %6 : vector<32x128xf32>
    %8 = arith.truncf %7 : vector<32x128xf32> to vector<32x128xbf16>
    %c0_6 = arith.constant 0 : index
    %c0_7 = arith.constant 0 : index
    %9 = vector.load %arg6[%c0_6, %c0_7] : memref<32x128xbf16, #tpu.memory_space<vmem>>, vector<32x128xbf16>
    tpu.vector_store %arg6[%c0_6, %c0_7], %8 {strides = array<i32>} : memref<32x128xbf16, #tpu.memory_space<vmem>>, vector<32x128xbf16>,
    return
  }
  func.func @transform_0(%arg0: i32, %arg1: i32, %arg2: i32) -> (i32, i32) {
    %c0_i32 = arith.constant 0 : i32
    return %arg0, %arg2 : i32, i32
  }
  func.func @transform_1(%arg0: i32, %arg1: i32, %arg2: i32) -> (i32, i32) {
    %c0_i32 = arith.constant 0 : i32
    return %arg2, %arg1 : i32, i32
  }
  func.func @transform_2(%arg0: i32, %arg1: i32, %arg2: i32) -> (i32, i32) {
    %c0_i32 = arith.constant 0 : i32
    %c0_i32_0 = arith.constant 0 : i32
    return %c0_i32, %arg1 : i32, i32
  }
  func.func @transform_3(%arg0: i32, %arg1: i32, %arg2: i32) -> (i32, i32) {
    %c0_i32 = arith.constant 0 : i32
    return %arg0, %arg1 : i32, i32
  }
}

module attributes {stable_mosaic.version = 11 : i64} {
  func.func @_mm_noacc_kernel(%arg0: i32, %arg1: i32, %arg2: i32, %arg3: memref<8x128xbf16, #tpu.memory_space<vmem>>, %arg4: memref<128x128xbf16, #tpu.memory_space<vmem>>, %arg5: memref<1x128xf32, #tpu.memory_space<vmem>>, %arg6: memref<8x128xbf16, #tpu.memory_space<vmem>>) attributes {dimension_semantics = [#tpu.dimension_semantics<parallel>, #tpu.dimension_semantics<parallel>, #tpu.dimension_semantics<arbitrary>], iteration_bounds = array<i64: 1, 1, 1>, scalar_prefetch = 0 : i64, scratch_operands = 0 : i64, tpu.core_type = #tpu.core_type<tc>, window_params = [{transform_indices = @transform_0, window_bounds = array<i64: 8, 128>}, {transform_indices = @transform_1, window_bounds = array<i64: 128, 128>}, {transform_indices = @transform_2, window_bounds = array<i64: 1, 128>}, {transform_indices = @transform_3, window_bounds = array<i64: 8, 128>}]} {
    %c0 = arith.constant 0 : index
    %c0_0 = arith.constant 0 : index
    %0 = vector.load %arg3[%c0, %c0_0] : memref<8x128xbf16, #tpu.memory_space<vmem>>, vector<8x128xbf16>
    %c0_1 = arith.constant 0 : index
    %c0_2 = arith.constant 0 : index
    %1 = vector.load %arg4[%c0_1, %c0_2] : memref<128x128xbf16, #tpu.memory_space<vmem>>, vector<128x128xbf16>
    %cst = arith.constant dense<0.000000e+00> : vector<8x128xf32>
    %2 = tpu.matmul %0, %1, %cst {dimension_numbers = #tpu.dot_dimension_numbers<[1], [0], [0], [1], [0, 0, 1, 1], [], []>} : vector<8x128xbf16>, vector<128x128xbf16>, vector<8x128xf32> -> vector<8x128xf32>
    %c0_3 = arith.constant 0 : index
    %c0_4 = arith.constant 0 : index
    %3 = vector.load %arg5[%c0_3, %c0_4] : memref<1x128xf32, #tpu.memory_space<vmem>>, vector<1x128xf32>
    %4 = vector.broadcast %3 : vector<1x128xf32> to vector<8x128xf32>
    %5 = arith.addf %2, %4 : vector<8x128xf32>
    %6 = arith.truncf %5 : vector<8x128xf32> to vector<8x128xbf16>
    %c0_5 = arith.constant 0 : index
    %c0_6 = arith.constant 0 : index
    %7 = vector.load %arg6[%c0_5, %c0_6] : memref<8x128xbf16, #tpu.memory_space<vmem>>, vector<8x128xbf16>
    tpu.vector_store %arg6[%c0_5, %c0_6], %6 {strides = array<i32>} : memref<8x128xbf16, #tpu.memory_space<vmem>>, vector<8x128xbf16>,
    return
  }
  func.func @transform_0(%arg0: i32, %arg1: i32, %arg2: i32) -> (i32, i32) {
    %c0_i32 = arith.constant 0 : i32
    return %arg0, %arg2 : i32, i32
  }
  func.func @transform_1(%arg0: i32, %arg1: i32, %arg2: i32) -> (i32, i32) {
    %c0_i32 = arith.constant 0 : i32
    return %arg2, %arg1 : i32, i32
  }
  func.func @transform_2(%arg0: i32, %arg1: i32, %arg2: i32) -> (i32, i32) {
    %c0_i32 = arith.constant 0 : i32
    %c0_i32_0 = arith.constant 0 : i32
    return %c0_i32, %arg1 : i32, i32
  }
  func.func @transform_3(%arg0: i32, %arg1: i32, %arg2: i32) -> (i32, i32) {
    %c0_i32 = arith.constant 0 : i32
    return %arg0, %arg1 : i32, i32
  }
}

module attributes {stable_mosaic.version = 11 : i64} {
  func.func @_mm_noacc_kernel(%arg0: i32, %arg1: i32, %arg2: i32, %arg3: memref<8x128xbf16, #tpu.memory_space<vmem>>, %arg4: memref<128x128xbf16, #tpu.memory_space<vmem>>, %arg5: memref<1x128xf32, #tpu.memory_space<vmem>>, %arg6: memref<8x128xbf16, #tpu.memory_space<vmem>>) attributes {dimension_semantics = [#tpu.dimension_semantics<parallel>, #tpu.dimension_semantics<parallel>, #tpu.dimension_semantics<arbitrary>], iteration_bounds = array<i64: 1, 1, 1>, scalar_prefetch = 0 : i64, scratch_operands = 0 : i64, tpu.core_type = #tpu.core_type<tc>, window_params = [{transform_indices = @transform_0, window_bounds = array<i64: 8, 128>}, {transform_indices = @transform_1, window_bounds = array<i64: 128, 128>}, {transform_indices = @transform_2, window_bounds = array<i64: 1, 128>}, {transform_indices = @transform_3, window_bounds = array<i64: 8, 128>}]} {
    %c0 = arith.constant 0 : index
    %c0_0 = arith.constant 0 : index
    %0 = vector.load %arg3[%c0, %c0_0] : memref<8x128xbf16, #tpu.memory_space<vmem>>, vector<8x128xbf16>
    %c0_1 = arith.constant 0 : index
    %c0_2 = arith.constant 0 : index
    %1 = vector.load %arg4[%c0_1, %c0_2] : memref<128x128xbf16, #tpu.memory_space<vmem>>, vector<128x128xbf16>
    %cst = arith.constant dense<0.000000e+00> : vector<8x128xf32>
    %2 = tpu.matmul %0, %1, %cst {dimension_numbers = #tpu.dot_dimension_numbers<[1], [0], [0], [1], [0, 0, 1, 1], [], []>} : vector<8x128xbf16>, vector<128x128xbf16>, vector<8x128xf32> -> vector<8x128xf32>
    %c0_3 = arith.constant 0 : index
    %c0_4 = arith.constant 0 : index
    %3 = vector.load %arg5[%c0_3, %c0_4] : memref<1x128xf32, #tpu.memory_space<vmem>>, vector<1x128xf32>
    %4 = vector.broadcast %3 : vector<1x128xf32> to vector<8x128xf32>
    %5 = arith.addf %2, %4 : vector<8x128xf32>
    %cst_5 = arith.constant 0.000000e+00 : f32
    %6 = vector.broadcast %cst_5 : f32 to vector<8x128xf32>
    %7 = arith.maximumf %5, %6 : vector<8x128xf32>
    %8 = arith.truncf %7 : vector<8x128xf32> to vector<8x128xbf16>
    %c0_6 = arith.constant 0 : index
    %c0_7 = arith.constant 0 : index
    %9 = vector.load %arg6[%c0_6, %c0_7] : memref<8x128xbf16, #tpu.memory_space<vmem>>, vector<8x128xbf16>
    tpu.vector_store %arg6[%c0_6, %c0_7], %8 {strides = array<i32>} : memref<8x128xbf16, #tpu.memory_space<vmem>>, vector<8x128xbf16>,
    return
  }
  func.func @transform_0(%arg0: i32, %arg1: i32, %arg2: i32) -> (i32, i32) {
    %c0_i32 = arith.constant 0 : i32
    return %arg0, %arg2 : i32, i32
  }
  func.func @transform_1(%arg0: i32, %arg1: i32, %arg2: i32) -> (i32, i32) {
    %c0_i32 = arith.constant 0 : i32
    return %arg2, %arg1 : i32, i32
  }
  func.func @transform_2(%arg0: i32, %arg1: i32, %arg2: i32) -> (i32, i32) {
    %c0_i32 = arith.constant 0 : i32
    %c0_i32_0 = arith.constant 0 : i32
    return %c0_i32, %arg1 : i32, i32
  }
  func.func @transform_3(%arg0: i32, %arg1: i32, %arg2: i32) -> (i32, i32) {
    %c0_i32 = arith.constant 0 : i32
    return %arg0, %arg1 : i32, i32
  }
}

module attributes {stable_mosaic.version = 11 : i64} {
  func.func @_mm_acc_kernel(%arg0: i32, %arg1: i32, %arg2: i32, %arg3: memref<32x384xbf16, #tpu.memory_space<vmem>>, %arg4: memref<384x128xbf16, #tpu.memory_space<vmem>>, %arg5: memref<1x128xf32, #tpu.memory_space<vmem>>, %arg6: memref<32x128xbf16, #tpu.memory_space<vmem>>, %arg7: memref<32x128xf32, #tpu.memory_space<vmem>>) attributes {dimension_semantics = [#tpu.dimension_semantics<parallel>, #tpu.dimension_semantics<parallel>, #tpu.dimension_semantics<arbitrary>], iteration_bounds = array<i64: 1, 1, 3>, scalar_prefetch = 0 : i64, scratch_operands = 1 : i64, tpu.core_type = #tpu.core_type<tc>, window_params = [{transform_indices = @transform_0, window_bounds = array<i64: 32, 384>}, {transform_indices = @transform_1, window_bounds = array<i64: 384, 128>}, {transform_indices = @transform_2, window_bounds = array<i64: 1, 128>}, {transform_indices = @transform_3, window_bounds = array<i64: 32, 128>}]} {
    %c0_i32 = arith.constant 0 : i32
    %0 = arith.cmpi eq, %arg2, %c0_i32 : i32
    %1 = arith.extui %0 : i1 to i32
    %c0_i32_0 = arith.constant 0 : i32
    %2 = arith.cmpi ne, %1, %c0_i32_0 : i32
    scf.if %2 {
      %cst_9 = arith.constant 0.000000e+00 : f32
      %12 = vector.broadcast %cst_9 : f32 to vector<32x128xf32>
      %c0_10 = arith.constant 0 : index
      %c0_11 = arith.constant 0 : index
      %13 = vector.load %arg7[%c0_10, %c0_11] : memref<32x128xf32, #tpu.memory_space<vmem>>, vector<32x128xf32>
      tpu.vector_store %arg7[%c0_10, %c0_11], %12 {strides = array<i32>} : memref<32x128xf32, #tpu.memory_space<vmem>>, vector<32x128xf32>,
    } else {
    }
    %c0 = arith.constant 0 : index
    %c0_1 = arith.constant 0 : index
    %3 = vector.load %arg7[%c0, %c0_1] : memref<32x128xf32, #tpu.memory_space<vmem>>, vector<32x128xf32>
    %c0_2 = arith.constant 0 : index
    %c0_3 = arith.constant 0 : index
    %4 = vector.load %arg3[%c0_2, %c0_3] : memref<32x384xbf16, #tpu.memory_space<vmem>>, vector<32x384xbf16>
    %c0_4 = arith.constant 0 : index
    %c0_5 = arith.constant 0 : index
    %5 = vector.load %arg4[%c0_4, %c0_5] : memref<384x128xbf16, #tpu.memory_space<vmem>>, vector<384x128xbf16>
    %cst = arith.constant dense<0.000000e+00> : vector<32x128xf32>
    %6 = tpu.matmul %4, %5, %cst {dimension_numbers = #tpu.dot_dimension_numbers<[1], [0], [0], [1], [0, 0, 1, 1], [], []>} : vector<32x384xbf16>, vector<384x128xbf16>, vector<32x128xf32> -> vector<32x128xf32>
    %7 = arith.addf %3, %6 : vector<32x128xf32>
    %c0_6 = arith.constant 0 : index
    %c0_7 = arith.constant 0 : index
    %8 = vector.load %arg7[%c0_6, %c0_7] : memref<32x128xf32, #tpu.memory_space<vmem>>, vector<32x128xf32>
    tpu.vector_store %arg7[%c0_6, %c0_7], %7 {strides = array<i32>} : memref<32x128xf32, #tpu.memory_space<vmem>>, vector<32x128xf32>,
    %c2_i32 = arith.constant 2 : i32
    %9 = arith.cmpi eq, %arg2, %c2_i32 : i32
    %10 = arith.extui %9 : i1 to i32
    %c0_i32_8 = arith.constant 0 : i32
    %11 = arith.cmpi ne, %10, %c0_i32_8 : i32
    scf.if %11 {
      %c0_9 = arith.constant 0 : index
      %c0_10 = arith.constant 0 : index
      %12 = vector.load %arg7[%c0_9, %c0_10] : memref<32x128xf32, #tpu.memory_space<vmem>>, vector<32x128xf32>
      %c0_11 = arith.constant 0 : index
      %c0_12 = arith.constant 0 : index
      %13 = vector.load %arg5[%c0_11, %c0_12] : memref<1x128xf32, #tpu.memory_space<vmem>>, vector<1x128xf32>
      %14 = vector.broadcast %13 : vector<1x128xf32> to vector<32x128xf32>
      %15 = arith.addf %12, %14 : vector<32x128xf32>
      %cst_13 = arith.constant 0.000000e+00 : f32
      %16 = vector.broadcast %cst_13 : f32 to vector<32x128xf32>
      %17 = arith.maximumf %15, %16 : vector<32x128xf32>
      %18 = arith.truncf %17 : vector<32x128xf32> to vector<32x128xbf16>
      %c0_14 = arith.constant 0 : index
      %c0_15 = arith.constant 0 : index
      %19 = vector.load %arg6[%c0_14, %c0_15] : memref<32x128xbf16, #tpu.memory_space<vmem>>, vector<32x128xbf16>
      tpu.vector_store %arg6[%c0_14, %c0_15], %18 {strides = array<i32>} : memref<32x128xbf16, #tpu.memory_space<vmem>>, vector<32x128xbf16>,
    } else {
    }
    return
  }
  func.func @transform_0(%arg0: i32, %arg1: i32, %arg2: i32) -> (i32, i32) {
    %c0_i32 = arith.constant 0 : i32
    return %arg0, %arg2 : i32, i32
  }
  func.func @transform_1(%arg0: i32, %arg1: i32, %arg2: i32) -> (i32, i32) {
    %c0_i32 = arith.constant 0 : i32
    return %arg2, %arg1 : i32, i32
  }
  func.func @transform_2(%arg0: i32, %arg1: i32, %arg2: i32) -> (i32, i32) {
    %c0_i32 = arith.constant 0 : i32
    %c0_i32_0 = arith.constant 0 : i32
    return %c0_i32, %arg1 : i32, i32
  }
  func.func @transform_3(%arg0: i32, %arg1: i32, %arg2: i32) -> (i32, i32) {
    %c0_i32 = arith.constant 0 : i32
    return %arg0, %arg1 : i32, i32
  }
}

module attributes {stable_mosaic.version = 11 : i64} {
  func.func @_mm_noacc_kernel(%arg0: i32, %arg1: i32, %arg2: i32, %arg3: memref<8x128xbf16, #tpu.memory_space<vmem>>, %arg4: memref<128x128xbf16, #tpu.memory_space<vmem>>, %arg5: memref<1x128xf32, #tpu.memory_space<vmem>>, %arg6: memref<8x128xbf16, #tpu.memory_space<vmem>>, %arg7: memref<8x128xbf16, #tpu.memory_space<vmem>>) attributes {dimension_semantics = [#tpu.dimension_semantics<parallel>, #tpu.dimension_semantics<parallel>, #tpu.dimension_semantics<arbitrary>], iteration_bounds = array<i64: 1, 1, 1>, scalar_prefetch = 0 : i64, scratch_operands = 0 : i64, tpu.core_type = #tpu.core_type<tc>, window_params = [{transform_indices = @transform_0, window_bounds = array<i64: 8, 128>}, {transform_indices = @transform_1, window_bounds = array<i64: 128, 128>}, {transform_indices = @transform_2, window_bounds = array<i64: 1, 128>}, {transform_indices = @transform_3, window_bounds = array<i64: 8, 128>}, {transform_indices = @transform_4, window_bounds = array<i64: 8, 128>}]} {
    %c0 = arith.constant 0 : index
    %c0_0 = arith.constant 0 : index
    %0 = vector.load %arg3[%c0, %c0_0] : memref<8x128xbf16, #tpu.memory_space<vmem>>, vector<8x128xbf16>
    %c0_1 = arith.constant 0 : index
    %c0_2 = arith.constant 0 : index
    %1 = vector.load %arg4[%c0_1, %c0_2] : memref<128x128xbf16, #tpu.memory_space<vmem>>, vector<128x128xbf16>
    %cst = arith.constant dense<0.000000e+00> : vector<8x128xf32>
    %2 = tpu.matmul %0, %1, %cst {dimension_numbers = #tpu.dot_dimension_numbers<[1], [0], [0], [1], [0, 0, 1, 1], [], []>} : vector<8x128xbf16>, vector<128x128xbf16>, vector<8x128xf32> -> vector<8x128xf32>
    %c0_3 = arith.constant 0 : index
    %c0_4 = arith.constant 0 : index
    %3 = vector.load %arg5[%c0_3, %c0_4] : memref<1x128xf32, #tpu.memory_space<vmem>>, vector<1x128xf32>
    %4 = vector.broadcast %3 : vector<1x128xf32> to vector<8x128xf32>
    %5 = arith.addf %2, %4 : vector<8x128xf32>
    %c0_5 = arith.constant 0 : index
    %c0_6 = arith.constant 0 : index
    %6 = vector.load %arg6[%c0_5, %c0_6] : memref<8x128xbf16, #tpu.memory_space<vmem>>, vector<8x128xbf16>
    %7 = arith.extf %6 : vector<8x128xbf16> to vector<8x128xf32>
    %8 = arith.addf %5, %7 : vector<8x128xf32>
    %cst_7 = arith.constant 0.000000e+00 : f32
    %9 = vector.broadcast %cst_7 : f32 to vector<8x128xf32>
    %10 = arith.maximumf %8, %9 : vector<8x128xf32>
    %11 = arith.truncf %10 : vector<8x128xf32> to vector<8x128xbf16>
    %c0_8 = arith.constant 0 : index
    %c0_9 = arith.constant 0 : index
    %12 = vector.load %arg7[%c0_8, %c0_9] : memref<8x128xbf16, #tpu.memory_space<vmem>>, vector<8x128xbf16>
    tpu.vector_store %arg7[%c0_8, %c0_9], %11 {strides = array<i32>} : memref<8x128xbf16, #tpu.memory_space<vmem>>, vector<8x128xbf16>,
    return
  }
  func.func @transform_0(%arg0: i32, %arg1: i32, %arg2: i32) -> (i32, i32) {
    %c0_i32 = arith.constant 0 : i32
    return %arg0, %arg2 : i32, i32
  }
  func.func @transform_1(%arg0: i32, %arg1: i32, %arg2: i32) -> (i32, i32) {
    %c0_i32 = arith.constant 0 : i32
    return %arg2, %arg1 : i32, i32
  }
  func.func @transform_2(%arg0: i32, %arg1: i32, %arg2: i32) -> (i32, i32) {
    %c0_i32 = arith.constant 0 : i32
    %c0_i32_0 = arith.constant 0 : i32
    return %c0_i32, %arg1 : i32, i32
  }
  func.func @transform_3(%arg0: i32, %arg1: i32, %arg2: i32) -> (i32, i32) {
    %c0_i32 = arith.constant 0 : i32
    return %arg0, %arg1 : i32, i32
  }
  func.func @transform_4(%arg0: i32, %arg1: i32, %arg2: i32) -> (i32, i32) {
    %c0_i32 = arith.constant 0 : i32
    return %arg0, %arg1 : i32, i32
  }
}

module attributes {stable_mosaic.version = 11 : i64} {
  func.func @_mm_noacc_kernel(%arg0: i32, %arg1: i32, %arg2: i32, %arg3: memref<2x128xbf16, #tpu.memory_space<vmem>>, %arg4: memref<128x256xbf16, #tpu.memory_space<vmem>>, %arg5: memref<1x256xf32, #tpu.memory_space<vmem>>, %arg6: memref<2x256xbf16, #tpu.memory_space<vmem>>) attributes {dimension_semantics = [#tpu.dimension_semantics<parallel>, #tpu.dimension_semantics<parallel>, #tpu.dimension_semantics<arbitrary>], iteration_bounds = array<i64: 1, 1, 1>, scalar_prefetch = 0 : i64, scratch_operands = 0 : i64, tpu.core_type = #tpu.core_type<tc>, window_params = [{transform_indices = @transform_0, window_bounds = array<i64: 2, 128>}, {transform_indices = @transform_1, window_bounds = array<i64: 128, 256>}, {transform_indices = @transform_2, window_bounds = array<i64: 1, 256>}, {transform_indices = @transform_3, window_bounds = array<i64: 2, 256>}]} {
    %c0 = arith.constant 0 : index
    %c0_0 = arith.constant 0 : index
    %0 = vector.load %arg3[%c0, %c0_0] : memref<2x128xbf16, #tpu.memory_space<vmem>>, vector<2x128xbf16>
    %c0_1 = arith.constant 0 : index
    %c0_2 = arith.constant 0 : index
    %1 = vector.load %arg4[%c0_1, %c0_2] : memref<128x256xbf16, #tpu.memory_space<vmem>>, vector<128x256xbf16>
    %cst = arith.constant dense<0.000000e+00> : vector<2x256xf32>
    %2 = tpu.matmul %0, %1, %cst {dimension_numbers = #tpu.dot_dimension_numbers<[1], [0], [0], [1], [0, 0, 1, 1], [], []>} : vector<2x128xbf16>, vector<128x256xbf16>, vector<2x256xf32> -> vector<2x256xf32>
    %c0_3 = arith.constant 0 : index
    %c0_4 = arith.constant 0 : index
    %3 = vector.load %arg5[%c0_3, %c0_4] : memref<1x256xf32, #tpu.memory_space<vmem>>, vector<1x256xf32>
    %4 = vector.broadcast %3 : vector<1x256xf32> to vector<2x256xf32>
    %5 = arith.addf %2, %4 : vector<2x256xf32>
    %6 = arith.truncf %5 : vector<2x256xf32> to vector<2x256xbf16>
    %c0_5 = arith.constant 0 : index
    %c0_6 = arith.constant 0 : index
    %7 = vector.load %arg6[%c0_5, %c0_6] : memref<2x256xbf16, #tpu.memory_space<vmem>>, vector<2x256xbf16>
    tpu.vector_store %arg6[%c0_5, %c0_6], %6 {strides = array<i32>} : memref<2x256xbf16, #tpu.memory_space<vmem>>, vector<2x256xbf16>,
    return
  }
  func.func @transform_0(%arg0: i32, %arg1: i32, %arg2: i32) -> (i32, i32) {
    %c0_i32 = arith.constant 0 : i32
    return %arg0, %arg2 : i32, i32
  }
  func.func @transform_1(%arg0: i32, %arg1: i32, %arg2: i32) -> (i32, i32) {
    %c0_i32 = arith.constant 0 : i32
    return %arg2, %arg1 : i32, i32
  }
  func.func @transform_2(%arg0: i32, %arg1: i32, %arg2: i32) -> (i32, i32) {
    %c0_i32 = arith.constant 0 : i32
    %c0_i32_0 = arith.constant 0 : i32
    return %c0_i32, %arg1 : i32, i32
  }
  func.func @transform_3(%arg0: i32, %arg1: i32, %arg2: i32) -> (i32, i32) {
    %c0_i32 = arith.constant 0 : i32
    return %arg0, %arg1 : i32, i32
  }
}

module attributes {stable_mosaic.version = 11 : i64} {
  func.func @_mm_acc_kernel(%arg0: i32, %arg1: i32, %arg2: i32, %arg3: memref<8x384xbf16, #tpu.memory_space<vmem>>, %arg4: memref<384x128xbf16, #tpu.memory_space<vmem>>, %arg5: memref<1x128xf32, #tpu.memory_space<vmem>>, %arg6: memref<8x128xbf16, #tpu.memory_space<vmem>>, %arg7: memref<8x128xf32, #tpu.memory_space<vmem>>) attributes {dimension_semantics = [#tpu.dimension_semantics<parallel>, #tpu.dimension_semantics<parallel>, #tpu.dimension_semantics<arbitrary>], iteration_bounds = array<i64: 1, 1, 3>, scalar_prefetch = 0 : i64, scratch_operands = 1 : i64, tpu.core_type = #tpu.core_type<tc>, window_params = [{transform_indices = @transform_0, window_bounds = array<i64: 8, 384>}, {transform_indices = @transform_1, window_bounds = array<i64: 384, 128>}, {transform_indices = @transform_2, window_bounds = array<i64: 1, 128>}, {transform_indices = @transform_3, window_bounds = array<i64: 8, 128>}]} {
    %c0_i32 = arith.constant 0 : i32
    %0 = arith.cmpi eq, %arg2, %c0_i32 : i32
    %1 = arith.extui %0 : i1 to i32
    %c0_i32_0 = arith.constant 0 : i32
    %2 = arith.cmpi ne, %1, %c0_i32_0 : i32
    scf.if %2 {
      %cst_9 = arith.constant 0.000000e+00 : f32
      %12 = vector.broadcast %cst_9 : f32 to vector<8x128xf32>
      %c0_10 = arith.constant 0 : index
      %c0_11 = arith.constant 0 : index
      %13 = vector.load %arg7[%c0_10, %c0_11] : memref<8x128xf32, #tpu.memory_space<vmem>>, vector<8x128xf32>
      tpu.vector_store %arg7[%c0_10, %c0_11], %12 {strides = array<i32>} : memref<8x128xf32, #tpu.memory_space<vmem>>, vector<8x128xf32>,
    } else {
    }
    %c0 = arith.constant 0 : index
    %c0_1 = arith.constant 0 : index
    %3 = vector.load %arg7[%c0, %c0_1] : memref<8x128xf32, #tpu.memory_space<vmem>>, vector<8x128xf32>
    %c0_2 = arith.constant 0 : index
    %c0_3 = arith.constant 0 : index
    %4 = vector.load %arg3[%c0_2, %c0_3] : memref<8x384xbf16, #tpu.memory_space<vmem>>, vector<8x384xbf16>
    %c0_4 = arith.constant 0 : index
    %c0_5 = arith.constant 0 : index
    %5 = vector.load %arg4[%c0_4, %c0_5] : memref<384x128xbf16, #tpu.memory_space<vmem>>, vector<384x128xbf16>
    %cst = arith.constant dense<0.000000e+00> : vector<8x128xf32>
    %6 = tpu.matmul %4, %5, %cst {dimension_numbers = #tpu.dot_dimension_numbers<[1], [0], [0], [1], [0, 0, 1, 1], [], []>} : vector<8x384xbf16>, vector<384x128xbf16>, vector<8x128xf32> -> vector<8x128xf32>
    %7 = arith.addf %3, %6 : vector<8x128xf32>
    %c0_6 = arith.constant 0 : index
    %c0_7 = arith.constant 0 : index
    %8 = vector.load %arg7[%c0_6, %c0_7] : memref<8x128xf32, #tpu.memory_space<vmem>>, vector<8x128xf32>
    tpu.vector_store %arg7[%c0_6, %c0_7], %7 {strides = array<i32>} : memref<8x128xf32, #tpu.memory_space<vmem>>, vector<8x128xf32>,
    %c2_i32 = arith.constant 2 : i32
    %9 = arith.cmpi eq, %arg2, %c2_i32 : i32
    %10 = arith.extui %9 : i1 to i32
    %c0_i32_8 = arith.constant 0 : i32
    %11 = arith.cmpi ne, %10, %c0_i32_8 : i32
    scf.if %11 {
      %c0_9 = arith.constant 0 : index
      %c0_10 = arith.constant 0 : index
      %12 = vector.load %arg7[%c0_9, %c0_10] : memref<8x128xf32, #tpu.memory_space<vmem>>, vector<8x128xf32>
      %c0_11 = arith.constant 0 : index
      %c0_12 = arith.constant 0 : index
      %13 = vector.load %arg5[%c0_11, %c0_12] : memref<1x128xf32, #tpu.memory_space<vmem>>, vector<1x128xf32>
      %14 = vector.broadcast %13 : vector<1x128xf32> to vector<8x128xf32>
      %15 = arith.addf %12, %14 : vector<8x128xf32>
      %cst_13 = arith.constant 0.000000e+00 : f32
      %16 = vector.broadcast %cst_13 : f32 to vector<8x128xf32>
      %17 = arith.maximumf %15, %16 : vector<8x128xf32>
      %18 = arith.truncf %17 : vector<8x128xf32> to vector<8x128xbf16>
      %c0_14 = arith.constant 0 : index
      %c0_15 = arith.constant 0 : index
      %19 = vector.load %arg6[%c0_14, %c0_15] : memref<8x128xbf16, #tpu.memory_space<vmem>>, vector<8x128xbf16>
      tpu.vector_store %arg6[%c0_14, %c0_15], %18 {strides = array<i32>} : memref<8x128xbf16, #tpu.memory_space<vmem>>, vector<8x128xbf16>,
    } else {
    }
    return
  }
  func.func @transform_0(%arg0: i32, %arg1: i32, %arg2: i32) -> (i32, i32) {
    %c0_i32 = arith.constant 0 : i32
    return %arg0, %arg2 : i32, i32
  }
  func.func @transform_1(%arg0: i32, %arg1: i32, %arg2: i32) -> (i32, i32) {
    %c0_i32 = arith.constant 0 : i32
    return %arg2, %arg1 : i32, i32
  }
  func.func @transform_2(%arg0: i32, %arg1: i32, %arg2: i32) -> (i32, i32) {
    %c0_i32 = arith.constant 0 : i32
    %c0_i32_0 = arith.constant 0 : i32
    return %c0_i32, %arg1 : i32, i32
  }
  func.func @transform_3(%arg0: i32, %arg1: i32, %arg2: i32) -> (i32, i32) {
    %c0_i32 = arith.constant 0 : i32
    return %arg0, %arg1 : i32, i32
  }
}

module attributes {stable_mosaic.version = 11 : i64} {
  func.func @_mm_noacc_kernel(%arg0: i32, %arg1: i32, %arg2: i32, %arg3: memref<2x128xbf16, #tpu.memory_space<vmem>>, %arg4: memref<128x256xbf16, #tpu.memory_space<vmem>>, %arg5: memref<1x256xf32, #tpu.memory_space<vmem>>, %arg6: memref<2x256xbf16, #tpu.memory_space<vmem>>, %arg7: memref<2x256xbf16, #tpu.memory_space<vmem>>) attributes {dimension_semantics = [#tpu.dimension_semantics<parallel>, #tpu.dimension_semantics<parallel>, #tpu.dimension_semantics<arbitrary>], iteration_bounds = array<i64: 1, 1, 1>, scalar_prefetch = 0 : i64, scratch_operands = 0 : i64, tpu.core_type = #tpu.core_type<tc>, window_params = [{transform_indices = @transform_0, window_bounds = array<i64: 2, 128>}, {transform_indices = @transform_1, window_bounds = array<i64: 128, 256>}, {transform_indices = @transform_2, window_bounds = array<i64: 1, 256>}, {transform_indices = @transform_3, window_bounds = array<i64: 2, 256>}, {transform_indices = @transform_4, window_bounds = array<i64: 2, 256>}]} {
    %c0 = arith.constant 0 : index
    %c0_0 = arith.constant 0 : index
    %0 = vector.load %arg3[%c0, %c0_0] : memref<2x128xbf16, #tpu.memory_space<vmem>>, vector<2x128xbf16>
    %c0_1 = arith.constant 0 : index
    %c0_2 = arith.constant 0 : index
    %1 = vector.load %arg4[%c0_1, %c0_2] : memref<128x256xbf16, #tpu.memory_space<vmem>>, vector<128x256xbf16>
    %cst = arith.constant dense<0.000000e+00> : vector<2x256xf32>
    %2 = tpu.matmul %0, %1, %cst {dimension_numbers = #tpu.dot_dimension_numbers<[1], [0], [0], [1], [0, 0, 1, 1], [], []>} : vector<2x128xbf16>, vector<128x256xbf16>, vector<2x256xf32> -> vector<2x256xf32>
    %c0_3 = arith.constant 0 : index
    %c0_4 = arith.constant 0 : index
    %3 = vector.load %arg5[%c0_3, %c0_4] : memref<1x256xf32, #tpu.memory_space<vmem>>, vector<1x256xf32>
    %4 = vector.broadcast %3 : vector<1x256xf32> to vector<2x256xf32>
    %5 = arith.addf %2, %4 : vector<2x256xf32>
    %c0_5 = arith.constant 0 : index
    %c0_6 = arith.constant 0 : index
    %6 = vector.load %arg6[%c0_5, %c0_6] : memref<2x256xbf16, #tpu.memory_space<vmem>>, vector<2x256xbf16>
    %7 = arith.extf %6 : vector<2x256xbf16> to vector<2x256xf32>
    %8 = arith.addf %5, %7 : vector<2x256xf32>
    %cst_7 = arith.constant 0.000000e+00 : f32
    %9 = vector.broadcast %cst_7 : f32 to vector<2x256xf32>
    %10 = arith.maximumf %8, %9 : vector<2x256xf32>
    %11 = arith.truncf %10 : vector<2x256xf32> to vector<2x256xbf16>
    %c0_8 = arith.constant 0 : index
    %c0_9 = arith.constant 0 : index
    %12 = vector.load %arg7[%c0_8, %c0_9] : memref<2x256xbf16, #tpu.memory_space<vmem>>, vector<2x256xbf16>
    tpu.vector_store %arg7[%c0_8, %c0_9], %11 {strides = array<i32>} : memref<2x256xbf16, #tpu.memory_space<vmem>>, vector<2x256xbf16>,
    return
  }
  func.func @transform_0(%arg0: i32, %arg1: i32, %arg2: i32) -> (i32, i32) {
    %c0_i32 = arith.constant 0 : i32
    return %arg0, %arg2 : i32, i32
  }
  func.func @transform_1(%arg0: i32, %arg1: i32, %arg2: i32) -> (i32, i32) {
    %c0_i32 = arith.constant 0 : i32
    return %arg2, %arg1 : i32, i32
  }
  func.func @transform_2(%arg0: i32, %arg1: i32, %arg2: i32) -> (i32, i32) {
    %c0_i32 = arith.constant 0 : i32
    %c0_i32_0 = arith.constant 0 : i32
    return %c0_i32, %arg1 : i32, i32
  }
  func.func @transform_3(%arg0: i32, %arg1: i32, %arg2: i32) -> (i32, i32) {
    %c0_i32 = arith.constant 0 : i32
    return %arg0, %arg1 : i32, i32
  }
  func.func @transform_4(%arg0: i32, %arg1: i32, %arg2: i32) -> (i32, i32) {
    %c0_i32 = arith.constant 0 : i32
    return %arg0, %arg1 : i32, i32
  }
}

module attributes {stable_mosaic.version = 11 : i64} {
  func.func @_mm_noacc_kernel(%arg0: i32, %arg1: i32, %arg2: i32, %arg3: memref<2x256xbf16, #tpu.memory_space<vmem>>, %arg4: memref<256x256xbf16, #tpu.memory_space<vmem>>, %arg5: memref<1x256xf32, #tpu.memory_space<vmem>>, %arg6: memref<2x256xbf16, #tpu.memory_space<vmem>>) attributes {dimension_semantics = [#tpu.dimension_semantics<parallel>, #tpu.dimension_semantics<parallel>, #tpu.dimension_semantics<arbitrary>], iteration_bounds = array<i64: 1, 1, 1>, scalar_prefetch = 0 : i64, scratch_operands = 0 : i64, tpu.core_type = #tpu.core_type<tc>, window_params = [{transform_indices = @transform_0, window_bounds = array<i64: 2, 256>}, {transform_indices = @transform_1, window_bounds = array<i64: 256, 256>}, {transform_indices = @transform_2, window_bounds = array<i64: 1, 256>}, {transform_indices = @transform_3, window_bounds = array<i64: 2, 256>}]} {
    %c0 = arith.constant 0 : index
    %c0_0 = arith.constant 0 : index
    %0 = vector.load %arg3[%c0, %c0_0] : memref<2x256xbf16, #tpu.memory_space<vmem>>, vector<2x256xbf16>
    %c0_1 = arith.constant 0 : index
    %c0_2 = arith.constant 0 : index
    %1 = vector.load %arg4[%c0_1, %c0_2] : memref<256x256xbf16, #tpu.memory_space<vmem>>, vector<256x256xbf16>
    %cst = arith.constant dense<0.000000e+00> : vector<2x256xf32>
    %2 = tpu.matmul %0, %1, %cst {dimension_numbers = #tpu.dot_dimension_numbers<[1], [0], [0], [1], [0, 0, 1, 1], [], []>} : vector<2x256xbf16>, vector<256x256xbf16>, vector<2x256xf32> -> vector<2x256xf32>
    %c0_3 = arith.constant 0 : index
    %c0_4 = arith.constant 0 : index
    %3 = vector.load %arg5[%c0_3, %c0_4] : memref<1x256xf32, #tpu.memory_space<vmem>>, vector<1x256xf32>
    %4 = vector.broadcast %3 : vector<1x256xf32> to vector<2x256xf32>
    %5 = arith.addf %2, %4 : vector<2x256xf32>
    %6 = arith.truncf %5 : vector<2x256xf32> to vector<2x256xbf16>
    %c0_5 = arith.constant 0 : index
    %c0_6 = arith.constant 0 : index
    %7 = vector.load %arg6[%c0_5, %c0_6] : memref<2x256xbf16, #tpu.memory_space<vmem>>, vector<2x256xbf16>
    tpu.vector_store %arg6[%c0_5, %c0_6], %6 {strides = array<i32>} : memref<2x256xbf16, #tpu.memory_space<vmem>>, vector<2x256xbf16>,
    return
  }
  func.func @transform_0(%arg0: i32, %arg1: i32, %arg2: i32) -> (i32, i32) {
    %c0_i32 = arith.constant 0 : i32
    return %arg0, %arg2 : i32, i32
  }
  func.func @transform_1(%arg0: i32, %arg1: i32, %arg2: i32) -> (i32, i32) {
    %c0_i32 = arith.constant 0 : i32
    return %arg2, %arg1 : i32, i32
  }
  func.func @transform_2(%arg0: i32, %arg1: i32, %arg2: i32) -> (i32, i32) {
    %c0_i32 = arith.constant 0 : i32
    %c0_i32_0 = arith.constant 0 : i32
    return %c0_i32, %arg1 : i32, i32
  }
  func.func @transform_3(%arg0: i32, %arg1: i32, %arg2: i32) -> (i32, i32) {
    %c0_i32 = arith.constant 0 : i32
    return %arg0, %arg1 : i32, i32
  }
}

module attributes {stable_mosaic.version = 11 : i64} {
  func.func @_mm_noacc_kernel(%arg0: i32, %arg1: i32, %arg2: i32, %arg3: memref<4x256xbf16, #tpu.memory_space<vmem>>, %arg4: memref<256x512xbf16, #tpu.memory_space<vmem>>, %arg5: memref<1x512xf32, #tpu.memory_space<vmem>>, %arg6: memref<4x512xbf16, #tpu.memory_space<vmem>>) attributes {dimension_semantics = [#tpu.dimension_semantics<parallel>, #tpu.dimension_semantics<parallel>, #tpu.dimension_semantics<arbitrary>], iteration_bounds = array<i64: 1, 1, 1>, scalar_prefetch = 0 : i64, scratch_operands = 0 : i64, tpu.core_type = #tpu.core_type<tc>, window_params = [{transform_indices = @transform_0, window_bounds = array<i64: 4, 256>}, {transform_indices = @transform_1, window_bounds = array<i64: 256, 512>}, {transform_indices = @transform_2, window_bounds = array<i64: 1, 512>}, {transform_indices = @transform_3, window_bounds = array<i64: 4, 512>}]} {
    %c0 = arith.constant 0 : index
    %c0_0 = arith.constant 0 : index
    %0 = vector.load %arg3[%c0, %c0_0] : memref<4x256xbf16, #tpu.memory_space<vmem>>, vector<4x256xbf16>
    %c0_1 = arith.constant 0 : index
    %c0_2 = arith.constant 0 : index
    %1 = vector.load %arg4[%c0_1, %c0_2] : memref<256x512xbf16, #tpu.memory_space<vmem>>, vector<256x512xbf16>
    %cst = arith.constant dense<0.000000e+00> : vector<4x512xf32>
    %2 = tpu.matmul %0, %1, %cst {dimension_numbers = #tpu.dot_dimension_numbers<[1], [0], [0], [1], [0, 0, 1, 1], [], []>} : vector<4x256xbf16>, vector<256x512xbf16>, vector<4x512xf32> -> vector<4x512xf32>
    %c0_3 = arith.constant 0 : index
    %c0_4 = arith.constant 0 : index
    %3 = vector.load %arg5[%c0_3, %c0_4] : memref<1x512xf32, #tpu.memory_space<vmem>>, vector<1x512xf32>
    %4 = vector.broadcast %3 : vector<1x512xf32> to vector<4x512xf32>
    %5 = arith.addf %2, %4 : vector<4x512xf32>
    %6 = arith.truncf %5 : vector<4x512xf32> to vector<4x512xbf16>
    %c0_5 = arith.constant 0 : index
    %c0_6 = arith.constant 0 : index
    %7 = vector.load %arg6[%c0_5, %c0_6] : memref<4x512xbf16, #tpu.memory_space<vmem>>, vector<4x512xbf16>
    tpu.vector_store %arg6[%c0_5, %c0_6], %6 {strides = array<i32>} : memref<4x512xbf16, #tpu.memory_space<vmem>>, vector<4x512xbf16>,
    return
  }
  func.func @transform_0(%arg0: i32, %arg1: i32, %arg2: i32) -> (i32, i32) {
    %c0_i32 = arith.constant 0 : i32
    return %arg0, %arg2 : i32, i32
  }
  func.func @transform_1(%arg0: i32, %arg1: i32, %arg2: i32) -> (i32, i32) {
    %c0_i32 = arith.constant 0 : i32
    return %arg2, %arg1 : i32, i32
  }
  func.func @transform_2(%arg0: i32, %arg1: i32, %arg2: i32) -> (i32, i32) {
    %c0_i32 = arith.constant 0 : i32
    %c0_i32_0 = arith.constant 0 : i32
    return %c0_i32, %arg1 : i32, i32
  }
  func.func @transform_3(%arg0: i32, %arg1: i32, %arg2: i32) -> (i32, i32) {
    %c0_i32 = arith.constant 0 : i32
    return %arg0, %arg1 : i32, i32
  }
}

module attributes {stable_mosaic.version = 11 : i64} {
  func.func @_mm_noacc_kernel(%arg0: i32, %arg1: i32, %arg2: i32, %arg3: memref<2x256xbf16, #tpu.memory_space<vmem>>, %arg4: memref<256x128xbf16, #tpu.memory_space<vmem>>, %arg5: memref<1x128xf32, #tpu.memory_space<vmem>>, %arg6: memref<2x128xbf16, #tpu.memory_space<vmem>>) attributes {dimension_semantics = [#tpu.dimension_semantics<parallel>, #tpu.dimension_semantics<parallel>, #tpu.dimension_semantics<arbitrary>], iteration_bounds = array<i64: 1, 1, 1>, scalar_prefetch = 0 : i64, scratch_operands = 0 : i64, tpu.core_type = #tpu.core_type<tc>, window_params = [{transform_indices = @transform_0, window_bounds = array<i64: 2, 256>}, {transform_indices = @transform_1, window_bounds = array<i64: 256, 128>}, {transform_indices = @transform_2, window_bounds = array<i64: 1, 128>}, {transform_indices = @transform_3, window_bounds = array<i64: 2, 128>}]} {
    %c0 = arith.constant 0 : index
    %c0_0 = arith.constant 0 : index
    %0 = vector.load %arg3[%c0, %c0_0] : memref<2x256xbf16, #tpu.memory_space<vmem>>, vector<2x256xbf16>
    %c0_1 = arith.constant 0 : index
    %c0_2 = arith.constant 0 : index
    %1 = vector.load %arg4[%c0_1, %c0_2] : memref<256x128xbf16, #tpu.memory_space<vmem>>, vector<256x128xbf16>
    %cst = arith.constant dense<0.000000e+00> : vector<2x128xf32>
    %2 = tpu.matmul %0, %1, %cst {dimension_numbers = #tpu.dot_dimension_numbers<[1], [0], [0], [1], [0, 0, 1, 1], [], []>} : vector<2x256xbf16>, vector<256x128xbf16>, vector<2x128xf32> -> vector<2x128xf32>
    %c0_3 = arith.constant 0 : index
    %c0_4 = arith.constant 0 : index
    %3 = vector.load %arg5[%c0_3, %c0_4] : memref<1x128xf32, #tpu.memory_space<vmem>>, vector<1x128xf32>
    %4 = vector.broadcast %3 : vector<1x128xf32> to vector<2x128xf32>
    %5 = arith.addf %2, %4 : vector<2x128xf32>
    %6 = arith.truncf %5 : vector<2x128xf32> to vector<2x128xbf16>
    %c0_5 = arith.constant 0 : index
    %c0_6 = arith.constant 0 : index
    %7 = vector.load %arg6[%c0_5, %c0_6] : memref<2x128xbf16, #tpu.memory_space<vmem>>, vector<2x128xbf16>
    tpu.vector_store %arg6[%c0_5, %c0_6], %6 {strides = array<i32>} : memref<2x128xbf16, #tpu.memory_space<vmem>>, vector<2x128xbf16>,
    return
  }
  func.func @transform_0(%arg0: i32, %arg1: i32, %arg2: i32) -> (i32, i32) {
    %c0_i32 = arith.constant 0 : i32
    return %arg0, %arg2 : i32, i32
  }
  func.func @transform_1(%arg0: i32, %arg1: i32, %arg2: i32) -> (i32, i32) {
    %c0_i32 = arith.constant 0 : i32
    return %arg2, %arg1 : i32, i32
  }
  func.func @transform_2(%arg0: i32, %arg1: i32, %arg2: i32) -> (i32, i32) {
    %c0_i32 = arith.constant 0 : i32
    %c0_i32_0 = arith.constant 0 : i32
    return %c0_i32, %arg1 : i32, i32
  }
  func.func @transform_3(%arg0: i32, %arg1: i32, %arg2: i32) -> (i32, i32) {
    %c0_i32 = arith.constant 0 : i32
    return %arg0, %arg1 : i32, i32
  }
}

module attributes {stable_mosaic.version = 11 : i64} {
  func.func @_norm_logits_kernel(%arg0: i32, %arg1: memref<2x128xbf16, #tpu.memory_space<vmem>>, %arg2: memref<128x128xbf16, #tpu.memory_space<vmem>>, %arg3: memref<2x128xf32, #tpu.memory_space<vmem>>) attributes {dimension_semantics = [#tpu.dimension_semantics<parallel>], iteration_bounds = array<i64: 1>, scalar_prefetch = 0 : i64, scratch_operands = 0 : i64, tpu.core_type = #tpu.core_type<tc>, window_params = [{transform_indices = @transform_0, window_bounds = array<i64: 2, 128>}, {pipeline_mode = #tpu.pipeline_mode<synchronous>, transform_indices = @transform_1, window_bounds = array<i64: 128, 128>}, {transform_indices = @transform_2, window_bounds = array<i64: 2, 128>}]} {
    %c0 = arith.constant 0 : index
    %c0_0 = arith.constant 0 : index
    %0 = vector.load %arg1[%c0, %c0_0] : memref<2x128xbf16, #tpu.memory_space<vmem>>, vector<2x128xbf16>
    %1 = arith.extf %0 : vector<2x128xbf16> to vector<2x128xf32>
    %2 = arith.mulf %1, %1 : vector<2x128xf32>
    %cst = arith.constant dense<0.000000e+00> : vector<2xf32>
    %3 = vector.multi_reduction <add>, %2, %cst [1] : vector<2x128xf32> to vector<2xf32>
    %4 = vector.shape_cast %3 : vector<2xf32> to vector<2x1xf32>
    %cst_1 = arith.constant 9.99999996E-13 : f32
    %5 = vector.broadcast %cst_1 : f32 to vector<2x1xf32>
    %6 = arith.addf %4, %5 : vector<2x1xf32>
    %7 = math.rsqrt %6 : vector<2x1xf32>
    %8 = vector.broadcast %7 : vector<2x1xf32> to vector<2x128xf32>
    %9 = arith.mulf %1, %8 : vector<2x128xf32>
    %10 = arith.truncf %9 : vector<2x128xf32> to vector<2x128xbf16>
    %c0_2 = arith.constant 0 : index
    %c0_3 = arith.constant 0 : index
    %11 = vector.load %arg2[%c0_2, %c0_3] : memref<128x128xbf16, #tpu.memory_space<vmem>>, vector<128x128xbf16>
    %cst_4 = arith.constant dense<0.000000e+00> : vector<2x128xf32>
    %12 = tpu.matmul %10, %11, %cst_4 {dimension_numbers = #tpu.dot_dimension_numbers<[1], [0], [0], [1], [0, 0, 1, 1], [], []>} : vector<2x128xbf16>, vector<128x128xbf16>, vector<2x128xf32> -> vector<2x128xf32>
    %c0_5 = arith.constant 0 : index
    %c0_6 = arith.constant 0 : index
    %13 = vector.load %arg3[%c0_5, %c0_6] : memref<2x128xf32, #tpu.memory_space<vmem>>, vector<2x128xf32>
    tpu.vector_store %arg3[%c0_5, %c0_6], %12 {strides = array<i32>} : memref<2x128xf32, #tpu.memory_space<vmem>>, vector<2x128xf32>,
    return
  }
  func.func @transform_0(%arg0: i32) -> (i32, i32) {
    %c0_i32 = arith.constant 0 : i32
    %c0_i32_0 = arith.constant 0 : i32
    return %arg0, %c0_i32 : i32, i32
  }
  func.func @transform_1(%arg0: i32) -> (i32, i32) {
    %c0_i32 = arith.constant 0 : i32
    %c0_i32_0 = arith.constant 0 : i32
    %c0_i32_1 = arith.constant 0 : i32
    return %c0_i32, %c0_i32_0 : i32, i32
  }
  func.func @transform_2(%arg0: i32) -> (i32, i32) {
    %c0_i32 = arith.constant 0 : i32
    %c0_i32_0 = arith.constant 0 : i32
    return %arg0, %c0_i32 : i32, i32
  }
}

</mosaic_0001>

<bundles_post_ra>
// kernel: clip_with_labels_forward.23
= control target key start
LH: loop header
LB: loop body
LE: loop exit
PB: predicated region body
PF: predicated region fallthrough
CT: control target
= control target key end

     0   :  { %s1267_s12 = smov 0   ;;  %s1269_s13 = smov 0   ;;  %s1402_s0 = inlined_call_operand.vmem [shape: bf16[512,27], index: 0, kind: input, shape index: {}]   ;;  %s1403_s1 = inlined_call_operand.vmem [shape: bf16[27,128], index: 1, kind: input, shape index: {}]   ;;  %s1404_s2 = inlined_call_operand.vmem [shape: f32[1,128], index: 2, kind: input, shape index: {}]   ;;  %s1405_s3 = inlined_call_operand.vmem [shape: bf16[512,128], index: 3, kind: output, shape index: {}]  }
   0x1   :  { %s1271_s14 = smov 0  }
   0x2 LB: > { %s32_s15 = sadd.s32 1, %s1240_s13  ;;  %p920_p0 = scmp.ge.s32.totalorder %s1244_s14, 1  ;;  %s1244_s14 = sphi %s1271_s14, %s13_s14   ;;  %s1240_s13 = sphi %s1269_s13, %s1407_s13   ;;  %s1236_s12 = sphi %s1267_s12, %s1406_s12  }
   0x3   : > { %p34_p1 = scmp.ge.s32.totalorder %s32_s15, 2  ;;  %p188_p2 = scmp.lt.s32.totalorder %s1244_s14, 3 }
   0x5   : > { %s1409_s15 = smov (%p34_p1, %s32_s15), 0  ;;  %p189_p3 = pnand %p920_p0, %p188_p2 }
   0x6   : > { %s921_s18 = sshll.u32 (!%p189_p3), %s1236_s12, 5 }
   0x7   : > { %192 = sbr.rel (%p189_p3) target bundleno = 255 (0xff), region = 32  ;;  %p230_p4 = scmp.lt.s32.totalorder (!%p189_p3), %s921_s18, 63 }
   0xc   : > { %v1204_v0 = vld [vmem:[%s1403_s1 + $0x8] sm:$0x3f]   ;;  %vm443_vm0 = vcmask 1044480   ;;  %vm444_vm1 = vcmask 1045504   ;;  %v1246_v1 = vmov 65535   ;;  %v1205_v5 = vld [vmem:[%s1403_s1] sm:$0xff]  }
   0xd   : > { %v445_v2 = vsel %vm443_vm0, 4294967295, %v1246_v1  ;;  %s1411_s18 = smov (!%p230_p4, %s921_s18), 63  ;;  %vm394_vm2 = vcmask 220160   ;;  %v1336_v22 = vld [vmem:[%s1404_s2] ss:$0 sm:$0xff] }
   0xe   : > { %v446_v3 = vsel %vm444_vm1, %v445_v2, 0  ;;  %s922_s21 = sshll.u32 %s1411_s18, 2 }
   0xf   : > { %v448_v4 = vand.u32 %v1204_v0, %v446_v3  ;;  %s1299_s24 = scalar_lea.vmem %s1402_s0, %s922_s21  ;;  %s1351_s29 = scalar_lea.vmem %s1405_s3, %s922_s21 }
  0x10   : > { %v1206_v6 = vld [vmem:[%s1299_s24] sm:$0xff]   ;;  %v1208_v8 = vld [vmem:[%s1299_s24 + $0x8] sm:$0xff]   ;;  %v1210_v10 = vld [vmem:[%s1299_s24 + $0x10] sm:$0xff]  }
  0x11   : > { %1139 = vmatprep.subr.bf16.mxu0 %v448_v4  ;;  %1175 = vmatprep.subr.bf16.mxu1 %v448_v4  ;;  %v1207_v7 = vld [vmem:[%s1299_s24 + $0x40] sm:$0xff]   ;;  %v1209_v9 = vld [vmem:[%s1299_s24 + $0x48] sm:$0xff]   ;;  %v1211_v11 = vld [vmem:[%s1299_s24 + $0x50] sm:$0xff]  }
  0x12   : > { %1140 = vmatpush3.bf16.msra.mxu0 %v448_v4  ;;  %1177 = vmatpush3.bf16.msra.mxu1 %v448_v4  ;;  %v1212_v12 = vld [vmem:[%s1299_s24 + $0x18] sm:$0xff]   ;;  %v1214_v14 = vld [vmem:[%s1299_s24 + $0x20] sm:$0xff]   ;;  %v1216_v16 = vld [vmem:[%s1299_s24 + $0x28] sm:$0xff]  }
  0x13   : > { %1141 = vmatprep.subr.bf16.mxu0 %v1205_v5  ;;  %1176 = vmatprep.subr.bf16.mxu1 %v1205_v5  ;;  %v1213_v13 = vld [vmem:[%s1299_s24 + $0x58] sm:$0xff]   ;;  %v1215_v15 = vld [vmem:[%s1299_s24 + $0x60] sm:$0xff]   ;;  %v1217_v17 = vld [vmem:[%s1299_s24 + $0x68] sm:$0xff]  }
  0x14   : > { %1143 = vmatprep.mubr.msk.bf16.mxu0 %vm394_vm2, %v1206_v6  ;;  %1159 = vmatprep.mubr.msk.bf16.mxu1 %vm394_vm2, %v1207_v7  ;;  %v1218_v18 = vld [vmem:[%s1299_s24 + $0x30] sm:$0xff]   ;;  %v1220_v20 = vld [vmem:[%s1299_s24 + $0x38] sm:$0xff]  }
  0x15   : > { %v1219_v19 = vld [vmem:[%s1299_s24 + $0x70] sm:$0xff]   ;;  %v1221_v21 = vld [vmem:[%s1299_s24 + $0x78] sm:$0xff]  }
  0x16   : > { %1142 = vmatpush3.bf16.msra.mxu0 %v1205_v5  ;;  %1178 = vmatpush3.bf16.msra.mxu1 %v1205_v5 }
  0x19   : > { %1144 = vmatmul.mubr.msk.bf16.vlgmr.msra.gmra.mxu0 %vm394_vm2, %v1208_v8  ;;  %1160 = vmatmul.mubr.msk.bf16.vlgmr.msra.gmra.mxu1 %vm394_vm2, %v1209_v9 }
  0x1a   : > { %1147 = vmatprep.mubr.msk.bf16.mxu0 %vm394_vm2, %v1210_v10  ;;  %1163 = vmatprep.mubr.msk.bf16.mxu1 %vm394_vm2, %v1211_v11 }
  0x21   : > { %1148 = vmatmul.mubr.msk.bf16.gmra.mxu0 %vm394_vm2, %v1212_v12  ;;  %1164 = vmatmul.mubr.msk.bf16.gmra.mxu1 %vm394_vm2, %v1213_v13 }
  0x22   : > { %1151 = vmatprep.mubr.msk.bf16.mxu0 %vm394_vm2, %v1214_v14  ;;  %1167 = vmatprep.mubr.msk.bf16.mxu1 %vm394_vm2, %v1215_v15 }
  0x29   : > { %1152 = vmatmul.mubr.msk.bf16.gmra.mxu0 %vm394_vm2, %v1216_v16  ;;  %1168 = vmatmul.mubr.msk.bf16.gmra.mxu1 %vm394_vm2, %v1217_v17 }
  0x2a   : > { %1155 = vmatprep.mubr.msk.bf16.mxu0 %vm394_vm2, %v1218_v18  ;;  %1171 = vmatprep.mubr.msk.bf16.mxu1 %vm394_vm2, %v1219_v19 }
  0x31   : > { %1156 = vmatmul.mubr.msk.bf16.gmra.mxu0 %vm394_vm2, %v1220_v20  ;;  %1172 = vmatmul.mubr.msk.bf16.gmra.mxu1 %vm394_vm2, %v1221_v21 }
  0xd9   : > { %v1145_v23 = vpop.f32.mrf.mxu0  ;;  %v1161_v24 = vpop.f32.mrf.mxu1 }
  0xda   : > { %v493_v25 = vadd.f32 %v1145_v23, %v1336_v22  ;;  %v557_v26 = vadd.f32 %v1161_v24, %v1336_v22 }
  0xdb   : > { %v484_v27 = vpop.f32.mrf.mxu0  ;;  %v548_v28 = vpop.f32.mrf.mxu1 }
  0xdc   : > { %v485_v29 = vadd.f32 %v1336_v22, %v484_v27  ;;  %v549_v30 = vadd.f32 %v1336_v22, %v548_v28  ;;  %v613_v35 = vmax.f32 %v493_v25, 0.0  ;;  %v629_v36 = vmax.f32 %v557_v26, 0.0 }
  0xdd   : > { %v1146_v31 = vpop.f32.mrf.mxu0  ;;  %v1162_v32 = vpop.f32.mrf.mxu1 }
  0xde   : > { %v496_v33 = vadd.f32 %v1146_v31, %v1336_v22  ;;  %v560_v34 = vadd.f32 %v1162_v32, %v1336_v22  ;;  %v611_v43 = vmax.f32 %v485_v29, 0.0  ;;  %v627_v44 = vmax.f32 %v549_v30, 0.0 }
  0xdf   : > { %v487_v37 = vpop.f32.mrf.mxu0  ;;  %v551_v38 = vpop.f32.mrf.mxu1 }
  0xe0   : > { %v614_v39 = vmax.f32 %v496_v33, 0.0  ;;  %v630_v40 = vmax.f32 %v560_v34, 0.0  ;;  %v488_v41 = vadd.f32 %v1336_v22, %v487_v37  ;;  %v552_v42 = vadd.f32 %v1336_v22, %v551_v38 }
  0xe1   : > { %v1149_v45 = vpop.f32.mrf.mxu0  ;;  %v1165_v46 = vpop.f32.mrf.mxu1 }
  0xe2   : > { %v1034_v47 = vpack.c.bf16 %v614_v39, %v613_v35  ;;  %v1074_v48 = vpack.c.bf16 %v630_v40, %v629_v36  ;;  %v612_v49 = vmax.f32 %v488_v41, 0.0  ;;  %v628_v50 = vmax.f32 %v552_v42, 0.0 }
  0xe3   : > { %v509_v51 = vadd.f32 %v1149_v45, %v1336_v22  ;;  %v573_v52 = vadd.f32 %v1165_v46, %v1336_v22  ;;  %v500_v53 = vpop.f32.mrf.mxu0  ;;  %v564_v54 = vpop.f32.mrf.mxu1 }
  0xe4   : > { %1106 = vst [vmem:[%s1351_s29 + $0x8] sm:$0xff] %v1034_v47   ;;  %1114 = vst [vmem:[%s1351_s29 + $0x48] sm:$0xff] %v1074_v48   ;;  %v1029_v55 = vpack.c.bf16 %v612_v49, %v611_v43  ;;  %v1069_v56 = vpack.c.bf16 %v628_v50, %v627_v44  ;;  %v501_v57 = vadd.f32 %v1336_v22, %v500_v53 }
  0xe5   : > { %v565_v58 = vadd.f32 %v1336_v22, %v564_v54  ;;  %v1150_v59 = vpop.f32.mrf.mxu0  ;;  %v1166_v60 = vpop.f32.mrf.mxu1  ;;  %v617_v63 = vmax.f32 %v509_v51, 0.0  ;;  %v633_v0 = vmax.f32 %v573_v52, 0.0 }
  0xe6   : > { %1030 = vst [vmem:[%s1351_s29] sm:$0xff] %v1029_v55   ;;  %1113 = vst [vmem:[%s1351_s29 + $0x40] sm:$0xff] %v1069_v56   ;;  %v512_v61 = vadd.f32 %v1150_v59, %v1336_v22  ;;  %v576_v62 = vadd.f32 %v1166_v60, %v1336_v22  ;;  %v615_v7 = vmax.f32 %v501_v57, 0.0 }
  0xe7   : > { %v503_v1 = vpop.f32.mrf.mxu0  ;;  %v567_v2 = vpop.f32.mrf.mxu1  ;;  %v631_v8 = vmax.f32 %v565_v58, 0.0 }
  0xe8   : > { %v618_v3 = vmax.f32 %v512_v61, 0.0  ;;  %v634_v4 = vmax.f32 %v576_v62, 0.0  ;;  %v504_v5 = vadd.f32 %v1336_v22, %v503_v1  ;;  %v568_v6 = vadd.f32 %v1336_v22, %v567_v2 }
  0xe9   : > { %v1153_v9 = vpop.f32.mrf.mxu0  ;;  %v1169_v10 = vpop.f32.mrf.mxu1 }
  0xea   : > { %v1044_v11 = vpack.c.bf16 %v618_v3, %v617_v63  ;;  %v1084_v12 = vpack.c.bf16 %v634_v4, %v633_v0  ;;  %v616_v13 = vmax.f32 %v504_v5, 0.0  ;;  %v632_v14 = vmax.f32 %v568_v6, 0.0 }
  0xeb   : > { %v525_v15 = vadd.f32 %v1153_v9, %v1336_v22  ;;  %v589_v16 = vadd.f32 %v1169_v10, %v1336_v22  ;;  %v516_v17 = vpop.f32.mrf.mxu0  ;;  %v580_v18 = vpop.f32.mrf.mxu1 }
  0xec   : > { %1108 = vst [vmem:[%s1351_s29 + $0x18] sm:$0xff] %v1044_v11   ;;  %1116 = vst [vmem:[%s1351_s29 + $0x58] sm:$0xff] %v1084_v12   ;;  %v1039_v19 = vpack.c.bf16 %v616_v13, %v615_v7  ;;  %v1079_v20 = vpack.c.bf16 %v632_v14, %v631_v8  ;;  %v517_v21 = vadd.f32 %v1336_v22, %v516_v17 }
  0xed   : > { %v581_v23 = vadd.f32 %v1336_v22, %v580_v18  ;;  %v1154_v24 = vpop.f32.mrf.mxu0  ;;  %v1170_v25 = vpop.f32.mrf.mxu1  ;;  %v621_v28 = vmax.f32 %v525_v15, 0.0  ;;  %v637_v29 = vmax.f32 %v589_v16, 0.0 }
  0xee   : > { %1107 = vst [vmem:[%s1351_s29 + $0x10] sm:$0xff] %v1039_v19   ;;  %1115 = vst [vmem:[%s1351_s29 + $0x50] sm:$0xff] %v1079_v20   ;;  %v528_v26 = vadd.f32 %v1154_v24, %v1336_v22  ;;  %v592_v27 = vadd.f32 %v1170_v25, %v1336_v22  ;;  %v619_v36 = vmax.f32 %v517_v21, 0.0 }
  0xef   : > { %v519_v30 = vpop.f32.mrf.mxu0  ;;  %v583_v31 = vpop.f32.mrf.mxu1  ;;  %v635_v37 = vmax.f32 %v581_v23, 0.0 }
  0xf0   : > { %v622_v32 = vmax.f32 %v528_v26, 0.0  ;;  %v638_v33 = vmax.f32 %v592_v27, 0.0  ;;  %v520_v34 = vadd.f32 %v1336_v22, %v519_v30  ;;  %v584_v35 = vadd.f32 %v1336_v22, %v583_v31 }
  0xf1   : > { %v1157_v38 = vpop.f32.mrf.mxu0  ;;  %v1173_v39 = vpop.f32.mrf.mxu1 }
  0xf2   : > { %v1054_v40 = vpack.c.bf16 %v622_v32, %v621_v28  ;;  %v1094_v41 = vpack.c.bf16 %v638_v33, %v637_v29  ;;  %v620_v42 = vmax.f32 %v520_v34, 0.0  ;;  %v636_v43 = vmax.f32 %v584_v35, 0.0 }
  0xf3   : > { %v541_v44 = vadd.f32 %v1157_v38, %v1336_v22  ;;  %v605_v45 = vadd.f32 %v1173_v39, %v1336_v22  ;;  %v532_v46 = vpop.f32.mrf.mxu0  ;;  %v596_v47 = vpop.f32.mrf.mxu1 }
  0xf4   : > { %1110 = vst [vmem:[%s1351_s29 + $0x28] sm:$0xff] %v1054_v40   ;;  %1118 = vst [vmem:[%s1351_s29 + $0x68] sm:$0xff] %v1094_v41   ;;  %v1049_v48 = vpack.c.bf16 %v620_v42, %v619_v36  ;;  %v1089_v49 = vpack.c.bf16 %v636_v43, %v635_v37  ;;  %v533_v50 = vadd.f32 %v1336_v22, %v532_v46 }
  0xf5   : > { %v597_v51 = vadd.f32 %v1336_v22, %v596_v47  ;;  %v1158_v52 = vpop.f32.mrf.mxu0  ;;  %v1174_v53 = vpop.f32.mrf.mxu1  ;;  %v625_v56 = vmax.f32 %v541_v44, 0.0  ;;  %v641_v57 = vmax.f32 %v605_v45, 0.0 }
  0xf6   : > { %1109 = vst [vmem:[%s1351_s29 + $0x20] sm:$0xff] %v1049_v48   ;;  %1117 = vst [vmem:[%s1351_s29 + $0x60] sm:$0xff] %v1089_v49   ;;  %v544_v54 = vadd.f32 %v1158_v52, %v1336_v22  ;;  %v608_v55 = vadd.f32 %v1174_v53, %v1336_v22  ;;  %v623_v0 = vmax.f32 %v533_v50, 0.0 }
  0xf7   : > { %v535_v58 = vpop.f32.mrf.mxu0  ;;  %v599_v59 = vpop.f32.mrf.mxu1  ;;  %v639_v1 = vmax.f32 %v597_v51, 0.0 }
  0xf8   : > { %v626_v60 = vmax.f32 %v544_v54, 0.0  ;;  %v642_v61 = vmax.f32 %v608_v55, 0.0  ;;  %v536_v62 = vadd.f32 %v1336_v22, %v535_v58  ;;  %v600_v63 = vadd.f32 %v1336_v22, %v599_v59 }
  0xfa   : > { %v1064_v2 = vpack.c.bf16 %v626_v60, %v625_v56  ;;  %v1104_v3 = vpack.c.bf16 %v642_v61, %v641_v57  ;;  %v624_v4 = vmax.f32 %v536_v62, 0.0  ;;  %v640_v5 = vmax.f32 %v600_v63, 0.0 }
  0xfc   : > { %1112 = vst [vmem:[%s1351_s29 + $0x38] sm:$0xff] %v1064_v2   ;;  %1120 = vst [vmem:[%s1351_s29 + $0x78] sm:$0xff] %v1104_v3   ;;  %v1059_v6 = vpack.c.bf16 %v624_v4, %v623_v0  ;;  %v1099_v7 = vpack.c.bf16 %v640_v5, %v639_v1 }
  0xfe   : > { %1111 = vst [vmem:[%s1351_s29 + $0x30] sm:$0xff] %v1059_v6   ;;  %1119 = vst [vmem:[%s1351_s29 + $0x70] sm:$0xff] %v1099_v7  }
  0xff PF: > { %s13_s14 = sadd.s32 1, %s1244_s14   ;;  %s1406_s12 = smov %s1240_s13 }
 0x100   : > { %p10_p5 = scmp.ge.s32.totalorder %s13_s14, 4   ;;  %s1407_s13 = smov %s1409_s15 }
 0x102   :  { %12 = sbr.rel (!%p10_p5) target bundleno = 2 (0x2), region = 68 }

// kernel: clip_with_labels_forward.28
= control target key start
LH: loop header
LB: loop body
LE: loop exit
PB: predicated region body
PF: predicated region fallthrough
CT: control target
= control target key end

     0   :  { %s602_s1 = inlined_call_operand.vmem [shape: bf16[128,128], index: 1, kind: input, shape index: {}]   ;;  %s603_s0 = inlined_call_operand.vmem [shape: bf16[128,128], index: 0, kind: input, shape index: {}]   ;;  %s604_s2 = inlined_call_operand.vmem [shape: f32[1,128], index: 2, kind: input, shape index: {}]   ;;  %s605_s3 = inlined_call_operand.vmem [shape: bf16[128,128], index: 3, kind: output, shape index: {}]  }
   0x1   :  { %v491_v0 = vld [vmem:[%s602_s1 + $0x38] sm:$0xff]   ;;  %v492_v1 = vld [vmem:[%s602_s1 + $0x30] sm:$0xff]   ;;  %v493_v2 = vld [vmem:[%s602_s1 + $0x28] sm:$0xff]  }
   0x2   :  { %443 = vmatprep.subr.bf16.mxu0 %v491_v0  ;;  %475 = vmatprep.subr.bf16.mxu1 %v491_v0  ;;  %v494_v3 = vld [vmem:[%s602_s1 + $0x20] sm:$0xff]   ;;  %v495_v6 = vld [vmem:[%s602_s1 + $0x18] sm:$0xff]   ;;  %v496_v7 = vld [vmem:[%s602_s1 + $0x10] sm:$0xff]  }
   0x3   :  { %444 = vmatpush3.bf16.msra.mxu0 %v491_v0  ;;  %483 = vmatpush3.bf16.msra.mxu1 %v491_v0  ;;  %v499_v4 = vld [vmem:[%s603_s0] sm:$0xff]   ;;  %v497_v8 = vld [vmem:[%s602_s1 + $0x8] sm:$0xff]   ;;  %v503_v12 = vld [vmem:[%s603_s0 + $0x10] sm:$0xff]  }
   0x4   :  { %445 = vmatprep.subr.bf16.mxu0 %v492_v1  ;;  %476 = vmatprep.subr.bf16.mxu1 %v492_v1  ;;  %v500_v5 = vld [vmem:[%s603_s0 + $0x20] sm:$0xff]   ;;  %v501_v10 = vld [vmem:[%s603_s0 + $0x8] sm:$0xff]   ;;  %v504_v13 = vld [vmem:[%s603_s0 + $0x30] sm:$0xff]  }
   0x5   :  { %459 = vmatprep.mubr.bf16.mxu0 %v499_v4  ;;  %467 = vmatprep.mubr.bf16.mxu1 %v500_v5  ;;  %v498_v9 = vld [vmem:[%s602_s1] sm:$0xff]   ;;  %v502_v11 = vld [vmem:[%s603_s0 + $0x28] sm:$0xff]   ;;  %v505_v14 = vld [vmem:[%s603_s0 + $0x18] sm:$0xff]  }
   0x6   :  { %v506_v15 = vld [vmem:[%s603_s0 + $0x38] sm:$0xff]   ;;  %v331_v18 = vld [vmem:[%s604_s2] ss:$0 sm:$0xff] }
   0x7   :  { %446 = vmatpush3.bf16.msra.mxu0 %v492_v1  ;;  %484 = vmatpush3.bf16.msra.mxu1 %v492_v1 }
   0x8   :  { %447 = vmatprep.subr.bf16.mxu0 %v493_v2  ;;  %477 = vmatprep.subr.bf16.mxu1 %v493_v2 }
   0xb   :  { %448 = vmatpush3.bf16.msra.mxu0 %v493_v2  ;;  %485 = vmatpush3.bf16.msra.mxu1 %v493_v2 }
   0xc   :  { %449 = vmatprep.subr.bf16.mxu0 %v494_v3  ;;  %478 = vmatprep.subr.bf16.mxu1 %v494_v3 }
   0xf   :  { %450 = vmatpush3.bf16.msra.mxu0 %v494_v3  ;;  %486 = vmatpush3.bf16.msra.mxu1 %v494_v3 }
  0x10   :  { %451 = vmatprep.subr.bf16.mxu0 %v495_v6  ;;  %479 = vmatprep.subr.bf16.mxu1 %v495_v6 }
  0x13   :  { %452 = vmatpush3.bf16.msra.mxu0 %v495_v6  ;;  %487 = vmatpush3.bf16.msra.mxu1 %v495_v6 }
  0x14   :  { %453 = vmatprep.subr.bf16.mxu0 %v496_v7  ;;  %480 = vmatprep.subr.bf16.mxu1 %v496_v7 }
  0x17   :  { %454 = vmatpush3.bf16.msra.mxu0 %v496_v7  ;;  %488 = vmatpush3.bf16.msra.mxu1 %v496_v7 }
  0x18   :  { %455 = vmatprep.subr.bf16.mxu0 %v497_v8  ;;  %481 = vmatprep.subr.bf16.mxu1 %v497_v8 }
  0x1b   :  { %456 = vmatpush3.bf16.msra.mxu0 %v497_v8  ;;  %489 = vmatpush3.bf16.msra.mxu1 %v497_v8 }
  0x1c   :  { %457 = vmatprep.subr.bf16.mxu0 %v498_v9  ;;  %482 = vmatprep.subr.bf16.mxu1 %v498_v9 }
  0x1f   :  { %458 = vmatpush3.bf16.msra.mxu0 %v498_v9  ;;  %490 = vmatpush3.bf16.msra.mxu1 %v498_v9 }
  0x22   :  { %460 = vmatmul.mubr.bf16.vlgmr.msra.gmra.mxu0 %v501_v10  ;;  %468 = vmatmul.mubr.bf16.vlgmr.msra.gmra.mxu1 %v502_v11 }
  0x23   :  { %463 = vmatprep.mubr.bf16.mxu0 %v503_v12  ;;  %471 = vmatprep.mubr.bf16.mxu1 %v504_v13 }
  0x2a   :  { %464 = vmatmul.mubr.bf16.gmra.mxu0 %v505_v14  ;;  %472 = vmatmul.mubr.bf16.gmra.mxu1 %v506_v15 }
  0xe2   :  { %v461_v16 = vpop.f32.mrf.mxu0  ;;  %v469_v17 = vpop.f32.mrf.mxu1 }
  0xe3   :  { %v193_v23 = vadd.f32 %v461_v16, %v331_v18  ;;  %v225_v24 = vadd.f32 %v469_v17, %v331_v18 }
  0xe4   :  { %v184_v19 = vpop.f32.mrf.mxu0  ;;  %v216_v20 = vpop.f32.mrf.mxu1 }
  0xe5   :  { %v185_v27 = vadd.f32 %v331_v18, %v184_v19  ;;  %v217_v28 = vadd.f32 %v331_v18, %v216_v20 }
  0xe6   :  { %v462_v21 = vpop.f32.mrf.mxu0  ;;  %v470_v22 = vpop.f32.mrf.mxu1 }
  0xe7   :  { %v196_v25 = vadd.f32 %v462_v21, %v331_v18  ;;  %v228_v26 = vadd.f32 %v470_v22, %v331_v18 }
  0xe8   :  { %v187_v29 = vpop.f32.mrf.mxu0  ;;  %v219_v30 = vpop.f32.mrf.mxu1 }
  0xe9   :  { %v388_v31 = vpack.c.bf16 %v196_v25, %v193_v23  ;;  %v408_v32 = vpack.c.bf16 %v228_v26, %v225_v24  ;;  %v188_v33 = vadd.f32 %v331_v18, %v187_v29  ;;  %v220_v34 = vadd.f32 %v331_v18, %v219_v30 }
  0xea   :  { %v465_v35 = vpop.f32.mrf.mxu0  ;;  %v473_v36 = vpop.f32.mrf.mxu1 }
  0xeb   :  { %420 = vst [vmem:[%s605_s3 + $0x8] sm:$0xff] %v388_v31   ;;  %424 = vst [vmem:[%s605_s3 + $0x28] sm:$0xff] %v408_v32   ;;  %v383_v37 = vpack.c.bf16 %v188_v33, %v185_v27  ;;  %v403_v38 = vpack.c.bf16 %v220_v34, %v217_v28  ;;  %v209_v43 = vadd.f32 %v465_v35, %v331_v18 }
  0xec   :  { %v200_v39 = vpop.f32.mrf.mxu0  ;;  %v232_v40 = vpop.f32.mrf.mxu1  ;;  %v241_v44 = vadd.f32 %v473_v36, %v331_v18 }
  0xed   :  { %384 = vst [vmem:[%s605_s3] sm:$0xff] %v383_v37   ;;  %423 = vst [vmem:[%s605_s3 + $0x20] sm:$0xff] %v403_v38   ;;  %v201_v47 = vadd.f32 %v331_v18, %v200_v39  ;;  %v233_v48 = vadd.f32 %v331_v18, %v232_v40 }
  0xee   :  { %v466_v41 = vpop.f32.mrf.mxu0  ;;  %v474_v42 = vpop.f32.mrf.mxu1 }
  0xef   :  { %v212_v45 = vadd.f32 %v466_v41, %v331_v18  ;;  %v244_v46 = vadd.f32 %v474_v42, %v331_v18 }
  0xf0   :  { %v203_v49 = vpop.f32.mrf.mxu0  ;;  %v235_v50 = vpop.f32.mrf.mxu1 }
  0xf1   :  { %v398_v51 = vpack.c.bf16 %v212_v45, %v209_v43  ;;  %v418_v52 = vpack.c.bf16 %v244_v46, %v241_v44  ;;  %v204_v53 = vadd.f32 %v331_v18, %v203_v49  ;;  %v236_v54 = vadd.f32 %v331_v18, %v235_v50 }
  0xf3   :  { %422 = vst [vmem:[%s605_s3 + $0x18] sm:$0xff] %v398_v51   ;;  %426 = vst [vmem:[%s605_s3 + $0x38] sm:$0xff] %v418_v52   ;;  %v393_v55 = vpack.c.bf16 %v204_v53, %v201_v47  ;;  %v413_v56 = vpack.c.bf16 %v236_v54, %v233_v48 }
  0xf5   :  { %421 = vst [vmem:[%s605_s3 + $0x10] sm:$0xff] %v393_v55   ;;  %425 = vst [vmem:[%s605_s3 + $0x30] sm:$0xff] %v413_v56  }

// kernel: clip_with_labels_forward.24
= control target key start
LH: loop header
LB: loop body
LE: loop exit
PB: predicated region body
PF: predicated region fallthrough
CT: control target
= control target key end

     0   :  { %s2501_s12 = smov 0   ;;  %s2503_s13 = smov 0   ;;  %s2894_s0 = inlined_call_operand.vmem [shape: bf16[512,1152], index: 0, kind: input, shape index: {}]   ;;  %s2895_s1 = inlined_call_operand.vmem [shape: bf16[1152,128], index: 1, kind: input, shape index: {}]   ;;  %s2896_s2 = inlined_call_operand.vmem [shape: f32[1,128], index: 2, kind: input, shape index: {}]   ;;  %s2897_s3 = inlined_call_operand.vmem [shape: bf16[512,128], index: 3, kind: output, shape index: {}]  }
   0x1   :  { %s2505_s14 = smov 0   ;;  %s2507_s15 = smov 0  }
   0x2   :  { %s2509_s16 = smov 0   ;;  %s2511_s17 = smov 0  }
   0x3   :  { %s2513_s18 = smov 0  }
   0x4 LB: > { %s25_s19 = sadd.s32 1, %s2470_s16  ;;  %s32_s20 = sadd.s32 1, %s2474_s17  ;;  %s2478_s18 = sphi %s2513_s18, %s13_s18   ;;  %s2474_s17 = sphi %s2511_s17, %s2903_s17   ;;  %s2470_s16 = sphi %s2509_s16, %s2902_s16   ;;  %s2466_s15 = sphi %s2507_s15, %s2901_s15   ;;  %s2462_s14 = sphi %s2505_s14, %s2900_s14   ;;  %s2458_s13 = sphi %s2503_s13, %s2899_s13   ;;  %s2454_s12 = sphi %s2501_s12, %s2898_s12  }
   0x5   : > { %p26_p0 = scmp.ge.s32.totalorder %s25_s19, 3  ;;  %p48_p1 = scmp.ne.s32.totalorder %s2458_s13, %s2454_s12 }
   0x6   : > { %p49_p2 = scmp.eq.s32.totalorder %s2478_s18, 0  ;;  %s41_s24 = sadd.s32 1, %s2458_s13 }
   0x7   : > { %s2905_s19 = smov (%p26_p0, %s25_s19), 0  ;;  %s2907_s20 = smov (!%p26_p0, %s32_s20), %s2474_s17 }
   0x8   : > { %p50_p3 = por %p49_p2, %p48_p1  ;;  %p34_p4 = scmp.ge.s32.totalorder %s2907_s20, 2 }
   0x9   : > { %s37_s21 = ssub.s32 %s2470_s16, %s2905_s19  ;;  %p1768_p6 = scmp.ge.s32.totalorder %s2478_s18, 6 }
   0xa   : > { %s2909_s20 = smov (%p34_p4, %s2907_s20), 0 }
   0xb   : > { %s36_s22 = ssub.s32 %s2474_s17, %s2909_s20  ;;  %162 = sbr.rel (%p1768_p6) target bundleno = 62 (0x3e), region = 20 }
   0xc   : > { %s38_s23 = sor.u32 %s37_s21, %s36_s22 }
   0xd   : > { %p39_p5 = scmp.eq.s32.totalorder %s38_s23, 0 }
   0xf   : > { %s2552_s25 = scalar_select %p39_p5, %s2458_s13, %s41_s24  }
  0x10   : > { %165 = sbr.rel (!%p50_p3) target bundleno = 62 (0x3e), region = 24  ;;  %s167_s26 = sand.u32 (%p50_p3), 1, %s2458_s13  }
  0x11   : > { %s171_s27 = smul.u32 (%p50_p3), 3, %s2470_s16 }
  0x12   : > { %s2276_s28 = smul.u32 (%p50_p3), 384, %s167_s26 }
  0x13   : > { %s2277_s29 = smul.u32 (%p50_p3), 288, %s2474_s17 }
  0x14   : > { %s2566_s8 = scalar_lea.vmem (%p50_p3), [#allocation3], %s2276_s28 }
  0x15   : > { %s173_s30 = sadd.s32 %s2277_s29, %s171_s27 }
  0x16   : > { %s1771_s4 = sshll.u32 %s173_s30, 2 }
  0x17   : > { %s2561_s7 = scalar_lea.vmem %s2894_s0, %s1771_s4 }
  0x18   : > { %v190_v0 = vld [vmem:[%s2561_s7] sm:$0xff]  ;;  %v194_v2 = vld [vmem:[%s2561_s7 + $0x48] sm:$0xff]  ;;  %v198_v4 = vld [vmem:[%s2561_s7 + $0x90] sm:$0xff] }
  0x19   : > { %v192_v1 = vld [vmem:[%s2561_s7 + $0x24] sm:$0xff]  ;;  %191 = vst [vmem:[%s2566_s8] sm:$0xff] %v190_v0  ;;  %195 = vst [vmem:[%s2566_s8 + $0x18] sm:$0xff] %v194_v2  ;;  %v196_v3 = vld [vmem:[%s2561_s7 + $0x6c] sm:$0xff] }
  0x1a   : > { %193 = vst [vmem:[%s2566_s8 + $0xc] sm:$0xff] %v192_v1  ;;  %v200_v5 = vld [vmem:[%s2561_s7 + $0xb4] sm:$0xff]  ;;  %197 = vst [vmem:[%s2566_s8 + $0x24] sm:$0xff] %v196_v3  ;;  %v204_v7 = vld [vmem:[%s2561_s7 + $0xfc] sm:$0xff] }
  0x1b   : > { %199 = vst [vmem:[%s2566_s8 + $0x30] sm:$0xff] %v198_v4  ;;  %201 = vst [vmem:[%s2566_s8 + $0x3c] sm:$0xff] %v200_v5  ;;  %v202_v6 = vld [vmem:[%s2561_s7 + $0xd8] sm:$0xff]  ;;  %v206_v8 = vld [vmem:[%s2561_s7 + $0x120] sm:$0xff] }
  0x1c   : > { %203 = vst [vmem:[%s2566_s8 + $0x48] sm:$0xff] %v202_v6  ;;  %205 = vst [vmem:[%s2566_s8 + $0x54] sm:$0xff] %v204_v7  ;;  %v208_v9 = vld [vmem:[%s2561_s7 + $0x144] sm:$0xff]  ;;  %v212_v11 = vld [vmem:[%s2561_s7 + $0x18c] sm:$0xff] }
  0x1d   : > { %207 = vst [vmem:[%s2566_s8 + $0x60] sm:$0xff] %v206_v8  ;;  %v210_v10 = vld [vmem:[%s2561_s7 + $0x168] sm:$0xff]  ;;  %209 = vst [vmem:[%s2566_s8 + $0x6c] sm:$0xff] %v208_v9  ;;  %v214_v12 = vld [vmem:[%s2561_s7 + $0x1b0] sm:$0xff] }
  0x1e   : > { %211 = vst [vmem:[%s2566_s8 + $0x78] sm:$0xff] %v210_v10  ;;  %213 = vst [vmem:[%s2566_s8 + $0x84] sm:$0xff] %v212_v11  ;;  %v216_v13 = vld [vmem:[%s2561_s7 + $0x1d4] sm:$0xff]  ;;  %v220_v15 = vld [vmem:[%s2561_s7 + $0x21c] sm:$0xff] }
  0x1f   : > { %v218_v14 = vld [vmem:[%s2561_s7 + $0x1f8] sm:$0xff]  ;;  %215 = vst [vmem:[%s2566_s8 + $0x90] sm:$0xff] %v214_v12  ;;  %217 = vst [vmem:[%s2566_s8 + $0x9c] sm:$0xff] %v216_v13  ;;  %v222_v16 = vld [vmem:[%s2561_s7 + $0x240] sm:$0xff] }
  0x20   : > { %219 = vst [vmem:[%s2566_s8 + $0xa8] sm:$0xff] %v218_v14  ;;  %v224_v17 = vld [vmem:[%s2561_s7 + $0x264] sm:$0xff]  ;;  %221 = vst [vmem:[%s2566_s8 + $0xb4] sm:$0xff] %v220_v15  ;;  %v228_v19 = vld [vmem:[%s2561_s7 + $0x2ac] sm:$0xff] }
  0x21   : > { %223 = vst [vmem:[%s2566_s8 + $0xc0] sm:$0xff] %v222_v16  ;;  %225 = vst [vmem:[%s2566_s8 + $0xcc] sm:$0xff] %v224_v17  ;;  %v226_v18 = vld [vmem:[%s2561_s7 + $0x288] sm:$0xff]  ;;  %v230_v20 = vld [vmem:[%s2561_s7 + $0x2d0] sm:$0xff] }
  0x22   : > { %227 = vst [vmem:[%s2566_s8 + $0xd8] sm:$0xff] %v226_v18  ;;  %229 = vst [vmem:[%s2566_s8 + $0xe4] sm:$0xff] %v228_v19  ;;  %v232_v21 = vld [vmem:[%s2561_s7 + $0x2f4] sm:$0xff]  ;;  %v236_v23 = vld [vmem:[%s2561_s7 + $0x33c] sm:$0xff] }
  0x23   : > { %231 = vst [vmem:[%s2566_s8 + $0xf0] sm:$0xff] %v230_v20  ;;  %v234_v22 = vld [vmem:[%s2561_s7 + $0x318] sm:$0xff]  ;;  %233 = vst [vmem:[%s2566_s8 + $0xfc] sm:$0xff] %v232_v21  ;;  %v238_v24 = vld [vmem:[%s2561_s7 + $0x360] sm:$0xff] }
  0x24   : > { %235 = vst [vmem:[%s2566_s8 + $0x108] sm:$0xff] %v234_v22  ;;  %237 = vst [vmem:[%s2566_s8 + $0x114] sm:$0xff] %v236_v23  ;;  %v240_v25 = vld [vmem:[%s2561_s7 + $0x384] sm:$0xff]  ;;  %v244_v27 = vld [vmem:[%s2561_s7 + $0x3cc] sm:$0xff] }
  0x25   : > { %v242_v26 = vld [vmem:[%s2561_s7 + $0x3a8] sm:$0xff]  ;;  %239 = vst [vmem:[%s2566_s8 + $0x120] sm:$0xff] %v238_v24  ;;  %241 = vst [vmem:[%s2566_s8 + $0x12c] sm:$0xff] %v240_v25  ;;  %v246_v28 = vld [vmem:[%s2561_s7 + $0x3f0] sm:$0xff] }
  0x26   : > { %243 = vst [vmem:[%s2566_s8 + $0x138] sm:$0xff] %v242_v26  ;;  %v248_v29 = vld [vmem:[%s2561_s7 + $0x414] sm:$0xff]  ;;  %245 = vst [vmem:[%s2566_s8 + $0x144] sm:$0xff] %v244_v27  ;;  %v252_v31 = vld [vmem:[%s2561_s7 + $0x45c] sm:$0xff] }
  0x27   : > { %247 = vst [vmem:[%s2566_s8 + $0x150] sm:$0xff] %v246_v28  ;;  %249 = vst [vmem:[%s2566_s8 + $0x15c] sm:$0xff] %v248_v29  ;;  %v250_v30 = vld [vmem:[%s2561_s7 + $0x438] sm:$0xff]  ;;  %v1772_v32 = vld [vmem:[%s2561_s7 + $0x8] sm:$0xf] }
  0x28   : > { %251 = vst [vmem:[%s2566_s8 + $0x168] sm:$0xff] %v250_v30  ;;  %253 = vst [vmem:[%s2566_s8 + $0x174] sm:$0xff] %v252_v31  ;;  %v1774_v33 = vld [vmem:[%s2561_s7 + $0x2c] sm:$0xf]  ;;  %v1776_v34 = vld [vmem:[%s2561_s7 + $0x50] sm:$0xf] }
  0x29   : > { %1773 = vst [vmem:[%s2566_s8 + $0x8] sm:$0xf] %v1772_v32  ;;  %v1778_v35 = vld [vmem:[%s2561_s7 + $0x74] sm:$0xf]  ;;  %1775 = vst [vmem:[%s2566_s8 + $0x14] sm:$0xf] %v1774_v33 }
  0x2a   : > { %1777 = vst [vmem:[%s2566_s8 + $0x20] sm:$0xf] %v1776_v34  ;;  %1779 = vst [vmem:[%s2566_s8 + $0x2c] sm:$0xf] %v1778_v35  ;;  %v1780_v36 = vld [vmem:[%s2561_s7 + $0x98] sm:$0xf] }
  0x2b   : > { %v1782_v37 = vld [vmem:[%s2561_s7 + $0xbc] sm:$0xf]  ;;  %v1784_v38 = vld [vmem:[%s2561_s7 + $0xe0] sm:$0xf]  ;;  %1781 = vst [vmem:[%s2566_s8 + $0x38] sm:$0xf] %v1780_v36 }
  0x2c   : > { %1783 = vst [vmem:[%s2566_s8 + $0x44] sm:$0xf] %v1782_v37  ;;  %1785 = vst [vmem:[%s2566_s8 + $0x50] sm:$0xf] %v1784_v38  ;;  %v1786_v39 = vld [vmem:[%s2561_s7 + $0x104] sm:$0xf] }
  0x2d   : > { %v1788_v40 = vld [vmem:[%s2561_s7 + $0x128] sm:$0xf]  ;;  %v1790_v41 = vld [vmem:[%s2561_s7 + $0x14c] sm:$0xf]  ;;  %1787 = vst [vmem:[%s2566_s8 + $0x5c] sm:$0xf] %v1786_v39 }
  0x2e   : > { %1789 = vst [vmem:[%s2566_s8 + $0x68] sm:$0xf] %v1788_v40  ;;  %1791 = vst [vmem:[%s2566_s8 + $0x74] sm:$0xf] %v1790_v41  ;;  %v1792_v42 = vld [vmem:[%s2561_s7 + $0x170] sm:$0xf] }
  0x2f   : > { %v1794_v43 = vld [vmem:[%s2561_s7 + $0x194] sm:$0xf]  ;;  %v1796_v44 = vld [vmem:[%s2561_s7 + $0x1b8] sm:$0xf]  ;;  %1793 = vst [vmem:[%s2566_s8 + $0x80] sm:$0xf] %v1792_v42 }
  0x30   : > { %1795 = vst [vmem:[%s2566_s8 + $0x8c] sm:$0xf] %v1794_v43  ;;  %1797 = vst [vmem:[%s2566_s8 + $0x98] sm:$0xf] %v1796_v44  ;;  %v1798_v45 = vld [vmem:[%s2561_s7 + $0x1dc] sm:$0xf] }
  0x31   : > { %v1800_v46 = vld [vmem:[%s2561_s7 + $0x200] sm:$0xf]  ;;  %v1802_v47 = vld [vmem:[%s2561_s7 + $0x224] sm:$0xf]  ;;  %1799 = vst [vmem:[%s2566_s8 + $0xa4] sm:$0xf] %v1798_v45 }
  0x32   : > { %1801 = vst [vmem:[%s2566_s8 + $0xb0] sm:$0xf] %v1800_v46  ;;  %1803 = vst [vmem:[%s2566_s8 + $0xbc] sm:$0xf] %v1802_v47  ;;  %v1804_v48 = vld [vmem:[%s2561_s7 + $0x248] sm:$0xf] }
  0x33   : > { %v1806_v49 = vld [vmem:[%s2561_s7 + $0x26c] sm:$0xf]  ;;  %v1808_v50 = vld [vmem:[%s2561_s7 + $0x290] sm:$0xf]  ;;  %1805 = vst [vmem:[%s2566_s8 + $0xc8] sm:$0xf] %v1804_v48 }
  0x34   : > { %1807 = vst [vmem:[%s2566_s8 + $0xd4] sm:$0xf] %v1806_v49  ;;  %1809 = vst [vmem:[%s2566_s8 + $0xe0] sm:$0xf] %v1808_v50  ;;  %v1810_v51 = vld [vmem:[%s2561_s7 + $0x2b4] sm:$0xf] }
  0x35   : > { %v1812_v52 = vld [vmem:[%s2561_s7 + $0x2d8] sm:$0xf]  ;;  %v1814_v53 = vld [vmem:[%s2561_s7 + $0x2fc] sm:$0xf]  ;;  %1811 = vst [vmem:[%s2566_s8 + $0xec] sm:$0xf] %v1810_v51 }
  0x36   : > { %1813 = vst [vmem:[%s2566_s8 + $0xf8] sm:$0xf] %v1812_v52  ;;  %1815 = vst [vmem:[%s2566_s8 + $0x104] sm:$0xf] %v1814_v53  ;;  %v1816_v54 = vld [vmem:[%s2561_s7 + $0x320] sm:$0xf] }
  0x37   : > { %v1818_v55 = vld [vmem:[%s2561_s7 + $0x344] sm:$0xf]  ;;  %v1820_v56 = vld [vmem:[%s2561_s7 + $0x368] sm:$0xf]  ;;  %1817 = vst [vmem:[%s2566_s8 + $0x110] sm:$0xf] %v1816_v54 }
  0x38   : > { %1819 = vst [vmem:[%s2566_s8 + $0x11c] sm:$0xf] %v1818_v55  ;;  %1821 = vst [vmem:[%s2566_s8 + $0x128] sm:$0xf] %v1820_v56  ;;  %v1822_v57 = vld [vmem:[%s2561_s7 + $0x38c] sm:$0xf] }
  0x39   : > { %v1824_v58 = vld [vmem:[%s2561_s7 + $0x3b0] sm:$0xf]  ;;  %v1826_v59 = vld [vmem:[%s2561_s7 + $0x3d4] sm:$0xf]  ;;  %1823 = vst [vmem:[%s2566_s8 + $0x134] sm:$0xf] %v1822_v57 }
  0x3a   : > { %1825 = vst [vmem:[%s2566_s8 + $0x140] sm:$0xf] %v1824_v58  ;;  %1827 = vst [vmem:[%s2566_s8 + $0x14c] sm:$0xf] %v1826_v59  ;;  %v1828_v60 = vld [vmem:[%s2561_s7 + $0x3f8] sm:$0xf] }
  0x3b   : > { %v1830_v61 = vld [vmem:[%s2561_s7 + $0x41c] sm:$0xf]  ;;  %v1832_v62 = vld [vmem:[%s2561_s7 + $0x440] sm:$0xf]  ;;  %1829 = vst [vmem:[%s2566_s8 + $0x158] sm:$0xf] %v1828_v60 }
  0x3c   : > { %1831 = vst [vmem:[%s2566_s8 + $0x164] sm:$0xf] %v1830_v61  ;;  %1833 = vst [vmem:[%s2566_s8 + $0x170] sm:$0xf] %v1832_v62  ;;  %v1834_v63 = vld [vmem:[%s2561_s7 + $0x464] sm:$0xf] }
  0x3d   : > { %1835 = vst [vmem:[%s2566_s8 + $0x17c] sm:$0xf] %v1834_v63 }
  0x3e PF: > { %p1836_p7 = scmp.ge.s32.totalorder %s2478_s18, 1  ;;  %p342_p8 = scmp.lt.s32.totalorder %s2478_s18, 7 }
  0x40   : > { %p343_p9 = pnand %p1836_p7, %p342_p8 }
  0x41   : > { %s349_s9 = sand.u32 (!%p343_p9), 1, %s2454_s12   ;;  %s388_s10 = smul.u32 (!%p343_p9), 48, %s2462_s14 }
  0x42   : > { %346 = sbr.rel (%p343_p9) target bundleno = 449 (0x1c1), region = 54  ;;  %s1838_s21 = sshll.u32 (!%p343_p9), %s2466_s15, 5 }
  0x43   : > { %s2278_s11 = smul.u32 (!%p343_p9), 384, %s349_s9  ;;  %p389_p10 = scmp.lt.s32.totalorder (!%p343_p9), %s388_s10, 143 }
  0x44   : > { %p401_p11 = scmp.lt.s32.totalorder (!%p343_p9), %s1838_s21, 63  ;;  %p1840_p12 = scmp.ne.s32.totalorder (!%p343_p9), %s2462_s14, 0 }
  0x45   : > { %s2708_s12 = scalar_lea.vmem (!%p343_p9), [#allocation3], %s2278_s11 }
  0x47   : > { %s2911_s10 = smov (!%p389_p10, %s388_s10), 143  ;;  %s2913_s21 = smov (!%p401_p11, %s1838_s21), 63 }
  0x48   : > { %s1837_s22 = sshll.u32 %s2911_s10, 2  ;;  %s1839_s27 = sshll.u32 %s2913_s21, 2 }
  0x49   : > { %s2701_s26 = scalar_lea.vmem %s2895_s1, %s1837_s22  ;;  %s2706_s30 = scalar_lea.vmem %s2897_s3, %s1839_s27 }
  0x4a   : > { %413 = sbr.rel (%p1840_p12) target bundleno = 96 (0x60), region = 62 }
  0x4f   : > { %v2480_v0 = vmov 0.0  }
  0x50   : > { %414 = vst [vmem:[#allocation2 + $0xb0] sm:$0xff] %v2480_v0  ;;  %415 = vst [vmem:[#allocation2] sm:$0xff] %v2480_v0 }
  0x51   : > { %416 = vst [vmem:[#allocation2 + $0xd8] sm:$0xff] %v2480_v0  ;;  %417 = vst [vmem:[#allocation2 + $0x18] sm:$0xff] %v2480_v0 }
  0x52   : > { %418 = vst [vmem:[#allocation2 + $0x50] sm:$0xff] %v2480_v0  ;;  %419 = vst [vmem:[#allocation2 + $0x68] sm:$0xff] %v2480_v0 }
  0x53   : > { %420 = vst [vmem:[#allocation2 + $0x30] sm:$0xff] %v2480_v0  ;;  %421 = vst [vmem:[#allocation2 + $0x48] sm:$0xff] %v2480_v0 }
  0x54   : > { %422 = vst [vmem:[#allocation2 + $0x80] sm:$0xff] %v2480_v0  ;;  %423 = vst [vmem:[#allocation2 + $0x88] sm:$0xff] %v2480_v0 }
  0x55   : > { %424 = vst [vmem:[#allocation2 + $0xe8] sm:$0xff] %v2480_v0  ;;  %425 = vst [vmem:[#allocation2 + $0xb8] sm:$0xff] %v2480_v0 }
  0x56   : > { %426 = vst [vmem:[#allocation2 + $0x60] sm:$0xff] %v2480_v0  ;;  %427 = vst [vmem:[#allocation2 + $0xf0] sm:$0xff] %v2480_v0 }
  0x57   : > { %428 = vst [vmem:[#allocation2 + $0x8] sm:$0xff] %v2480_v0  ;;  %429 = vst [vmem:[#allocation2 + $0x78] sm:$0xff] %v2480_v0 }
  0x58   : > { %430 = vst [vmem:[#allocation2 + $0x38] sm:$0xff] %v2480_v0  ;;  %431 = vst [vmem:[#allocation2 + $0x58] sm:$0xff] %v2480_v0 }
  0x59   : > { %432 = vst [vmem:[#allocation2 + $0x40] sm:$0xff] %v2480_v0  ;;  %433 = vst [vmem:[#allocation2 + $0xc8] sm:$0xff] %v2480_v0 }
  0x5a   : > { %434 = vst [vmem:[#allocation2 + $0xe0] sm:$0xff] %v2480_v0  ;;  %435 = vst [vmem:[#allocation2 + $0x90] sm:$0xff] %v2480_v0 }
  0x5b   : > { %436 = vst [vmem:[#allocation2 + $0x70] sm:$0xff] %v2480_v0  ;;  %437 = vst [vmem:[#allocation2 + $0xc0] sm:$0xff] %v2480_v0 }
  0x5c   : > { %438 = vst [vmem:[#allocation2 + $0xa8] sm:$0xff] %v2480_v0  ;;  %439 = vst [vmem:[#allocation2 + $0xd0] sm:$0xff] %v2480_v0 }
  0x5d   : > { %440 = vst [vmem:[#allocation2 + $0x10] sm:$0xff] %v2480_v0  ;;  %441 = vst [vmem:[#allocation2 + $0x28] sm:$0xff] %v2480_v0 }
  0x5e   : > { %442 = vst [vmem:[#allocation2 + $0xa0] sm:$0xff] %v2480_v0  ;;  %443 = vst [vmem:[#allocation2 + $0xf8] sm:$0xff] %v2480_v0 }
  0x5f   : > { %444 = vst [vmem:[#allocation2 + $0x20] sm:$0xff] %v2480_v0  ;;  %445 = vst [vmem:[#allocation2 + $0x98] sm:$0xff] %v2480_v0 }
  0x60 PF: > { %v2336_v1 = vld [vmem:[%s2701_s26 + $0x78] sm:$0xff]   ;;  %v2338_v3 = vld [vmem:[%s2701_s26 + $0x70] sm:$0xff]   ;;  %v2340_v5 = vld [vmem:[%s2701_s26 + $0x68] sm:$0xff]   ;;  %p1913_p13 = scmp.ne.s32.totalorder %s2462_s14, 2 }
  0x61   : > { %v2337_v2 = vld [vmem:[%s2701_s26 + $0x38] sm:$0xff]   ;;  %2076 = vmatprep.subr.bf16.mxu0 %v2336_v1  ;;  %2260 = vmatprep.subr.bf16.mxu1 %v2336_v1  ;;  %v2339_v4 = vld [vmem:[%s2701_s26 + $0x30] sm:$0xff]   ;;  %v2341_v6 = vld [vmem:[%s2701_s26 + $0x28] sm:$0xff]  }
  0x62   : > { %2077 = vmatpush3.bf16.msra.mxu0 %v2337_v2  ;;  %2268 = vmatpush3.bf16.msra.mxu1 %v2337_v2  ;;  %v2342_v7 = vld [vmem:[%s2701_s26 + $0x60] sm:$0xff]   ;;  %v2344_v9 = vld [vmem:[%s2701_s26 + $0x58] sm:$0xff]   ;;  %v2346_v11 = vld [vmem:[%s2701_s26 + $0x50] sm:$0xff]  }
  0x63   : > { %2078 = vmatprep.subr.bf16.mxu0 %v2338_v3  ;;  %2261 = vmatprep.subr.bf16.mxu1 %v2338_v3  ;;  %v2343_v8 = vld [vmem:[%s2701_s26 + $0x20] sm:$0xff]   ;;  %v2345_v10 = vld [vmem:[%s2701_s26 + $0x18] sm:$0xff]   ;;  %v2347_v14 = vld [vmem:[%s2701_s26 + $0x10] sm:$0xff]  }
  0x64   : > { %v2354_v12 = vld [vmem:[%s2708_s12 + $0x4] ss:$12 sps:$4 sm:$0xff]   ;;  %v2348_v15 = vld [vmem:[%s2701_s26 + $0x48] sm:$0xff]   ;;  %v2358_v19 = vld [vmem:[%s2701_s26 + $0xb8] sm:$0xff]  }
  0x65   : > { %v2357_v13 = vld [vmem:[%s2708_s12 + $0x124] ss:$12 sps:$4 sm:$0xff]   ;;  %1022 = vmatprep.mubr.bf16.mxu0 %v2354_v12  ;;  %v2349_v16 = vld [vmem:[%s2701_s26 + $0x8] sm:$0xff]   ;;  %v2368_v29 = vld [vmem:[%s2708_s12 + $0x34] ss:$12 sps:$4 sm:$0xff]  }
  0x66   : > { %2079 = vmatpush3.bf16.msra.mxu0 %v2339_v4  ;;  %2269 = vmatpush3.bf16.msra.mxu1 %v2339_v4  ;;  %v2350_v17 = vld [vmem:[%s2701_s26 + $0x40] sm:$0xff]   ;;  %v2360_v22 = vld [vmem:[%s2708_s12 + $0x1c] ss:$12 sps:$4 sm:$0xff]   ;;  %v2359_v23 = vld [vmem:[%s2701_s26 + $0xb0] sm:$0xff]  }
  0x67   : > { %2080 = vmatprep.subr.bf16.mxu0 %v2340_v5  ;;  %2262 = vmatprep.subr.bf16.mxu1 %v2340_v5  ;;  %v2351_v18 = vld [vmem:[%s2701_s26] sm:$0xff]   ;;  %v2362_v24 = vld [vmem:[%s2708_s12 + $0x13c] ss:$12 sps:$4 sm:$0xff]   ;;  %v2375_v34 = vld [vmem:[%s2701_s26 + $0x90] sm:$0xff]  }
  0x68   : > { %1118 = vmatprep.mubr.bf16.mxu1 %v2357_v13  ;;  %v2352_v20 = vld [vmem:[%s2708_s12] ss:$12 sps:$4 sm:$0xff]   ;;  %v2364_v25 = vld [vmem:[%s2708_s12 + $0x18] ss:$12 sps:$4 sm:$0xff]   ;;  %v2372_v32 = vld [vmem:[%s2708_s12 + $0x30] ss:$12 sps:$4 sm:$0xff]  }
  0x69   : > { %v2355_v21 = vld [vmem:[%s2708_s12 + $0x120] ss:$12 sps:$4 sm:$0xff]   ;;  %v2365_v27 = vld [vmem:[%s2708_s12 + $0x138] ss:$12 sps:$4 sm:$0xff]   ;;  %v2373_v33 = vld [vmem:[%s2708_s12 + $0x150] ss:$12 sps:$4 sm:$0xff]  }
  0x6a   : > { %2081 = vmatpush3.bf16.msra.mxu0 %v2341_v6  ;;  %2270 = vmatpush3.bf16.msra.mxu1 %v2341_v6  ;;  %v2366_v26 = vld [vmem:[%s2701_s26 + $0xa8] sm:$0xff]   ;;  %v2367_v28 = vld [vmem:[%s2701_s26 + $0xa0] sm:$0xff]   ;;  %v2374_v31 = vld [vmem:[%s2701_s26 + $0x98] sm:$0xff]  }
  0x6b   : > { %2082 = vmatprep.subr.bf16.mxu0 %v2342_v7  ;;  %2263 = vmatprep.subr.bf16.mxu1 %v2342_v7  ;;  %v2370_v30 = vld [vmem:[%s2708_s12 + $0x154] ss:$12 sps:$4 sm:$0xff]   ;;  %v2376_v35 = vld [vmem:[%s2708_s12 + $0x4c] ss:$12 sps:$4 sm:$0xff]   ;;  %v2384_v40 = vld [vmem:[%s2708_s12 + $0x64] ss:$12 sps:$4 sm:$0xff]  }
  0x6c   : > { %v2378_v36 = vld [vmem:[%s2708_s12 + $0x16c] ss:$12 sps:$4 sm:$0xff]   ;;  %v2380_v38 = vld [vmem:[%s2708_s12 + $0x48] ss:$12 sps:$4 sm:$0xff]   ;;  %v2383_v41 = vld [vmem:[%s2701_s26 + $0x80] sm:$0xff]  }
  0x6d   : > { %v2382_v37 = vld [vmem:[%s2701_s26 + $0x88] sm:$0xff]   ;;  %v2391_v46 = vld [vmem:[%s2708_s12 + $0x38] ss:$12 sps:$4 sm:$0xff]   ;;  %v2393_v48 = vld [vmem:[%s2708_s12 + $0x50] ss:$12 sps:$4 sm:$0xff]  }
  0x6e   : > { %2083 = vmatpush3.bf16.msra.mxu0 %v2343_v8  ;;  %2271 = vmatpush3.bf16.msra.mxu1 %v2343_v8  ;;  %v2381_v39 = vld [vmem:[%s2708_s12 + $0x168] ss:$12 sps:$4 sm:$0xff]   ;;  %v2387_v43 = vld [vmem:[%s2708_s12 + $0x60] ss:$12 sps:$4 sm:$0xff]   ;;  %v2392_v47 = vld [vmem:[%s2708_s12 + $0x78] ss:$12 sps:$4 sm:$0xff]  }
  0x6f   : > { %2084 = vmatprep.subr.bf16.mxu0 %v2344_v9  ;;  %2264 = vmatprep.subr.bf16.mxu1 %v2344_v9  ;;  %v2386_v42 = vld [vmem:[%s2708_s12 + $0x8] ss:$12 sps:$4 sm:$0xff]   ;;  %v2388_v44 = vld [vmem:[%s2708_s12 + $0x20] ss:$12 sps:$4 sm:$0xff]   ;;  %v2397_v51 = vld [vmem:[%s2708_s12 + $0x90] ss:$12 sps:$4 sm:$0xff]  }
  0x70   : > { %v2389_v45 = vld [vmem:[%s2708_s12 + $0x7c] ss:$12 sps:$4 sm:$0xff]   ;;  %v2394_v49 = vld [vmem:[%s2708_s12 + $0x94] ss:$12 sps:$4 sm:$0xff]   ;;  %v2399_v53 = vld [vmem:[%s2708_s12 + $0xac] ss:$12 sps:$4 sm:$0xff]  }
  0x71   : > { %v2396_v50 = vld [vmem:[%s2708_s12 + $0x68] ss:$12 sps:$4 sm:$0xff]   ;;  %v2398_v52 = vld [vmem:[%s2708_s12 + $0x80] ss:$12 sps:$4 sm:$0xff]   ;;  %v2401_v54 = vld [vmem:[%s2708_s12 + $0x98] ss:$12 sps:$4 sm:$0xff]  }
  0x72   : > { %2085 = vmatpush3.bf16.msra.mxu0 %v2345_v10  ;;  %2272 = vmatpush3.bf16.msra.mxu1 %v2345_v10  ;;  %v2402_v55 = vld [vmem:[%s2708_s12 + $0xa8] ss:$12 sps:$4 sm:$0xff]   ;;  %v2403_v56 = vld [vmem:[%s2708_s12 + $0xb0] ss:$12 sps:$4 sm:$0xff]   ;;  %v2407_v59 = vld [vmem:[%s2708_s12 + $0xc0] ss:$12 sps:$4 sm:$0xff]  }
  0x73   : > { %2086 = vmatprep.subr.bf16.mxu0 %v2346_v11  ;;  %2265 = vmatprep.subr.bf16.mxu1 %v2346_v11  ;;  %v2404_v57 = vld [vmem:[%s2708_s12 + $0xc4] ss:$12 sps:$4 sm:$0xff]   ;;  %v2406_v58 = vld [vmem:[%s2708_s12 + $0xc8] ss:$12 sps:$4 sm:$0xff]   ;;  %v2408_v60 = vld [vmem:[%s2708_s12 + $0xe0] ss:$12 sps:$4 sm:$0xff]  }
  0x74   : > { %v2409_v61 = vld [vmem:[%s2708_s12 + $0xdc] ss:$12 sps:$4 sm:$0xff]   ;;  %v2411_v62 = vld [vmem:[%s2708_s12 + $0xf8] ss:$12 sps:$4 sm:$0xff]   ;;  %v2414_v1 = vld [vmem:[%s2708_s12 + $0xf4] ss:$12 sps:$4 sm:$0xff]  }
  0x75   : > { %v2412_v63 = vld [vmem:[%s2708_s12 + $0xd8] ss:$12 sps:$4 sm:$0xff]   ;;  %v2413_v0 = vld [vmem:[%s2708_s12 + $0x110] ss:$12 sps:$4 sm:$0xff]   ;;  %v2416_v2 = vld [vmem:[%s2708_s12 + $0x128] ss:$12 sps:$4 sm:$0xff]  }
  0x76   : > { %2087 = vmatpush3.bf16.msra.mxu0 %v2347_v14  ;;  %2273 = vmatpush3.bf16.msra.mxu1 %v2347_v14  ;;  %v2417_v3 = vld [vmem:[%s2708_s12 + $0xf0] ss:$12 sps:$4 sm:$0xff]   ;;  %v2418_v4 = vld [vmem:[%s2708_s12 + $0x140] ss:$12 sps:$4 sm:$0xff]   ;;  %v2421_v6 = vld [vmem:[%s2708_s12 + $0x158] ss:$12 sps:$4 sm:$0xff]  }
  0x77   : > { %2088 = vmatprep.subr.bf16.mxu0 %v2348_v15  ;;  %2266 = vmatprep.subr.bf16.mxu1 %v2348_v15  ;;  %v2419_v5 = vld [vmem:[%s2708_s12 + $0x10c] ss:$12 sps:$4 sm:$0xff]   ;;  %v2422_v7 = vld [vmem:[%s2708_s12 + $0x108] ss:$12 sps:$4 sm:$0xff]   ;;  %v2423_v8 = vld [vmem:[%s2708_s12 + $0x170] ss:$12 sps:$4 sm:$0xff]  }
  0x7a   : > { %2089 = vmatpush3.bf16.msra.mxu0 %v2349_v16  ;;  %2274 = vmatpush3.bf16.msra.mxu1 %v2349_v16 }
  0x7b   : > { %2090 = vmatprep.subr.bf16.mxu0 %v2350_v17  ;;  %2267 = vmatprep.subr.bf16.mxu1 %v2350_v17 }
  0x7e   : > { %2091 = vmatpush3.bf16.msra.mxu0 %v2351_v18  ;;  %2275 = vmatpush3.bf16.msra.mxu1 %v2351_v18 }
  0x7f   : > { %2212 = vmatprep.subr.bf16.mxu1 %v2358_v19 }
  0x81   : > { %1023 = vmatmul.mubr.bf16.vlgmr.msra.gmra.mxu0 %v2352_v20  ;;  %1119 = vmatmul.mubr.bf16.vlgmr.msra.gmra.mxu1 %v2355_v21 }
  0x82   : > { %2213 = vmatpush3.bf16.msra.mxu1 %v2358_v19  ;;  %1030 = vmatprep.mubr.bf16.mxu0 %v2360_v22 }
  0x83   : > { %2214 = vmatprep.subr.bf16.mxu1 %v2359_v23  ;;  %1126 = vmatprep.mubr.bf16.mxu1 %v2362_v24 }
  0x86   : > { %2215 = vmatpush3.bf16.msra.mxu1 %v2359_v23 }
  0x87   : > { %2216 = vmatprep.subr.bf16.mxu1 %v2366_v26 }
  0x89   : > { %1031 = vmatmul.mubr.bf16.gmra.mxu0 %v2364_v25  ;;  %1127 = vmatmul.mubr.bf16.gmra.mxu1 %v2365_v27 }
  0x8a   : > { %2217 = vmatpush3.bf16.msra.mxu1 %v2366_v26  ;;  %1038 = vmatprep.mubr.bf16.mxu0 %v2368_v29 }
  0x8b   : > { %2218 = vmatprep.subr.bf16.mxu1 %v2367_v28  ;;  %1134 = vmatprep.mubr.bf16.mxu1 %v2370_v30 }
  0x8e   : > { %2219 = vmatpush3.bf16.msra.mxu1 %v2367_v28 }
  0x8f   : > { %2220 = vmatprep.subr.bf16.mxu1 %v2374_v31 }
  0x91   : > { %1039 = vmatmul.mubr.bf16.gmra.mxu0 %v2372_v32  ;;  %1135 = vmatmul.mubr.bf16.gmra.mxu1 %v2373_v33 }
  0x92   : > { %2221 = vmatpush3.bf16.msra.mxu1 %v2374_v31  ;;  %1046 = vmatprep.mubr.bf16.mxu0 %v2376_v35 }
  0x93   : > { %2222 = vmatprep.subr.bf16.mxu1 %v2375_v34  ;;  %1142 = vmatprep.mubr.bf16.mxu1 %v2378_v36 }
  0x96   : > { %2223 = vmatpush3.bf16.msra.mxu1 %v2375_v34 }
  0x97   : > { %2224 = vmatprep.subr.bf16.mxu1 %v2382_v37 }
  0x99   : > { %1047 = vmatmul.mubr.bf16.gmra.mxu0 %v2380_v38  ;;  %1143 = vmatmul.mubr.bf16.gmra.mxu1 %v2381_v39 }
  0x9a   : > { %2225 = vmatpush3.bf16.msra.mxu1 %v2382_v37  ;;  %1054 = vmatprep.mubr.bf16.mxu0 %v2384_v40 }
  0x9b   : > { %2226 = vmatprep.subr.bf16.mxu1 %v2383_v41  ;;  %2228 = vmatprep.mubr.bf16.mxu1 %v2386_v42 }
  0x9e   : > { %2227 = vmatpush3.bf16.msra.mxu1 %v2383_v41 }
  0xa1   : > { %1055 = vmatmul.mubr.bf16.gmra.mxu0 %v2387_v43  ;;  %2229 = vmatmul.mubr.bf16.vlgmr.msra.gmra.mxu1 %v2388_v44 }
  0xa2   : > { %1062 = vmatprep.mubr.bf16.mxu0 %v2389_v45  ;;  %2232 = vmatprep.mubr.bf16.mxu1 %v2391_v46 }
  0xa9   : > { %1063 = vmatmul.mubr.bf16.gmra.mxu0 %v2392_v47  ;;  %2233 = vmatmul.mubr.bf16.gmra.mxu1 %v2393_v48 }
  0xaa   : > { %1070 = vmatprep.mubr.bf16.mxu0 %v2394_v49  ;;  %2236 = vmatprep.mubr.bf16.mxu1 %v2396_v50  ;;  %v448_v49 = vld [vmem:[#allocation2 + $0xd8] sm:$0xff] }
  0xb1   : > { %1071 = vmatmul.mubr.bf16.gmra.mxu0 %v2397_v51  ;;  %2237 = vmatmul.mubr.bf16.gmra.mxu1 %v2398_v52 }
  0xb2   : > { %1078 = vmatprep.mubr.bf16.mxu0 %v2399_v53  ;;  %2240 = vmatprep.mubr.bf16.mxu1 %v2401_v54  ;;  %v446_v54 = vld [vmem:[#allocation2 + $0xb0] sm:$0xff] }
  0xb9   : > { %1079 = vmatmul.mubr.bf16.gmra.mxu0 %v2402_v55  ;;  %2241 = vmatmul.mubr.bf16.gmra.mxu1 %v2403_v56 }
  0xba   : > { %1086 = vmatprep.mubr.bf16.mxu0 %v2404_v57  ;;  %2244 = vmatprep.mubr.bf16.mxu1 %v2406_v58 }
  0xc1   : > { %1087 = vmatmul.mubr.bf16.gmra.mxu0 %v2407_v59  ;;  %2245 = vmatmul.mubr.bf16.gmra.mxu1 %v2408_v60  ;;  %v449_v60 = vld [vmem:[#allocation2 + $0x18] sm:$0xff] }
  0xc2   : > { %1094 = vmatprep.mubr.bf16.mxu0 %v2409_v61  ;;  %2248 = vmatprep.mubr.bf16.mxu1 %v2411_v62 }
  0xc9   : > { %1095 = vmatmul.mubr.bf16.gmra.mxu0 %v2412_v63  ;;  %2249 = vmatmul.mubr.bf16.gmra.mxu1 %v2413_v0 }
  0xca   : > { %1102 = vmatprep.mubr.bf16.mxu0 %v2414_v1  ;;  %2252 = vmatprep.mubr.bf16.mxu1 %v2416_v2  ;;  %v447_v2 = vld [vmem:[#allocation2] sm:$0xff] }
  0xd1   : > { %1103 = vmatmul.mubr.bf16.gmra.mxu0 %v2417_v3  ;;  %2253 = vmatmul.mubr.bf16.gmra.mxu1 %v2418_v4 }
  0xd2   : > { %1110 = vmatprep.mubr.bf16.mxu0 %v2419_v5  ;;  %2256 = vmatprep.mubr.bf16.mxu1 %v2421_v6 }
  0xd9   : > { %1111 = vmatmul.mubr.bf16.gmra.mxu0 %v2422_v7  ;;  %2257 = vmatmul.mubr.bf16.gmra.mxu1 %v2423_v8  ;;  %v452_v8 = vld [vmem:[#allocation2 + $0x30] sm:$0xff] }
 0x141   : > { %v2092_v9 = vpop.f32.mrf.mxu0  ;;  %v2164_v10 = vpop.f32.mrf.mxu1 }
 0x143   : > { %v2093_v11 = vpop.f32.mrf.mxu0  ;;  %v2165_v12 = vpop.f32.mrf.mxu1 }
 0x144   : > { %v2783_v13 = vadd.f32 %v2165_v12, %v2164_v10  ;;  %v2094_v51 = vadd.f32 %v2093_v11, %v2092_v9 }
 0x145   : > { %v2095_v14 = vpop.f32.mrf.mxu0  ;;  %v2167_v15 = vpop.f32.mrf.mxu1 }
 0x147   : > { %v2096_v16 = vpop.f32.mrf.mxu0  ;;  %v2168_v17 = vpop.f32.mrf.mxu1 }
 0x148   : > { %v2785_v18 = vadd.f32 %v2168_v17, %v2167_v15  ;;  %v2097_v62 = vadd.f32 %v2096_v16, %v2095_v14  ;;  %v450_v17 = vld [vmem:[#allocation2 + $0x50] sm:$0xff] }
 0x149   : > { %v2098_v19 = vpop.f32.mrf.mxu0  ;;  %v2170_v20 = vpop.f32.mrf.mxu1 }
 0x14b   : > { %v2099_v21 = vpop.f32.mrf.mxu0  ;;  %v2171_v22 = vpop.f32.mrf.mxu1 }
 0x14c   : > { %v2787_v23 = vadd.f32 %v2171_v22, %v2170_v20  ;;  %v2100_v47 = vadd.f32 %v2099_v21, %v2098_v19  ;;  %v453_v22 = vld [vmem:[#allocation2 + $0x48] sm:$0xff] }
 0x14d   : > { %v2101_v24 = vpop.f32.mrf.mxu0  ;;  %v2173_v25 = vpop.f32.mrf.mxu1 }
 0x14f   : > { %v2102_v26 = vpop.f32.mrf.mxu0  ;;  %v2174_v27 = vpop.f32.mrf.mxu1 }
 0x150   : > { %v2789_v28 = vadd.f32 %v2174_v27, %v2173_v25  ;;  %v2103_v56 = vadd.f32 %v2102_v26, %v2101_v24 }
 0x151   : > { %v2104_v29 = vpop.f32.mrf.mxu0  ;;  %v2176_v30 = vpop.f32.mrf.mxu1 }
 0x153   : > { %v2105_v31 = vpop.f32.mrf.mxu0  ;;  %v2177_v32 = vpop.f32.mrf.mxu1 }
 0x154   : > { %v2791_v33 = vadd.f32 %v2177_v32, %v2176_v30  ;;  %v2106_v10 = vadd.f32 %v2105_v31, %v2104_v29  ;;  %v451_v32 = vld [vmem:[#allocation2 + $0x68] sm:$0xff] }
 0x155   : > { %v2107_v34 = vpop.f32.mrf.mxu0  ;;  %v2179_v35 = vpop.f32.mrf.mxu1 }
 0x157   : > { %v2108_v36 = vpop.f32.mrf.mxu0  ;;  %v2180_v37 = vpop.f32.mrf.mxu1 }
 0x158   : > { %v2793_v38 = vadd.f32 %v2180_v37, %v2179_v35  ;;  %v2109_v25 = vadd.f32 %v2108_v36, %v2107_v34 }
 0x159   : > { %v2110_v39 = vpop.f32.mrf.mxu0  ;;  %v2795_v40 = vpop.f32.mrf.mxu1 }
 0x15b   : > { %v2111_v41 = vpop.f32.mrf.mxu0  ;;  %v2797_v42 = vpop.f32.mrf.mxu1 }
 0x15c   : > { %v2112_v4 = vadd.f32 %v2111_v41, %v2110_v39  ;;  %v456_v41 = vld [vmem:[#allocation2 + $0xe8] sm:$0xff] }
 0x15d   : > { %v2113_v43 = vpop.f32.mrf.mxu0  ;;  %v2799_v44 = vpop.f32.mrf.mxu1 }
 0x15f   : > { %v2114_v45 = vpop.f32.mrf.mxu0  ;;  %v2801_v46 = vpop.f32.mrf.mxu1 }
 0x160   : > { %v2115_v16 = vadd.f32 %v2114_v45, %v2113_v43 }
 0x161   : > { %v2116_v48 = vpop.f32.mrf.mxu0  ;;  %v2230_v50 = vpop.f32.mrf.mxu1 }
 0x162   : > { %v1194_v52 = vadd.f32 %v2230_v50, %v2100_v47 }
 0x163   : > { %v2117_v53 = vpop.f32.mrf.mxu0  ;;  %v1185_v55 = vpop.f32.mrf.mxu1 }
 0x164   : > { %v1314_v57 = vadd.f32 %v1194_v52, %v448_v49  ;;  %v1186_v58 = vadd.f32 %v2094_v51, %v1185_v55  ;;  %v2118_v45 = vadd.f32 %v2117_v53, %v2116_v48  ;;  %v454_v51 = vld [vmem:[#allocation2 + $0x80] sm:$0xff] }
 0x165   : > { %v2119_v59 = vpop.f32.mrf.mxu0  ;;  %v2231_v61 = vpop.f32.mrf.mxu1 }
 0x166   : > { %1346 = vst [vmem:[#allocation2 + $0xd8] sm:$0xff] %v1314_v57  ;;  %v1312_v63 = vadd.f32 %v1186_v58, %v446_v54  ;;  %v1197_v0 = vadd.f32 %v2231_v61, %v2103_v56  ;;  %v457_v56 = vld [vmem:[#allocation2 + $0xb8] sm:$0xff] }
 0x167   : > { %v2120_v1 = vpop.f32.mrf.mxu0  ;;  %v1188_v3 = vpop.f32.mrf.mxu1 }
 0x168   : > { %1344 = vst [vmem:[#allocation2 + $0xb0] sm:$0xff] %v1312_v63  ;;  %v1315_v5 = vadd.f32 %v1197_v0, %v449_v60  ;;  %v1189_v6 = vadd.f32 %v2097_v62, %v1188_v3  ;;  %v2121_v58 = vadd.f32 %v2120_v1, %v2119_v59  ;;  %v455_v63 = vld [vmem:[#allocation2 + $0x88] sm:$0xff] }
 0x169   : > { %v2122_v7 = vpop.f32.mrf.mxu0  ;;  %v2234_v9 = vpop.f32.mrf.mxu1  ;;  %v460_v1 = vld [vmem:[#allocation2 + $0x8] sm:$0xff] }
 0x16a   : > { %1347 = vst [vmem:[#allocation2 + $0x18] sm:$0xff] %v1315_v5  ;;  %v1313_v11 = vadd.f32 %v1189_v6, %v447_v2  ;;  %v1210_v12 = vadd.f32 %v2234_v9, %v2112_v4 }
 0x16b   : > { %v2123_v15 = vpop.f32.mrf.mxu0  ;;  %v1201_v14 = vpop.f32.mrf.mxu1 }
 0x16c   : > { %1345 = vst [vmem:[#allocation2] sm:$0xff] %v1313_v11  ;;  %v1318_v19 = vadd.f32 %v1210_v12, %v452_v8  ;;  %v1202_v20 = vadd.f32 %v2106_v10, %v1201_v14  ;;  %v2124_v31 = vadd.f32 %v2123_v15, %v2122_v7  ;;  %v458_v7 = vld [vmem:[#allocation2 + $0x60] sm:$0xff] }
 0x16d   : > { %v2125_v21 = vpop.f32.mrf.mxu0  ;;  %v2235_v24 = vpop.f32.mrf.mxu1 }
 0x16e   : > { %1350 = vst [vmem:[#allocation2 + $0x30] sm:$0xff] %v1318_v19  ;;  %v1316_v26 = vadd.f32 %v1202_v20, %v450_v17  ;;  %v1213_v27 = vadd.f32 %v2235_v24, %v2115_v16  ;;  %v459_v16 = vld [vmem:[#allocation2 + $0xf0] sm:$0xff]  ;;  %v461_v24 = vld [vmem:[#allocation2 + $0x78] sm:$0xff] }
 0x16f   : > { %v2126_v30 = vpop.f32.mrf.mxu0  ;;  %v1204_v29 = vpop.f32.mrf.mxu1 }
 0x170   : > { %1348 = vst [vmem:[#allocation2 + $0x50] sm:$0xff] %v1316_v26  ;;  %v1319_v35 = vadd.f32 %v1213_v27, %v453_v22  ;;  %v1205_v37 = vadd.f32 %v2109_v25, %v1204_v29  ;;  %v2127_v36 = vadd.f32 %v2126_v30, %v2125_v21 }
 0x171   : > { %v2128_v39 = vpop.f32.mrf.mxu0  ;;  %v2238_v43 = vpop.f32.mrf.mxu1 }
 0x172   : > { %1351 = vst [vmem:[#allocation2 + $0x48] sm:$0xff] %v1319_v35  ;;  %v1317_v47 = vadd.f32 %v1205_v37, %v451_v32  ;;  %v1226_v49 = vadd.f32 %v2238_v43, %v2124_v31  ;;  %v462_v37 = vld [vmem:[#allocation2 + $0x38] sm:$0xff] }
 0x173   : > { %v2129_v50 = vpop.f32.mrf.mxu0  ;;  %v1217_v34 = vpop.f32.mrf.mxu1 }
 0x174   : > { %1349 = vst [vmem:[#allocation2 + $0x68] sm:$0xff] %v1317_v47  ;;  %v1322_v52 = vadd.f32 %v1226_v49, %v456_v41  ;;  %v1218_v54 = vadd.f32 %v2118_v45, %v1217_v34  ;;  %v2130_v4 = vadd.f32 %v2129_v50, %v2128_v39 }
 0x175   : > { %v2131_v55 = vpop.f32.mrf.mxu0  ;;  %v2239_v57 = vpop.f32.mrf.mxu1 }
 0x176   : > { %1354 = vst [vmem:[#allocation2 + $0xe8] sm:$0xff] %v1322_v52  ;;  %v1320_v60 = vadd.f32 %v1218_v54, %v454_v51  ;;  %v1229_v61 = vadd.f32 %v2239_v57, %v2127_v36  ;;  %v463_v51 = vld [vmem:[#allocation2 + $0x58] sm:$0xff] }
 0x177   : > { %v2132_v62 = vpop.f32.mrf.mxu0  ;;  %v1220_v48 = vpop.f32.mrf.mxu1 }
 0x178   : > { %1352 = vst [vmem:[#allocation2 + $0x80] sm:$0xff] %v1320_v60  ;;  %v1323_v53 = vadd.f32 %v1229_v61, %v457_v56  ;;  %v1221_v0 = vadd.f32 %v2121_v58, %v1220_v48  ;;  %v2133_v12 = vadd.f32 %v2132_v62, %v2131_v55  ;;  %v464_v58 = vld [vmem:[#allocation2 + $0x40] sm:$0xff] }
 0x179   : > { %v2134_v2 = vpop.f32.mrf.mxu0  ;;  %v2242_v3 = vpop.f32.mrf.mxu1 }
 0x17a   : > { %1355 = vst [vmem:[#allocation2 + $0xb8] sm:$0xff] %v1323_v53  ;;  %v1321_v5 = vadd.f32 %v1221_v0, %v455_v63 }
 0x17b   : > { %v2135_v6 = vpop.f32.mrf.mxu0  ;;  %v1233_v8 = vpop.f32.mrf.mxu1 }
 0x17c   : > { %1353 = vst [vmem:[#allocation2 + $0x88] sm:$0xff] %v1321_v5  ;;  %v2136_v9 = vadd.f32 %v2135_v6, %v2134_v2  ;;  %v1234_v59 = vadd.f32 %v2130_v4, %v1233_v8  ;;  %v465_v2 = vld [vmem:[#allocation2 + $0xc8] sm:$0xff]  ;;  %v472_v4 = vld [vmem:[#allocation2 + $0x10] sm:$0xff] }
 0x17d   : > { %v2137_v10 = vpop.f32.mrf.mxu0  ;;  %v2243_v11 = vpop.f32.mrf.mxu1 }
 0x17e   : > { %v1242_v15 = vadd.f32 %v2242_v3, %v2136_v9  ;;  %v1324_v17 = vadd.f32 %v1234_v59, %v458_v7  ;;  %v470_v9 = vld [vmem:[#allocation2 + $0xa8] sm:$0xff] }
 0x17f   : > { %v2138_v14 = vpop.f32.mrf.mxu0  ;;  %v1236_v19 = vpop.f32.mrf.mxu1 }
 0x180   : > { %v1326_v20 = vadd.f32 %v1242_v15, %v460_v1  ;;  %1356 = vst [vmem:[#allocation2 + $0x60] sm:$0xff] %v1324_v17  ;;  %v2139_v21 = vadd.f32 %v2138_v14, %v2137_v10  ;;  %v1237_v22 = vadd.f32 %v2133_v12, %v1236_v19  ;;  %v466_v15 = vld [vmem:[#allocation2 + $0xe0] sm:$0xff]  ;;  %v473_v14 = vld [vmem:[#allocation2 + $0x28] sm:$0xff] }
 0x181   : > { %v2140_v25 = vpop.f32.mrf.mxu0  ;;  %v2246_v26 = vpop.f32.mrf.mxu1 }
 0x182   : > { %1358 = vst [vmem:[#allocation2 + $0x8] sm:$0xff] %v1326_v20  ;;  %v1245_v27 = vadd.f32 %v2243_v11, %v2139_v21  ;;  %v1325_v30 = vadd.f32 %v1237_v22, %v459_v16 }
 0x183   : > { %v2141_v32 = vpop.f32.mrf.mxu0  ;;  %v1249_v29 = vpop.f32.mrf.mxu1 }
 0x184   : > { %v1327_v31 = vadd.f32 %v1245_v27, %v461_v24  ;;  %1357 = vst [vmem:[#allocation2 + $0xf0] sm:$0xff] %v1325_v30  ;;  %v2142_v35 = vadd.f32 %v2141_v32, %v2140_v25  ;;  %v471_v24 = vld [vmem:[#allocation2 + $0xd0] sm:$0xff] }
 0x185   : > { %v2143_v39 = vpop.f32.mrf.mxu0  ;;  %v2247_v41 = vpop.f32.mrf.mxu1  ;;  %v467_v32 = vld [vmem:[#allocation2 + $0x90] sm:$0xff] }
 0x186   : > { %1359 = vst [vmem:[#allocation2 + $0x78] sm:$0xff] %v1327_v31  ;;  %v1250_v43 = vadd.f32 %v2142_v35, %v1249_v29  ;;  %v476_v31 = vld [vmem:[#allocation2 + $0x20] sm:$0xff] }
 0x187   : > { %v2144_v45 = vpop.f32.mrf.mxu0  ;;  %v1252_v47 = vpop.f32.mrf.mxu1 }
 0x188   : > { %v1328_v49 = vadd.f32 %v1250_v43, %v462_v37  ;;  %v2145_v50 = vadd.f32 %v2144_v45, %v2143_v39 }
 0x189   : > { %v2146_v34 = vpop.f32.mrf.mxu0  ;;  %v2803_v36 = vpop.f32.mrf.mxu1 }
 0x18a   : > { %1360 = vst [vmem:[#allocation2 + $0x38] sm:$0xff] %v1328_v49  ;;  %v1253_v52 = vadd.f32 %v2145_v50, %v1252_v47  ;;  %v468_v50 = vld [vmem:[#allocation2 + $0x70] sm:$0xff] }
 0x18b   : > { %v2147_v54 = vpop.f32.mrf.mxu0  ;;  %v1265_v55 = vpop.f32.mrf.mxu1 }
 0x18c   : > { %v1329_v56 = vadd.f32 %v1253_v52, %v463_v51  ;;  %v2148_v57 = vadd.f32 %v2147_v54, %v2146_v34  ;;  %v477_v34 = vld [vmem:[#allocation2 + $0x98] sm:$0xff] }
 0x18d   : > { %v2149_v60 = vpop.f32.mrf.mxu0  ;;  %v2805_v61 = vpop.f32.mrf.mxu1 }
 0x18e   : > { %1361 = vst [vmem:[#allocation2 + $0x58] sm:$0xff] %v1329_v56  ;;  %v1258_v62 = vadd.f32 %v2246_v26, %v2148_v57 }
 0x18f   : > { %v2150_v63 = vpop.f32.mrf.mxu0  ;;  %v1268_v48 = vpop.f32.mrf.mxu1 }
 0x190   : > { %v1330_v53 = vadd.f32 %v1258_v62, %v464_v58  ;;  %v2151_v0 = vadd.f32 %v2150_v63, %v2149_v60 }
 0x191   : > { %v2152_v3 = vpop.f32.mrf.mxu0  ;;  %v2254_v5 = vpop.f32.mrf.mxu1 }
 0x192   : > { %1362 = vst [vmem:[#allocation2 + $0x40] sm:$0xff] %v1330_v53  ;;  %v1261_v6 = vadd.f32 %v2247_v41, %v2151_v0  ;;  %v1290_v7 = vadd.f32 %v2254_v5, %v2787_v23  ;;  %v2184_v23 = vadd.f32 %v2797_v42, %v2795_v40  ;;  %v2187_v40 = vadd.f32 %v2801_v46, %v2799_v44  ;;  %v474_v41 = vld [vmem:[#allocation2 + $0xa0] sm:$0xff]  ;;  %v475_v46 = vld [vmem:[#allocation2 + $0xf8] sm:$0xff] }
 0x193   : > { %v2153_v8 = vpop.f32.mrf.mxu0  ;;  %v1281_v59 = vpop.f32.mrf.mxu1 }
 0x194   : > { %v1331_v1 = vadd.f32 %v1261_v6, %v465_v2  ;;  %v1338_v10 = vadd.f32 %v1290_v7, %v472_v4  ;;  %v2154_v11 = vadd.f32 %v2153_v8, %v2152_v3  ;;  %v1282_v12 = vadd.f32 %v2783_v13, %v1281_v59 }
 0x195   : > { %v2155_v17 = vpop.f32.mrf.mxu0  ;;  %v2255_v16 = vpop.f32.mrf.mxu1 }
 0x196   : > { %1363 = vst [vmem:[#allocation2 + $0xc8] sm:$0xff] %v1331_v1  ;;  %1370 = vst [vmem:[#allocation2 + $0x10] sm:$0xff] %v1338_v10  ;;  %v1266_v19 = vadd.f32 %v2154_v11, %v1265_v55  ;;  %v1336_v20 = vadd.f32 %v1282_v12, %v470_v9  ;;  %v1293_v21 = vadd.f32 %v2255_v16, %v2789_v28 }
 0x197   : > { %v2156_v22 = vpop.f32.mrf.mxu0  ;;  %v1284_v25 = vpop.f32.mrf.mxu1 }
 0x198   : > { %v1332_v26 = vadd.f32 %v1266_v19, %v466_v15  ;;  %1368 = vst [vmem:[#allocation2 + $0xa8] sm:$0xff] %v1336_v20  ;;  %v1339_v27 = vadd.f32 %v1293_v21, %v473_v14  ;;  %v2157_v13 = vadd.f32 %v2156_v22, %v2155_v17  ;;  %v1285_v30 = vadd.f32 %v2785_v18, %v1284_v25 }
 0x199   : > { %v2158_v29 = vpop.f32.mrf.mxu0  ;;  %v2258_v35 = vpop.f32.mrf.mxu1 }
 0x19a   : > { %1364 = vst [vmem:[#allocation2 + $0xe0] sm:$0xff] %v1332_v26  ;;  %1371 = vst [vmem:[#allocation2 + $0x28] sm:$0xff] %v1339_v27  ;;  %v1269_v37 = vadd.f32 %v2157_v13, %v1268_v48  ;;  %v1337_v28 = vadd.f32 %v1285_v30, %v471_v24  ;;  %v1306_v39 = vadd.f32 %v2258_v35, %v2184_v23 }
 0x19b   : > { %v2159_v42 = vpop.f32.mrf.mxu0  ;;  %v1297_v43 = vpop.f32.mrf.mxu1 }
 0x19c   : > { %v1333_v45 = vadd.f32 %v1269_v37, %v467_v32  ;;  %1369 = vst [vmem:[#allocation2 + $0xd0] sm:$0xff] %v1337_v28  ;;  %v1342_v47 = vadd.f32 %v1306_v39, %v476_v31  ;;  %v2160_v49 = vadd.f32 %v2159_v42, %v2158_v29  ;;  %v1298_v18 = vadd.f32 %v2791_v33, %v1297_v43  ;;  %v469_v33 = vld [vmem:[#allocation2 + $0xc0] sm:$0xff] }
 0x19d   : > { %v2161_v51 = vpop.f32.mrf.mxu0  ;;  %v2259_v52 = vpop.f32.mrf.mxu1 }
 0x19e   : > { %1365 = vst [vmem:[#allocation2 + $0x90] sm:$0xff] %v1333_v45  ;;  %1374 = vst [vmem:[#allocation2 + $0x20] sm:$0xff] %v1342_v47  ;;  %v1274_v54 = vadd.f32 %v2803_v36, %v2160_v49  ;;  %v1340_v55 = vadd.f32 %v1298_v18, %v474_v41  ;;  %v1309_v56 = vadd.f32 %v2259_v52, %v2187_v40 }
 0x19f   : > { %v2162_v44 = vpop.f32.mrf.mxu0  ;;  %v1300_v57 = vpop.f32.mrf.mxu1 }
 0x1a0   : > { %v1334_v58 = vadd.f32 %v1274_v54, %v468_v50  ;;  %1372 = vst [vmem:[#allocation2 + $0xa0] sm:$0xff] %v1340_v55  ;;  %v1343_v60 = vadd.f32 %v1309_v56, %v477_v34  ;;  %v2163_v62 = vadd.f32 %v2162_v44, %v2161_v51  ;;  %v1301_v63 = vadd.f32 %v2793_v38, %v1300_v57 }
 0x1a2   : > { %1366 = vst [vmem:[#allocation2 + $0x70] sm:$0xff] %v1334_v58  ;;  %1375 = vst [vmem:[#allocation2 + $0x98] sm:$0xff] %v1343_v60  ;;  %v1277_v48 = vadd.f32 %v2805_v61, %v2163_v62  ;;  %v1341_v53 = vadd.f32 %v1301_v63, %v475_v46  ;;  %1379 = sbr.rel (%p1913_p13) target bundleno = 449 (0x1c1), region = 66 }
 0x1a4   : > { %v1335_v0 = vadd.f32 %v1277_v48, %v469_v33  ;;  %1373 = vst [vmem:[#allocation2 + $0xf8] sm:$0xff] %v1341_v53 }
 0x1a6   : > { %1367 = vst [vmem:[#allocation2 + $0xc0] sm:$0xff] %v1335_v0 }
 0x1a7   : > { %v1380_v36 = vld [vmem:[#allocation2 + $0xb0] sm:$0xff]  ;;  %v1381_v2 = vld [vmem:[#allocation2] sm:$0xff]  ;;  %v1382_v5 = vld [vmem:[#allocation2 + $0xd8] sm:$0xff] }
 0x1a8   : > { %v2823_v3 = vld [vmem:[%s2896_s2] ss:$0 sm:$0xff]  ;;  %v1383_v61 = vld [vmem:[#allocation2 + $0x18] sm:$0xff]  ;;  %v1384_v6 = vld [vmem:[#allocation2 + $0x50] sm:$0xff] }
 0x1a9   : > { %v1419_v38 = vadd.f32 %v2823_v3, %v1380_v36  ;;  %v1420_v4 = vadd.f32 %v2823_v3, %v1381_v2  ;;  %v1421_v7 = vadd.f32 %v2823_v3, %v1382_v5  ;;  %v1422_v8 = vadd.f32 %v2823_v3, %v1383_v61  ;;  %v1385_v9 = vld [vmem:[#allocation2 + $0x68] sm:$0xff]  ;;  %v1386_v1 = vld [vmem:[#allocation2 + $0x30] sm:$0xff]  ;;  %v1388_v14 = vld [vmem:[#allocation2 + $0x80] sm:$0xff] }
 0x1aa   : > { %v1423_v59 = vadd.f32 %v2823_v3, %v1384_v6  ;;  %v1387_v10 = vld [vmem:[#allocation2 + $0x48] sm:$0xff]  ;;  %v1424_v15 = vadd.f32 %v2823_v3, %v1385_v9  ;;  %v1425_v17 = vadd.f32 %v2823_v3, %v1386_v1  ;;  %v1391_v24 = vld [vmem:[#allocation2 + $0xb8] sm:$0xff]  ;;  %v1392_v25 = vld [vmem:[#allocation2 + $0x60] sm:$0xff]  ;;  %v1427_v30 = vadd.f32 %v2823_v3, %v1388_v14 }
 0x1ab   : > { %v1451_v11 = vmax.f32 %v1419_v38, 0.0  ;;  %v1452_v12 = vmax.f32 %v1420_v4, 0.0  ;;  %v1389_v16 = vld [vmem:[#allocation2 + $0x88] sm:$0xff]  ;;  %v1453_v20 = vmax.f32 %v1421_v7, 0.0  ;;  %v1454_v21 = vmax.f32 %v1422_v8, 0.0  ;;  %v1393_v32 = vld [vmem:[#allocation2 + $0xf0] sm:$0xff] }
 0x1ac   : > { %v1390_v19 = vld [vmem:[#allocation2 + $0xe8] sm:$0xff]  ;;  %v1455_v23 = vmax.f32 %v1423_v59, 0.0  ;;  %v1426_v22 = vadd.f32 %v2823_v3, %v1387_v10  ;;  %v1456_v27 = vmax.f32 %v1424_v15, 0.0  ;;  %v1457_v13 = vmax.f32 %v1425_v17, 0.0  ;;  %v1395_v39 = vld [vmem:[#allocation2 + $0x78] sm:$0xff]  ;;  %v1398_v34 = vld [vmem:[#allocation2 + $0x40] sm:$0xff] }
 0x1ad   : > { %v1984_v26 = vpack.c.bf16 %v1452_v12, %v1451_v11  ;;  %v1989_v29 = vpack.c.bf16 %v1454_v21, %v1453_v20  ;;  %v1428_v35 = vadd.f32 %v2823_v3, %v1389_v16  ;;  %v1429_v37 = vadd.f32 %v2823_v3, %v1390_v19  ;;  %v1394_v28 = vld [vmem:[#allocation2 + $0x8] sm:$0xff]  ;;  %v1396_v45 = vld [vmem:[#allocation2 + $0x38] sm:$0xff]  ;;  %v1400_v62 = vld [vmem:[#allocation2 + $0xe0] sm:$0xff] }
 0x1ae   : > { %v1458_v31 = vmax.f32 %v1426_v22, 0.0  ;;  %v1994_v40 = vpack.c.bf16 %v1456_v27, %v1455_v23  ;;  %v1459_v42 = vmax.f32 %v1427_v30, 0.0  ;;  %v1430_v41 = vadd.f32 %v2823_v3, %v1391_v24  ;;  %v1397_v47 = vld [vmem:[#allocation2 + $0x58] sm:$0xff]  ;;  %v1399_v44 = vld [vmem:[#allocation2 + $0xc8] sm:$0xff]  ;;  %v1401_v63 = vld [vmem:[#allocation2 + $0x90] sm:$0xff] }
 0x1af   : > { %1985 = vst [vmem:[%s2706_s30] sm:$0xff] %v1984_v26   ;;  %v1431_v43 = vadd.f32 %v2823_v3, %v1392_v25  ;;  %2061 = vst [vmem:[%s2706_s30 + $0x8] sm:$0xff] %v1989_v29   ;;  %v1460_v18 = vmax.f32 %v1428_v35, 0.0  ;;  %v1461_v50 = vmax.f32 %v1429_v37, 0.0  ;;  %v1432_v51 = vadd.f32 %v2823_v3, %v1393_v32  ;;  %v1402_v36 = vld [vmem:[#allocation2 + $0x70] sm:$0xff]  ;;  %v1403_v2 = vld [vmem:[#allocation2 + $0xc0] sm:$0xff] }
 0x1b0   : > { %v1999_v49 = vpack.c.bf16 %v1458_v31, %v1457_v13  ;;  %2062 = vst [vmem:[%s2706_s30 + $0x10] sm:$0xff] %v1994_v40   ;;  %v1462_v52 = vmax.f32 %v1430_v41, 0.0  ;;  %v1433_v55 = vadd.f32 %v2823_v3, %v1394_v28  ;;  %v1434_v56 = vadd.f32 %v2823_v3, %v1395_v39  ;;  %v1404_v6 = vld [vmem:[#allocation2 + $0xa8] sm:$0xff]  ;;  %v1405_v7 = vld [vmem:[#allocation2 + $0xd0] sm:$0xff]  ;;  %v1408_v23 = vld [vmem:[#allocation2 + $0xa0] sm:$0xff] }
 0x1b1   : > { %v1463_v54 = vmax.f32 %v1431_v43, 0.0  ;;  %v2004_v46 = vpack.c.bf16 %v1460_v18, %v1459_v42  ;;  %v1464_v57 = vmax.f32 %v1432_v51, 0.0  ;;  %v1435_v58 = vadd.f32 %v2823_v3, %v1396_v45  ;;  %v1406_v10 = vld [vmem:[#allocation2 + $0x10] sm:$0xff]  ;;  %v1407_v14 = vld [vmem:[#allocation2 + $0x28] sm:$0xff]  ;;  %v1409_v22 = vld [vmem:[#allocation2 + $0xf8] sm:$0xff] }
 0x1b2   : > { %2063 = vst [vmem:[%s2706_s30 + $0x18] sm:$0xff] %v1999_v49   ;;  %v1436_v60 = vadd.f32 %v2823_v3, %v1397_v47  ;;  %v2009_v33 = vpack.c.bf16 %v1462_v52, %v1461_v50  ;;  %v1465_v48 = vmax.f32 %v1433_v55, 0.0  ;;  %v1466_v53 = vmax.f32 %v1434_v56, 0.0  ;;  %v1410_v13 = vld [vmem:[#allocation2 + $0x20] sm:$0xff]  ;;  %v1411_v30 = vld [vmem:[#allocation2 + $0x98] sm:$0xff] }
 0x1b3   : > { %v1437_v0 = vadd.f32 %v2823_v3, %v1398_v34  ;;  %2064 = vst [vmem:[%s2706_s30 + $0x20] sm:$0xff] %v2004_v46   ;;  %v2014_v38 = vpack.c.bf16 %v1464_v57, %v1463_v54  ;;  %v1467_v4 = vmax.f32 %v1435_v58, 0.0  ;;  %v1438_v61 = vadd.f32 %v2823_v3, %v1399_v44 }
 0x1b4   : > { %v1468_v5 = vmax.f32 %v1436_v60, 0.0  ;;  %2065 = vst [vmem:[%s2706_s30 + $0x28] sm:$0xff] %v2009_v33   ;;  %v2019_v8 = vpack.c.bf16 %v1466_v53, %v1465_v48  ;;  %v1439_v59 = vadd.f32 %v2823_v3, %v1400_v62  ;;  %v1440_v1 = vadd.f32 %v2823_v3, %v1401_v63 }
 0x1b5   : > { %v1469_v9 = vmax.f32 %v1437_v0, 0.0  ;;  %2066 = vst [vmem:[%s2706_s30 + $0x30] sm:$0xff] %v2014_v38   ;;  %v1470_v12 = vmax.f32 %v1438_v61, 0.0  ;;  %v1441_v15 = vadd.f32 %v2823_v3, %v1402_v36  ;;  %v1442_v17 = vadd.f32 %v2823_v3, %v1403_v2 }
 0x1b6   : > { %v2024_v11 = vpack.c.bf16 %v1468_v5, %v1467_v4  ;;  %2067 = vst [vmem:[%s2706_s30 + $0x38] sm:$0xff] %v2019_v8   ;;  %v1471_v16 = vmax.f32 %v1439_v59, 0.0  ;;  %v1472_v19 = vmax.f32 %v1440_v1, 0.0  ;;  %v1443_v20 = vadd.f32 %v2823_v3, %v1404_v6 }
 0x1b7   : > { %v1444_v21 = vadd.f32 %v2823_v3, %v1405_v7  ;;  %v2029_v24 = vpack.c.bf16 %v1470_v12, %v1469_v9  ;;  %v1473_v25 = vmax.f32 %v1441_v15, 0.0  ;;  %v1474_v26 = vmax.f32 %v1442_v17, 0.0 }
 0x1b8   : > { %2068 = vst [vmem:[%s2706_s30 + $0x40] sm:$0xff] %v2024_v11   ;;  %v1445_v27 = vadd.f32 %v2823_v3, %v1406_v10  ;;  %v2034_v32 = vpack.c.bf16 %v1472_v19, %v1471_v16  ;;  %v1475_v29 = vmax.f32 %v1443_v20, 0.0  ;;  %v1446_v35 = vadd.f32 %v2823_v3, %v1407_v14 }
 0x1b9   : > { %v1476_v31 = vmax.f32 %v1444_v21, 0.0  ;;  %2069 = vst [vmem:[%s2706_s30 + $0x48] sm:$0xff] %v2029_v24   ;;  %v2039_v37 = vpack.c.bf16 %v1474_v26, %v1473_v25  ;;  %v1447_v39 = vadd.f32 %v2823_v3, %v1408_v23  ;;  %v1448_v40 = vadd.f32 %v2823_v3, %v1409_v22 }
 0x1ba   : > { %v1477_v28 = vmax.f32 %v1445_v27, 0.0  ;;  %2070 = vst [vmem:[%s2706_s30 + $0x50] sm:$0xff] %v2034_v32   ;;  %v1478_v41 = vmax.f32 %v1446_v35, 0.0  ;;  %v1449_v43 = vadd.f32 %v2823_v3, %v1410_v13  ;;  %v1450_v45 = vadd.f32 %v2823_v3, %v1411_v30 }
 0x1bb   : > { %v2044_v42 = vpack.c.bf16 %v1476_v31, %v1475_v29  ;;  %2071 = vst [vmem:[%s2706_s30 + $0x58] sm:$0xff] %v2039_v37   ;;  %v1479_v47 = vmax.f32 %v1447_v39, 0.0  ;;  %v1480_v49 = vmax.f32 %v1448_v40, 0.0 }
 0x1bc   : > { %v2049_v18 = vpack.c.bf16 %v1478_v41, %v1477_v28  ;;  %v1481_v50 = vmax.f32 %v1449_v43, 0.0  ;;  %v1482_v51 = vmax.f32 %v1450_v45, 0.0 }
 0x1bd   : > { %2072 = vst [vmem:[%s2706_s30 + $0x60] sm:$0xff] %v2044_v42   ;;  %v2054_v34 = vpack.c.bf16 %v1480_v49, %v1479_v47 }
 0x1be   : > { %2073 = vst [vmem:[%s2706_s30 + $0x68] sm:$0xff] %v2049_v18   ;;  %v2059_v52 = vpack.c.bf16 %v1482_v51, %v1481_v50 }
 0x1bf   : > { %2074 = vst [vmem:[%s2706_s30 + $0x70] sm:$0xff] %v2054_v34  }
 0x1c0   : > { %2075 = vst [vmem:[%s2706_s30 + $0x78] sm:$0xff] %v2059_v52  }
 0x1c1 PF: > { %s13_s18 = sadd.s32 1, %s2478_s18   ;;  %s2898_s12 = smov %s2458_s13 }
 0x1c2   : > { %p10_p0 = scmp.ge.s32.totalorder %s13_s18, 8   ;;  %s2899_s13 = smov %s2552_s25 }
 0x1c3   : > { %s2900_s14 = smov %s2470_s16  ;;  %s2901_s15 = smov %s2474_s17 }
 0x1c4   : > { %s2902_s16 = smov %s2905_s19  ;;  %s2903_s17 = smov %s2909_s20 }
 0x1c5   :  { %12 = sbr.rel (!%p10_p0) target bundleno = 4 (0x4), region = 113 }

// kernel: clip_with_labels_forward.26
= control target key start
LH: loop header
LB: loop body
LE: loop exit
PB: predicated region body
PF: predicated region fallthrough
CT: control target
= control target key end

     0   :  { %s618_s1 = inlined_call_operand.vmem [shape: bf16[128,128], index: 1, kind: input, shape index: {}]   ;;  %s619_s0 = inlined_call_operand.vmem [shape: bf16[128,128], index: 0, kind: input, shape index: {}]   ;;  %s620_s2 = inlined_call_operand.vmem [shape: f32[1,128], index: 2, kind: input, shape index: {}]   ;;  %s621_s3 = inlined_call_operand.vmem [shape: bf16[128,128], index: 3, kind: output, shape index: {}]  }
   0x1   :  { %v507_v0 = vld [vmem:[%s618_s1 + $0x38] sm:$0xff]   ;;  %v508_v1 = vld [vmem:[%s618_s1 + $0x30] sm:$0xff]   ;;  %v509_v2 = vld [vmem:[%s618_s1 + $0x28] sm:$0xff]  }
   0x2   :  { %459 = vmatprep.subr.bf16.mxu0 %v507_v0  ;;  %491 = vmatprep.subr.bf16.mxu1 %v507_v0  ;;  %v510_v3 = vld [vmem:[%s618_s1 + $0x20] sm:$0xff]   ;;  %v511_v6 = vld [vmem:[%s618_s1 + $0x18] sm:$0xff]   ;;  %v512_v7 = vld [vmem:[%s618_s1 + $0x10] sm:$0xff]  }
   0x3   :  { %460 = vmatpush3.bf16.msra.mxu0 %v507_v0  ;;  %499 = vmatpush3.bf16.msra.mxu1 %v507_v0  ;;  %v515_v4 = vld [vmem:[%s619_s0] sm:$0xff]   ;;  %v513_v8 = vld [vmem:[%s618_s1 + $0x8] sm:$0xff]   ;;  %v519_v12 = vld [vmem:[%s619_s0 + $0x10] sm:$0xff]  }
   0x4   :  { %461 = vmatprep.subr.bf16.mxu0 %v508_v1  ;;  %492 = vmatprep.subr.bf16.mxu1 %v508_v1  ;;  %v516_v5 = vld [vmem:[%s619_s0 + $0x20] sm:$0xff]   ;;  %v517_v10 = vld [vmem:[%s619_s0 + $0x8] sm:$0xff]   ;;  %v520_v13 = vld [vmem:[%s619_s0 + $0x30] sm:$0xff]  }
   0x5   :  { %475 = vmatprep.mubr.bf16.mxu0 %v515_v4  ;;  %483 = vmatprep.mubr.bf16.mxu1 %v516_v5  ;;  %v514_v9 = vld [vmem:[%s618_s1] sm:$0xff]   ;;  %v518_v11 = vld [vmem:[%s619_s0 + $0x28] sm:$0xff]   ;;  %v521_v14 = vld [vmem:[%s619_s0 + $0x18] sm:$0xff]  }
   0x6   :  { %v522_v15 = vld [vmem:[%s619_s0 + $0x38] sm:$0xff]   ;;  %v347_v16 = vld [vmem:[%s620_s2] ss:$0 sm:$0xff] }
   0x7   :  { %462 = vmatpush3.bf16.msra.mxu0 %v508_v1  ;;  %500 = vmatpush3.bf16.msra.mxu1 %v508_v1 }
   0x8   :  { %463 = vmatprep.subr.bf16.mxu0 %v509_v2  ;;  %493 = vmatprep.subr.bf16.mxu1 %v509_v2 }
   0xb   :  { %464 = vmatpush3.bf16.msra.mxu0 %v509_v2  ;;  %501 = vmatpush3.bf16.msra.mxu1 %v509_v2 }
   0xc   :  { %465 = vmatprep.subr.bf16.mxu0 %v510_v3  ;;  %494 = vmatprep.subr.bf16.mxu1 %v510_v3 }
   0xf   :  { %466 = vmatpush3.bf16.msra.mxu0 %v510_v3  ;;  %502 = vmatpush3.bf16.msra.mxu1 %v510_v3 }
  0x10   :  { %467 = vmatprep.subr.bf16.mxu0 %v511_v6  ;;  %495 = vmatprep.subr.bf16.mxu1 %v511_v6 }
  0x13   :  { %468 = vmatpush3.bf16.msra.mxu0 %v511_v6  ;;  %503 = vmatpush3.bf16.msra.mxu1 %v511_v6 }
  0x14   :  { %469 = vmatprep.subr.bf16.mxu0 %v512_v7  ;;  %496 = vmatprep.subr.bf16.mxu1 %v512_v7 }
  0x17   :  { %470 = vmatpush3.bf16.msra.mxu0 %v512_v7  ;;  %504 = vmatpush3.bf16.msra.mxu1 %v512_v7 }
  0x18   :  { %471 = vmatprep.subr.bf16.mxu0 %v513_v8  ;;  %497 = vmatprep.subr.bf16.mxu1 %v513_v8 }
  0x1b   :  { %472 = vmatpush3.bf16.msra.mxu0 %v513_v8  ;;  %505 = vmatpush3.bf16.msra.mxu1 %v513_v8 }
  0x1c   :  { %473 = vmatprep.subr.bf16.mxu0 %v514_v9  ;;  %498 = vmatprep.subr.bf16.mxu1 %v514_v9 }
  0x1f   :  { %474 = vmatpush3.bf16.msra.mxu0 %v514_v9  ;;  %506 = vmatpush3.bf16.msra.mxu1 %v514_v9 }
  0x22   :  { %476 = vmatmul.mubr.bf16.vlgmr.msra.gmra.mxu0 %v517_v10  ;;  %484 = vmatmul.mubr.bf16.vlgmr.msra.gmra.mxu1 %v518_v11 }
  0x23   :  { %479 = vmatprep.mubr.bf16.mxu0 %v519_v12  ;;  %487 = vmatprep.mubr.bf16.mxu1 %v520_v13 }
  0x2a   :  { %480 = vmatmul.mubr.bf16.gmra.mxu0 %v521_v14  ;;  %488 = vmatmul.mubr.bf16.gmra.mxu1 %v522_v15 }
  0xe2   :  { %v477_v17 = vpop.f32.mrf.mxu0  ;;  %v485_v18 = vpop.f32.mrf.mxu1 }
  0xe3   :  { %v193_v19 = vadd.f32 %v477_v17, %v347_v16  ;;  %v225_v20 = vadd.f32 %v485_v18, %v347_v16 }
  0xe4   :  { %v184_v21 = vpop.f32.mrf.mxu0  ;;  %v216_v22 = vpop.f32.mrf.mxu1 }
  0xe5   :  { %v185_v23 = vadd.f32 %v347_v16, %v184_v21  ;;  %v217_v24 = vadd.f32 %v347_v16, %v216_v22  ;;  %v249_v29 = vmax.f32 %v193_v19, 0.0  ;;  %v257_v30 = vmax.f32 %v225_v20, 0.0 }
  0xe6   :  { %v478_v25 = vpop.f32.mrf.mxu0  ;;  %v486_v26 = vpop.f32.mrf.mxu1 }
  0xe7   :  { %v196_v27 = vadd.f32 %v478_v25, %v347_v16  ;;  %v228_v28 = vadd.f32 %v486_v26, %v347_v16  ;;  %v247_v37 = vmax.f32 %v185_v23, 0.0  ;;  %v255_v38 = vmax.f32 %v217_v24, 0.0 }
  0xe8   :  { %v187_v31 = vpop.f32.mrf.mxu0  ;;  %v219_v32 = vpop.f32.mrf.mxu1 }
  0xe9   :  { %v250_v33 = vmax.f32 %v196_v27, 0.0  ;;  %v258_v34 = vmax.f32 %v228_v28, 0.0  ;;  %v188_v35 = vadd.f32 %v347_v16, %v187_v31  ;;  %v220_v36 = vadd.f32 %v347_v16, %v219_v32 }
  0xea   :  { %v481_v39 = vpop.f32.mrf.mxu0  ;;  %v489_v40 = vpop.f32.mrf.mxu1 }
  0xeb   :  { %v404_v41 = vpack.c.bf16 %v250_v33, %v249_v29  ;;  %v424_v42 = vpack.c.bf16 %v258_v34, %v257_v30  ;;  %v248_v43 = vmax.f32 %v188_v35, 0.0  ;;  %v256_v44 = vmax.f32 %v220_v36, 0.0 }
  0xec   :  { %v209_v45 = vadd.f32 %v481_v39, %v347_v16  ;;  %v241_v46 = vadd.f32 %v489_v40, %v347_v16  ;;  %v200_v47 = vpop.f32.mrf.mxu0  ;;  %v232_v48 = vpop.f32.mrf.mxu1 }
  0xed   :  { %436 = vst [vmem:[%s621_s3 + $0x8] sm:$0xff] %v404_v41   ;;  %440 = vst [vmem:[%s621_s3 + $0x28] sm:$0xff] %v424_v42   ;;  %v399_v49 = vpack.c.bf16 %v248_v43, %v247_v37  ;;  %v419_v50 = vpack.c.bf16 %v256_v44, %v255_v38  ;;  %v201_v51 = vadd.f32 %v347_v16, %v200_v47 }
  0xee   :  { %v233_v52 = vadd.f32 %v347_v16, %v232_v48  ;;  %v482_v53 = vpop.f32.mrf.mxu0  ;;  %v490_v54 = vpop.f32.mrf.mxu1  ;;  %v253_v57 = vmax.f32 %v209_v45, 0.0  ;;  %v261_v58 = vmax.f32 %v241_v46, 0.0 }
  0xef   :  { %400 = vst [vmem:[%s621_s3] sm:$0xff] %v399_v49   ;;  %439 = vst [vmem:[%s621_s3 + $0x20] sm:$0xff] %v419_v50   ;;  %v212_v55 = vadd.f32 %v482_v53, %v347_v16  ;;  %v244_v56 = vadd.f32 %v490_v54, %v347_v16  ;;  %v251_v1 = vmax.f32 %v201_v51, 0.0 }
  0xf0   :  { %v203_v59 = vpop.f32.mrf.mxu0  ;;  %v235_v60 = vpop.f32.mrf.mxu1  ;;  %v259_v2 = vmax.f32 %v233_v52, 0.0 }
  0xf1   :  { %v254_v61 = vmax.f32 %v212_v55, 0.0  ;;  %v262_v62 = vmax.f32 %v244_v56, 0.0  ;;  %v204_v63 = vadd.f32 %v347_v16, %v203_v59  ;;  %v236_v0 = vadd.f32 %v347_v16, %v235_v60 }
  0xf3   :  { %v414_v3 = vpack.c.bf16 %v254_v61, %v253_v57  ;;  %v434_v4 = vpack.c.bf16 %v262_v62, %v261_v58  ;;  %v252_v5 = vmax.f32 %v204_v63, 0.0  ;;  %v260_v6 = vmax.f32 %v236_v0, 0.0 }
  0xf5   :  { %438 = vst [vmem:[%s621_s3 + $0x18] sm:$0xff] %v414_v3   ;;  %442 = vst [vmem:[%s621_s3 + $0x38] sm:$0xff] %v434_v4   ;;  %v409_v7 = vpack.c.bf16 %v252_v5, %v251_v1  ;;  %v429_v8 = vpack.c.bf16 %v260_v6, %v259_v2 }
  0xf7   :  { %437 = vst [vmem:[%s621_s3 + $0x10] sm:$0xff] %v409_v7   ;;  %441 = vst [vmem:[%s621_s3 + $0x30] sm:$0xff] %v429_v8  }

// kernel: clip_with_labels_forward.29
= control target key start
LH: loop header
LB: loop body
LE: loop exit
PB: predicated region body
PF: predicated region fallthrough
CT: control target
= control target key end

     0   :  { %s771_s1 = inlined_call_operand.vmem [shape: bf16[128,128], index: 1, kind: input, shape index: {}]   ;;  %s772_s0 = inlined_call_operand.vmem [shape: bf16[128,128], index: 0, kind: input, shape index: {}]   ;;  %s773_s2 = inlined_call_operand.vmem [shape: f32[1,128], index: 2, kind: input, shape index: {}]   ;;  %s774_s3 = inlined_call_operand.vmem [shape: bf16[128,128], index: 3, kind: input, shape index: {}]   ;;  %s775_s4 = inlined_call_operand.vmem [shape: bf16[128,128], index: 4, kind: output, shape index: {}]  }
   0x1   :  { %v597_v0 = vld [vmem:[%s771_s1 + $0x38] sm:$0xff]   ;;  %v598_v1 = vld [vmem:[%s771_s1 + $0x30] sm:$0xff]   ;;  %v599_v2 = vld [vmem:[%s771_s1 + $0x28] sm:$0xff]  }
   0x2   :  { %549 = vmatprep.subr.bf16.mxu0 %v597_v0  ;;  %581 = vmatprep.subr.bf16.mxu1 %v597_v0  ;;  %v600_v3 = vld [vmem:[%s771_s1 + $0x20] sm:$0xff]   ;;  %v601_v6 = vld [vmem:[%s771_s1 + $0x18] sm:$0xff]   ;;  %v602_v7 = vld [vmem:[%s771_s1 + $0x10] sm:$0xff]  }
   0x3   :  { %550 = vmatpush3.bf16.msra.mxu0 %v597_v0  ;;  %589 = vmatpush3.bf16.msra.mxu1 %v597_v0  ;;  %v605_v4 = vld [vmem:[%s772_s0] sm:$0xff]   ;;  %v603_v8 = vld [vmem:[%s771_s1 + $0x8] sm:$0xff]   ;;  %v609_v12 = vld [vmem:[%s772_s0 + $0x10] sm:$0xff]  }
   0x4   :  { %551 = vmatprep.subr.bf16.mxu0 %v598_v1  ;;  %582 = vmatprep.subr.bf16.mxu1 %v598_v1  ;;  %v606_v5 = vld [vmem:[%s772_s0 + $0x20] sm:$0xff]   ;;  %v607_v10 = vld [vmem:[%s772_s0 + $0x8] sm:$0xff]   ;;  %v610_v13 = vld [vmem:[%s772_s0 + $0x30] sm:$0xff]  }
   0x5   :  { %565 = vmatprep.mubr.bf16.mxu0 %v605_v4  ;;  %573 = vmatprep.mubr.bf16.mxu1 %v606_v5  ;;  %v604_v9 = vld [vmem:[%s771_s1] sm:$0xff]   ;;  %v608_v11 = vld [vmem:[%s772_s0 + $0x28] sm:$0xff]   ;;  %v611_v14 = vld [vmem:[%s772_s0 + $0x18] sm:$0xff]  }
   0x6   :  { %v612_v15 = vld [vmem:[%s772_s0 + $0x38] sm:$0xff]   ;;  %v689_v16 = vld [vmem:[%s773_s2] ss:$0 sm:$0xff]  ;;  %v519_v17 = vld [vmem:[%s774_s3 + $0x8] sm:$0xff]  }
   0x7   :  { %552 = vmatpush3.bf16.msra.mxu0 %v598_v1  ;;  %590 = vmatpush3.bf16.msra.mxu1 %v598_v1  ;;  %v523_v18 = vld [vmem:[%s774_s3 + $0x28] sm:$0xff]   ;;  %v448_v21 = vld [vmem:[%s774_s3] sm:$0xff]   ;;  %v453_v24 = vunpack.c.l.bf16 %v519_v17  ;;  %v708_v29 = vld [vmem:[%s774_s3 + $0x18] sm:$0xff]   ;;  %v454_v38 = vunpack.c.h.bf16 %v519_v17 }
   0x8   :  { %553 = vmatprep.subr.bf16.mxu0 %v599_v2  ;;  %583 = vmatprep.subr.bf16.mxu1 %v599_v2  ;;  %v522_v22 = vld [vmem:[%s774_s3 + $0x20] sm:$0xff]   ;;  %v469_v26 = vunpack.c.l.bf16 %v523_v18  ;;  %v713_v30 = vld [vmem:[%s774_s3 + $0x38] sm:$0xff]   ;;  %v449_v32 = vunpack.c.l.bf16 %v448_v21  ;;  %v720_v35 = vld [vmem:[%s774_s3 + $0x10] sm:$0xff]   ;;  %v470_v40 = vunpack.c.h.bf16 %v523_v18  ;;  %v450_v41 = vunpack.c.h.bf16 %v448_v21 }
   0x9   :  { %v465_v34 = vunpack.c.l.bf16 %v522_v22  ;;  %v725_v36 = vld [vmem:[%s774_s3 + $0x30] sm:$0xff]   ;;  %v466_v42 = vunpack.c.h.bf16 %v522_v22  ;;  %v461_v45 = vunpack.c.l.bf16 %v708_v29  ;;  %v477_v46 = vunpack.c.l.bf16 %v713_v30 }
   0xa   :  { %v457_v51 = vunpack.c.l.bf16 %v720_v35  ;;  %v473_v52 = vunpack.c.l.bf16 %v725_v36  ;;  %v462_v61 = vunpack.c.h.bf16 %v708_v29  ;;  %v478_v62 = vunpack.c.h.bf16 %v713_v30 }
   0xb   :  { %554 = vmatpush3.bf16.msra.mxu0 %v599_v2  ;;  %591 = vmatpush3.bf16.msra.mxu1 %v599_v2  ;;  %v458_v22 = vunpack.c.h.bf16 %v720_v35 }
   0xc   :  { %555 = vmatprep.subr.bf16.mxu0 %v600_v3  ;;  %584 = vmatprep.subr.bf16.mxu1 %v600_v3 }
   0xf   :  { %556 = vmatpush3.bf16.msra.mxu0 %v600_v3  ;;  %592 = vmatpush3.bf16.msra.mxu1 %v600_v3 }
  0x10   :  { %557 = vmatprep.subr.bf16.mxu0 %v601_v6  ;;  %585 = vmatprep.subr.bf16.mxu1 %v601_v6 }
  0x13   :  { %558 = vmatpush3.bf16.msra.mxu0 %v601_v6  ;;  %593 = vmatpush3.bf16.msra.mxu1 %v601_v6 }
  0x14   :  { %559 = vmatprep.subr.bf16.mxu0 %v602_v7  ;;  %586 = vmatprep.subr.bf16.mxu1 %v602_v7 }
  0x17   :  { %560 = vmatpush3.bf16.msra.mxu0 %v602_v7  ;;  %594 = vmatpush3.bf16.msra.mxu1 %v602_v7 }
  0x18   :  { %561 = vmatprep.subr.bf16.mxu0 %v603_v8  ;;  %587 = vmatprep.subr.bf16.mxu1 %v603_v8 }
  0x1b   :  { %562 = vmatpush3.bf16.msra.mxu0 %v603_v8  ;;  %595 = vmatpush3.bf16.msra.mxu1 %v603_v8 }
  0x1c   :  { %563 = vmatprep.subr.bf16.mxu0 %v604_v9  ;;  %588 = vmatprep.subr.bf16.mxu1 %v604_v9 }
  0x1f   :  { %564 = vmatpush3.bf16.msra.mxu0 %v604_v9  ;;  %596 = vmatpush3.bf16.msra.mxu1 %v604_v9 }
  0x22   :  { %566 = vmatmul.mubr.bf16.vlgmr.msra.gmra.mxu0 %v607_v10  ;;  %574 = vmatmul.mubr.bf16.vlgmr.msra.gmra.mxu1 %v608_v11 }
  0x23   :  { %569 = vmatprep.mubr.bf16.mxu0 %v609_v12  ;;  %577 = vmatprep.mubr.bf16.mxu1 %v610_v13 }
  0x2a   :  { %570 = vmatmul.mubr.bf16.gmra.mxu0 %v611_v14  ;;  %578 = vmatmul.mubr.bf16.gmra.mxu1 %v612_v15 }
  0xe2   :  { %v567_v19 = vpop.f32.mrf.mxu0  ;;  %v575_v20 = vpop.f32.mrf.mxu1 }
  0xe3   :  { %v196_v23 = vadd.f32 %v567_v19, %v689_v16  ;;  %v228_v25 = vadd.f32 %v575_v20, %v689_v16 }
  0xe4   :  { %v187_v27 = vpop.f32.mrf.mxu0  ;;  %v219_v28 = vpop.f32.mrf.mxu1 }
  0xe5   :  { %v188_v31 = vadd.f32 %v689_v16, %v187_v27  ;;  %v220_v33 = vadd.f32 %v689_v16, %v219_v28  ;;  %v284_v43 = vadd.f32 %v453_v24, %v196_v23  ;;  %v292_v44 = vadd.f32 %v469_v26, %v228_v25 }
  0xe6   :  { %v568_v37 = vpop.f32.mrf.mxu0  ;;  %v576_v39 = vpop.f32.mrf.mxu1  ;;  %v474_v23 = vunpack.c.h.bf16 %v725_v36 }
  0xe7   :  { %v199_v47 = vadd.f32 %v568_v37, %v689_v16  ;;  %v231_v48 = vadd.f32 %v576_v39, %v689_v16  ;;  %v282_v53 = vadd.f32 %v449_v32, %v188_v31  ;;  %v290_v54 = vadd.f32 %v465_v34, %v220_v33 }
  0xe8   :  { %v190_v49 = vpop.f32.mrf.mxu0  ;;  %v222_v50 = vpop.f32.mrf.mxu1  ;;  %v300_v63 = vmax.f32 %v284_v43, 0.0  ;;  %v308_v0 = vmax.f32 %v292_v44, 0.0 }
  0xe9   :  { %v191_v55 = vadd.f32 %v689_v16, %v190_v49  ;;  %v223_v56 = vadd.f32 %v689_v16, %v222_v50  ;;  %v285_v57 = vadd.f32 %v454_v38, %v199_v47  ;;  %v293_v58 = vadd.f32 %v470_v40, %v231_v48 }
  0xea   :  { %v571_v59 = vpop.f32.mrf.mxu0  ;;  %v579_v60 = vpop.f32.mrf.mxu1  ;;  %v298_v9 = vmax.f32 %v282_v53, 0.0  ;;  %v306_v10 = vmax.f32 %v290_v54, 0.0 }
  0xeb   :  { %v283_v1 = vadd.f32 %v450_v41, %v191_v55  ;;  %v291_v2 = vadd.f32 %v466_v42, %v223_v56  ;;  %v301_v3 = vmax.f32 %v285_v57, 0.0  ;;  %v309_v4 = vmax.f32 %v293_v58, 0.0 }
  0xec   :  { %v212_v5 = vadd.f32 %v571_v59, %v689_v16  ;;  %v244_v6 = vadd.f32 %v579_v60, %v689_v16  ;;  %v203_v7 = vpop.f32.mrf.mxu0  ;;  %v235_v8 = vpop.f32.mrf.mxu1 }
  0xed   :  { %v299_v11 = vmax.f32 %v283_v1, 0.0  ;;  %v307_v12 = vmax.f32 %v291_v2, 0.0  ;;  %v487_v13 = vpack.c.bf16 %v301_v3, %v300_v63  ;;  %v507_v14 = vpack.c.bf16 %v309_v4, %v308_v0 }
  0xee   :  { %v204_v15 = vadd.f32 %v689_v16, %v203_v7  ;;  %v236_v17 = vadd.f32 %v689_v16, %v235_v8  ;;  %v572_v18 = vpop.f32.mrf.mxu0  ;;  %v580_v19 = vpop.f32.mrf.mxu1  ;;  %v288_v24 = vadd.f32 %v461_v45, %v212_v5  ;;  %v296_v25 = vadd.f32 %v477_v46, %v244_v6 }
  0xef   :  { %v482_v20 = vpack.c.bf16 %v299_v11, %v298_v9  ;;  %v502_v21 = vpack.c.bf16 %v307_v12, %v306_v10  ;;  %526 = vst [vmem:[%s775_s4 + $0x8] sm:$0xff] %v487_v13   ;;  %530 = vst [vmem:[%s775_s4 + $0x28] sm:$0xff] %v507_v14   ;;  %v215_v26 = vadd.f32 %v572_v18, %v689_v16 }
  0xf0   :  { %v247_v27 = vadd.f32 %v580_v19, %v689_v16  ;;  %v206_v28 = vpop.f32.mrf.mxu0  ;;  %v238_v29 = vpop.f32.mrf.mxu1  ;;  %v286_v30 = vadd.f32 %v457_v51, %v204_v15  ;;  %v294_v31 = vadd.f32 %v473_v52, %v236_v17  ;;  %v304_v38 = vmax.f32 %v288_v24, 0.0 }
  0xf1   :  { %483 = vst [vmem:[%s775_s4] sm:$0xff] %v482_v20   ;;  %529 = vst [vmem:[%s775_s4 + $0x20] sm:$0xff] %v502_v21   ;;  %v207_v32 = vadd.f32 %v689_v16, %v206_v28  ;;  %v239_v33 = vadd.f32 %v689_v16, %v238_v29  ;;  %v289_v34 = vadd.f32 %v462_v61, %v215_v26  ;;  %v312_v39 = vmax.f32 %v296_v25, 0.0 }
  0xf2   :  { %v297_v35 = vadd.f32 %v478_v62, %v247_v27  ;;  %v302_v42 = vmax.f32 %v286_v30, 0.0  ;;  %v310_v43 = vmax.f32 %v294_v31, 0.0 }
  0xf3   :  { %v287_v36 = vadd.f32 %v458_v22, %v207_v32  ;;  %v295_v37 = vadd.f32 %v474_v23, %v239_v33  ;;  %v305_v40 = vmax.f32 %v289_v34, 0.0 }
  0xf4   :  { %v313_v41 = vmax.f32 %v297_v35, 0.0 }
  0xf5   :  { %v303_v44 = vmax.f32 %v287_v36, 0.0  ;;  %v311_v45 = vmax.f32 %v295_v37, 0.0  ;;  %v497_v46 = vpack.c.bf16 %v305_v40, %v304_v38 }
  0xf6   :  { %v517_v47 = vpack.c.bf16 %v313_v41, %v312_v39 }
  0xf7   :  { %v492_v48 = vpack.c.bf16 %v303_v44, %v302_v42  ;;  %v512_v49 = vpack.c.bf16 %v311_v45, %v310_v43  ;;  %528 = vst [vmem:[%s775_s4 + $0x18] sm:$0xff] %v497_v46  }
  0xf8   :  { %532 = vst [vmem:[%s775_s4 + $0x38] sm:$0xff] %v517_v47  }
  0xf9   :  { %527 = vst [vmem:[%s775_s4 + $0x10] sm:$0xff] %v492_v48   ;;  %531 = vst [vmem:[%s775_s4 + $0x30] sm:$0xff] %v512_v49  }

// kernel: clip_with_labels_forward.32
= control target key start
LH: loop header
LB: loop body
LE: loop exit
PB: predicated region body
PF: predicated region fallthrough
CT: control target
= control target key end

     0   :  { %s304_s1 = inlined_call_operand.vmem [shape: bf16[128,128], index: 1, kind: input, shape index: {}]   ;;  %s305_s0 = inlined_call_operand.vmem [shape: bf16[32,128], index: 0, kind: input, shape index: {}]   ;;  %s306_s2 = inlined_call_operand.vmem [shape: f32[1,128], index: 2, kind: input, shape index: {}]   ;;  %s307_s3 = inlined_call_operand.vmem [shape: bf16[32,128], index: 3, kind: output, shape index: {}]  }
   0x1   :  { %v235_v0 = vld [vmem:[%s304_s1 + $0x38] sm:$0xff]   ;;  %v236_v1 = vld [vmem:[%s304_s1 + $0x30] sm:$0xff]   ;;  %v237_v2 = vld [vmem:[%s304_s1 + $0x28] sm:$0xff]  }
   0x2   :  { %215 = vmatprep.subr.bf16.mxu0 %v235_v0  ;;  %v238_v3 = vld [vmem:[%s304_s1 + $0x20] sm:$0xff]   ;;  %v239_v5 = vld [vmem:[%s304_s1 + $0x18] sm:$0xff]   ;;  %v240_v6 = vld [vmem:[%s304_s1 + $0x10] sm:$0xff]  }
   0x3   :  { %216 = vmatpush3.bf16.msra.mxu0 %v235_v0  ;;  %v243_v4 = vld [vmem:[%s305_s0] sm:$0xff]   ;;  %v241_v7 = vld [vmem:[%s304_s1 + $0x8] sm:$0xff]  }
   0x4   :  { %217 = vmatprep.subr.bf16.mxu0 %v236_v1  ;;  %231 = vmatprep.mubr.bf16.mxu0 %v243_v4  ;;  %v242_v8 = vld [vmem:[%s304_s1] sm:$0xff]   ;;  %v244_v9 = vld [vmem:[%s305_s0 + $0x8] sm:$0xff]  }
   0x5   :  { %v175_v11 = vld [vmem:[%s306_s2] ss:$0 sm:$0xff] }
   0x7   :  { %218 = vmatpush3.bf16.msra.mxu0 %v236_v1 }
   0x8   :  { %219 = vmatprep.subr.bf16.mxu0 %v237_v2 }
   0xb   :  { %220 = vmatpush3.bf16.msra.mxu0 %v237_v2 }
   0xc   :  { %221 = vmatprep.subr.bf16.mxu0 %v238_v3 }
   0xf   :  { %222 = vmatpush3.bf16.msra.mxu0 %v238_v3 }
  0x10   :  { %223 = vmatprep.subr.bf16.mxu0 %v239_v5 }
  0x13   :  { %224 = vmatpush3.bf16.msra.mxu0 %v239_v5 }
  0x14   :  { %225 = vmatprep.subr.bf16.mxu0 %v240_v6 }
  0x17   :  { %226 = vmatpush3.bf16.msra.mxu0 %v240_v6 }
  0x18   :  { %227 = vmatprep.subr.bf16.mxu0 %v241_v7 }
  0x1b   :  { %228 = vmatpush3.bf16.msra.mxu0 %v241_v7 }
  0x1c   :  { %229 = vmatprep.subr.bf16.mxu0 %v242_v8 }
  0x1f   :  { %230 = vmatpush3.bf16.msra.mxu0 %v242_v8 }
  0x22   :  { %232 = vmatmul.mubr.bf16.vlgmr.msra.gmra.mxu0 %v244_v9 }
  0xe2   :  { %v233_v10 = vpop.f32.mrf.mxu0 }
  0xe3   :  { %v145_v14 = vadd.f32 %v233_v10, %v175_v11 }
  0xe4   :  { %v136_v12 = vpop.f32.mrf.mxu0 }
  0xe5   :  { %v137_v17 = vadd.f32 %v175_v11, %v136_v12 }
  0xe6   :  { %v234_v13 = vpop.f32.mrf.mxu0 }
  0xe7   :  { %v148_v15 = vadd.f32 %v234_v13, %v175_v11 }
  0xe8   :  { %v139_v16 = vpop.f32.mrf.mxu0 }
  0xe9   :  { %v202_v18 = vpack.c.bf16 %v148_v15, %v145_v14  ;;  %v140_v19 = vadd.f32 %v175_v11, %v139_v16 }
  0xeb   :  { %204 = vst [vmem:[%s307_s3 + $0x8] sm:$0xff] %v202_v18   ;;  %v197_v20 = vpack.c.bf16 %v140_v19, %v137_v17 }
  0xed   :  { %198 = vst [vmem:[%s307_s3] sm:$0xff] %v197_v20  }

// kernel: clip_with_labels_forward.33
= control target key start
LH: loop header
LB: loop body
LE: loop exit
PB: predicated region body
PF: predicated region fallthrough
CT: control target
= control target key end

     0   :  { %s343_s1 = inlined_call_operand.vmem [shape: bf16[128,128], index: 1, kind: input, shape index: {}]   ;;  %s344_s0 = inlined_call_operand.vmem [shape: bf16[32,128], index: 0, kind: input, shape index: {}]   ;;  %s345_s2 = inlined_call_operand.vmem [shape: f32[1,128], index: 2, kind: input, shape index: {}]   ;;  %s346_s3 = inlined_call_operand.vmem [shape: bf16[32,128], index: 3, kind: input, shape index: {}]   ;;  %s347_s4 = inlined_call_operand.vmem [shape: bf16[32,128], index: 4, kind: output, shape index: {}]  }
   0x1   :  { %v263_v0 = vld [vmem:[%s343_s1 + $0x38] sm:$0xff]   ;;  %v264_v1 = vld [vmem:[%s343_s1 + $0x30] sm:$0xff]   ;;  %v265_v2 = vld [vmem:[%s343_s1 + $0x28] sm:$0xff]  }
   0x2   :  { %243 = vmatprep.subr.bf16.mxu0 %v263_v0  ;;  %v266_v3 = vld [vmem:[%s343_s1 + $0x20] sm:$0xff]   ;;  %v267_v5 = vld [vmem:[%s343_s1 + $0x18] sm:$0xff]   ;;  %v268_v6 = vld [vmem:[%s343_s1 + $0x10] sm:$0xff]  }
   0x3   :  { %244 = vmatpush3.bf16.msra.mxu0 %v263_v0  ;;  %v271_v4 = vld [vmem:[%s344_s0] sm:$0xff]   ;;  %v269_v7 = vld [vmem:[%s343_s1 + $0x8] sm:$0xff]  }
   0x4   :  { %245 = vmatprep.subr.bf16.mxu0 %v264_v1  ;;  %259 = vmatprep.mubr.bf16.mxu0 %v271_v4  ;;  %v270_v8 = vld [vmem:[%s343_s1] sm:$0xff]   ;;  %v272_v9 = vld [vmem:[%s344_s0 + $0x8] sm:$0xff]  }
   0x5   :  { %v194_v10 = vld [vmem:[%s345_s2] ss:$0 sm:$0xff]  ;;  %v231_v11 = vld [vmem:[%s346_s3 + $0x8] sm:$0xff]  }
   0x6   :  { %v214_v13 = vld [vmem:[%s346_s3] sm:$0xff]   ;;  %v219_v15 = vunpack.c.l.bf16 %v231_v11  ;;  %v220_v19 = vunpack.c.h.bf16 %v231_v11 }
   0x7   :  { %246 = vmatpush3.bf16.msra.mxu0 %v264_v1  ;;  %v215_v18 = vunpack.c.l.bf16 %v214_v13  ;;  %v216_v23 = vunpack.c.h.bf16 %v214_v13 }
   0x8   :  { %247 = vmatprep.subr.bf16.mxu0 %v265_v2 }
   0xb   :  { %248 = vmatpush3.bf16.msra.mxu0 %v265_v2 }
   0xc   :  { %249 = vmatprep.subr.bf16.mxu0 %v266_v3 }
   0xf   :  { %250 = vmatpush3.bf16.msra.mxu0 %v266_v3 }
  0x10   :  { %251 = vmatprep.subr.bf16.mxu0 %v267_v5 }
  0x13   :  { %252 = vmatpush3.bf16.msra.mxu0 %v267_v5 }
  0x14   :  { %253 = vmatprep.subr.bf16.mxu0 %v268_v6 }
  0x17   :  { %254 = vmatpush3.bf16.msra.mxu0 %v268_v6 }
  0x18   :  { %255 = vmatprep.subr.bf16.mxu0 %v269_v7 }
  0x1b   :  { %256 = vmatpush3.bf16.msra.mxu0 %v269_v7 }
  0x1c   :  { %257 = vmatprep.subr.bf16.mxu0 %v270_v8 }
  0x1f   :  { %258 = vmatpush3.bf16.msra.mxu0 %v270_v8 }
  0x22   :  { %260 = vmatmul.mubr.bf16.vlgmr.msra.gmra.mxu0 %v272_v9 }
  0xe2   :  { %v261_v12 = vpop.f32.mrf.mxu0 }
  0xe3   :  { %v148_v14 = vadd.f32 %v261_v12, %v194_v10 }
  0xe4   :  { %v139_v16 = vpop.f32.mrf.mxu0 }
  0xe5   :  { %v140_v17 = vadd.f32 %v194_v10, %v139_v16  ;;  %v164_v21 = vadd.f32 %v219_v15, %v148_v14 }
  0xe6   :  { %v262_v20 = vpop.f32.mrf.mxu0 }
  0xe7   :  { %v151_v22 = vadd.f32 %v262_v20, %v194_v10  ;;  %v162_v25 = vadd.f32 %v215_v18, %v140_v17  ;;  %v168_v28 = vmax.f32 %v164_v21, 0.0 }
  0xe8   :  { %v142_v24 = vpop.f32.mrf.mxu0 }
  0xe9   :  { %v165_v26 = vadd.f32 %v220_v19, %v151_v22  ;;  %v143_v27 = vadd.f32 %v194_v10, %v142_v24  ;;  %v166_v31 = vmax.f32 %v162_v25, 0.0 }
  0xeb   :  { %v169_v29 = vmax.f32 %v165_v26, 0.0  ;;  %v163_v30 = vadd.f32 %v216_v23, %v143_v27 }
  0xed   :  { %v229_v32 = vpack.c.bf16 %v169_v29, %v168_v28  ;;  %v167_v33 = vmax.f32 %v163_v30, 0.0 }
  0xef   :  { %232 = vst [vmem:[%s347_s4 + $0x8] sm:$0xff] %v229_v32   ;;  %v224_v34 = vpack.c.bf16 %v167_v33, %v166_v31 }
  0xf1   :  { %225 = vst [vmem:[%s347_s4] sm:$0xff] %v224_v34  }

// kernel: clip_with_labels_forward.34
= control target key start
LH: loop header
LB: loop body
LE: loop exit
PB: predicated region body
PF: predicated region fallthrough
CT: control target
= control target key end

     0   :  { %s308_s1 = inlined_call_operand.vmem [shape: bf16[128,128], index: 1, kind: input, shape index: {}]   ;;  %s309_s0 = inlined_call_operand.vmem [shape: bf16[32,128], index: 0, kind: input, shape index: {}]   ;;  %s310_s2 = inlined_call_operand.vmem [shape: f32[1,128], index: 2, kind: input, shape index: {}]   ;;  %s311_s3 = inlined_call_operand.vmem [shape: bf16[32,128], index: 3, kind: output, shape index: {}]  }
   0x1   :  { %v239_v0 = vld [vmem:[%s308_s1 + $0x38] sm:$0xff]   ;;  %v240_v1 = vld [vmem:[%s308_s1 + $0x30] sm:$0xff]   ;;  %v241_v2 = vld [vmem:[%s308_s1 + $0x28] sm:$0xff]  }
   0x2   :  { %219 = vmatprep.subr.bf16.mxu0 %v239_v0  ;;  %v242_v3 = vld [vmem:[%s308_s1 + $0x20] sm:$0xff]   ;;  %v243_v5 = vld [vmem:[%s308_s1 + $0x18] sm:$0xff]   ;;  %v244_v6 = vld [vmem:[%s308_s1 + $0x10] sm:$0xff]  }
   0x3   :  { %220 = vmatpush3.bf16.msra.mxu0 %v239_v0  ;;  %v247_v4 = vld [vmem:[%s309_s0] sm:$0xff]   ;;  %v245_v7 = vld [vmem:[%s308_s1 + $0x8] sm:$0xff]  }
   0x4   :  { %221 = vmatprep.subr.bf16.mxu0 %v240_v1  ;;  %235 = vmatprep.mubr.bf16.mxu0 %v247_v4  ;;  %v246_v8 = vld [vmem:[%s308_s1] sm:$0xff]   ;;  %v248_v9 = vld [vmem:[%s309_s0 + $0x8] sm:$0xff]  }
   0x5   :  { %v179_v11 = vld [vmem:[%s310_s2] ss:$0 sm:$0xff] }
   0x7   :  { %222 = vmatpush3.bf16.msra.mxu0 %v240_v1 }
   0x8   :  { %223 = vmatprep.subr.bf16.mxu0 %v241_v2 }
   0xb   :  { %224 = vmatpush3.bf16.msra.mxu0 %v241_v2 }
   0xc   :  { %225 = vmatprep.subr.bf16.mxu0 %v242_v3 }
   0xf   :  { %226 = vmatpush3.bf16.msra.mxu0 %v242_v3 }
  0x10   :  { %227 = vmatprep.subr.bf16.mxu0 %v243_v5 }
  0x13   :  { %228 = vmatpush3.bf16.msra.mxu0 %v243_v5 }
  0x14   :  { %229 = vmatprep.subr.bf16.mxu0 %v244_v6 }
  0x17   :  { %230 = vmatpush3.bf16.msra.mxu0 %v244_v6 }
  0x18   :  { %231 = vmatprep.subr.bf16.mxu0 %v245_v7 }
  0x1b   :  { %232 = vmatpush3.bf16.msra.mxu0 %v245_v7 }
  0x1c   :  { %233 = vmatprep.subr.bf16.mxu0 %v246_v8 }
  0x1f   :  { %234 = vmatpush3.bf16.msra.mxu0 %v246_v8 }
  0x22   :  { %236 = vmatmul.mubr.bf16.vlgmr.msra.gmra.mxu0 %v248_v9 }
  0xe2   :  { %v237_v10 = vpop.f32.mrf.mxu0 }
  0xe3   :  { %v145_v13 = vadd.f32 %v237_v10, %v179_v11 }
  0xe4   :  { %v136_v12 = vpop.f32.mrf.mxu0 }
  0xe5   :  { %v137_v15 = vadd.f32 %v179_v11, %v136_v12  ;;  %v153_v18 = vmax.f32 %v145_v13, 0.0 }
  0xe6   :  { %v238_v14 = vpop.f32.mrf.mxu0 }
  0xe7   :  { %v148_v16 = vadd.f32 %v238_v14, %v179_v11  ;;  %v151_v21 = vmax.f32 %v137_v15, 0.0 }
  0xe8   :  { %v139_v17 = vpop.f32.mrf.mxu0 }
  0xe9   :  { %v154_v19 = vmax.f32 %v148_v16, 0.0  ;;  %v140_v20 = vadd.f32 %v179_v11, %v139_v17 }
  0xeb   :  { %v206_v22 = vpack.c.bf16 %v154_v19, %v153_v18  ;;  %v152_v23 = vmax.f32 %v140_v20, 0.0 }
  0xed   :  { %208 = vst [vmem:[%s311_s3 + $0x8] sm:$0xff] %v206_v22   ;;  %v201_v24 = vpack.c.bf16 %v152_v23, %v151_v21 }
  0xef   :  { %202 = vst [vmem:[%s311_s3] sm:$0xff] %v201_v24  }

// kernel: clip_with_labels_forward.27
= control target key start
LH: loop header
LB: loop body
LE: loop exit
PB: predicated region body
PF: predicated region fallthrough
CT: control target
= control target key end

     0   :  { %s1660_s12 = smov 0   ;;  %s1662_s13 = smov 0   ;;  %s1874_s0 = inlined_call_operand.vmem [shape: bf16[128,1152], index: 0, kind: input, shape index: {}]   ;;  %s1875_s1 = inlined_call_operand.vmem [shape: bf16[1152,128], index: 1, kind: input, shape index: {}]   ;;  %s1876_s2 = inlined_call_operand.vmem [shape: f32[1,128], index: 2, kind: input, shape index: {}]   ;;  %s1877_s3 = inlined_call_operand.vmem [shape: bf16[128,128], index: 3, kind: output, shape index: {}]  }
   0x1   :  { %s1664_s14 = smov 0   ;;  %s1666_s15 = smov 0  }
   0x2   :  { %s1668_s16 = smov 0  }
   0x3 LB: > { %s25_s17 = sadd.s32 1, %s1633_s15  ;;  %p48_p1 = scmp.ne.s32.totalorder %s1625_s13, %s1621_s12  ;;  %s1637_s16 = sphi %s1668_s16, %s13_s16   ;;  %s1633_s15 = sphi %s1666_s15, %s1881_s15   ;;  %s1629_s14 = sphi %s1664_s14, %s1880_s14   ;;  %s1625_s13 = sphi %s1662_s13, %s1879_s13   ;;  %s1621_s12 = sphi %s1660_s12, %s1878_s12  }
   0x4   : > { %p26_p0 = scmp.ge.s32.totalorder %s25_s17, 3  ;;  %p49_p2 = scmp.eq.s32.totalorder %s1637_s16, 0 }
   0x5   : > { %s41_s19 = sadd.s32 1, %s1625_s13  ;;  %p1217_p5 = scmp.ge.s32.totalorder %s1637_s16, 3 }
   0x6   : > { %s1883_s17 = smov (%p26_p0, %s25_s17), 0  ;;  %p50_p3 = por %p49_p2, %p48_p1 }
   0x7   : > { %s37_s18 = ssub.s32 %s1633_s15, %s1883_s17  ;;  %162 = sbr.rel (%p1217_p5) target bundleno = 35 (0x23), region = 20 }
   0x8   : > { %p39_p4 = scmp.eq.s32.totalorder %s37_s18, 0 }
   0xa   : > { %s1695_s20 = scalar_select %p39_p4, %s1625_s13, %s41_s19  }
   0xc   : > { %165 = sbr.rel (!%p50_p3) target bundleno = 35 (0x23), region = 24  ;;  %s167_s21 = sand.u32 (%p50_p3), 1, %s1625_s13  }
   0xd   : > { %s1324_s22 = smul.u32 (%p50_p3), 12, %s1633_s15 }
   0xe   : > { %s1500_s23 = smul.u32 (%p50_p3), 192, %s167_s21 }
   0xf   : > { %s1703_s26 = scalar_lea.vmem (%p50_p3), %s1874_s0, %s1324_s22 }
  0x10   : > { %v190_v0 = vld [vmem:[%s1703_s26] sm:$0xff] (%p50_p3)  ;;  %v194_v2 = vld [vmem:[%s1703_s26 + $0x48] sm:$0xff] (%p50_p3)  ;;  %s1708_s27 = scalar_lea.vmem (%p50_p3), [#allocation3], %s1500_s23  ;;  %v198_v4 = vld [vmem:[%s1703_s26 + $0x90] sm:$0xff] (%p50_p3) }
  0x11   : > { %v192_v1 = vld [vmem:[%s1703_s26 + $0x24] sm:$0xff]  ;;  %191 = vst [vmem:[%s1708_s27] sm:$0xff] %v190_v0  ;;  %195 = vst [vmem:[%s1708_s27 + $0x18] sm:$0xff] %v194_v2  ;;  %v196_v3 = vld [vmem:[%s1703_s26 + $0x6c] sm:$0xff] }
  0x12   : > { %193 = vst [vmem:[%s1708_s27 + $0xc] sm:$0xff] %v192_v1  ;;  %v200_v5 = vld [vmem:[%s1703_s26 + $0xb4] sm:$0xff]  ;;  %197 = vst [vmem:[%s1708_s27 + $0x24] sm:$0xff] %v196_v3  ;;  %v204_v7 = vld [vmem:[%s1703_s26 + $0xfc] sm:$0xff] }
  0x13   : > { %199 = vst [vmem:[%s1708_s27 + $0x30] sm:$0xff] %v198_v4  ;;  %201 = vst [vmem:[%s1708_s27 + $0x3c] sm:$0xff] %v200_v5  ;;  %v202_v6 = vld [vmem:[%s1703_s26 + $0xd8] sm:$0xff]  ;;  %v206_v8 = vld [vmem:[%s1703_s26 + $0x120] sm:$0xff] }
  0x14   : > { %203 = vst [vmem:[%s1708_s27 + $0x48] sm:$0xff] %v202_v6  ;;  %205 = vst [vmem:[%s1708_s27 + $0x54] sm:$0xff] %v204_v7  ;;  %v208_v9 = vld [vmem:[%s1703_s26 + $0x144] sm:$0xff]  ;;  %v212_v11 = vld [vmem:[%s1703_s26 + $0x18c] sm:$0xff] }
  0x15   : > { %207 = vst [vmem:[%s1708_s27 + $0x60] sm:$0xff] %v206_v8  ;;  %v210_v10 = vld [vmem:[%s1703_s26 + $0x168] sm:$0xff]  ;;  %209 = vst [vmem:[%s1708_s27 + $0x6c] sm:$0xff] %v208_v9  ;;  %v214_v12 = vld [vmem:[%s1703_s26 + $0x1b0] sm:$0xff] }
  0x16   : > { %211 = vst [vmem:[%s1708_s27 + $0x78] sm:$0xff] %v210_v10  ;;  %213 = vst [vmem:[%s1708_s27 + $0x84] sm:$0xff] %v212_v11  ;;  %v216_v13 = vld [vmem:[%s1703_s26 + $0x1d4] sm:$0xff]  ;;  %v220_v15 = vld [vmem:[%s1703_s26 + $0x21c] sm:$0xff] }
  0x17   : > { %v218_v14 = vld [vmem:[%s1703_s26 + $0x1f8] sm:$0xff]  ;;  %215 = vst [vmem:[%s1708_s27 + $0x90] sm:$0xff] %v214_v12  ;;  %217 = vst [vmem:[%s1708_s27 + $0x9c] sm:$0xff] %v216_v13  ;;  %v1219_v16 = vld [vmem:[%s1703_s26 + $0x8] sm:$0xf] }
  0x18   : > { %219 = vst [vmem:[%s1708_s27 + $0xa8] sm:$0xff] %v218_v14  ;;  %v1221_v17 = vld [vmem:[%s1703_s26 + $0x2c] sm:$0xf]  ;;  %221 = vst [vmem:[%s1708_s27 + $0xb4] sm:$0xff] %v220_v15  ;;  %v1223_v18 = vld [vmem:[%s1703_s26 + $0x50] sm:$0xf] }
  0x19   : > { %1220 = vst [vmem:[%s1708_s27 + $0x8] sm:$0xf] %v1219_v16  ;;  %1222 = vst [vmem:[%s1708_s27 + $0x14] sm:$0xf] %v1221_v17  ;;  %v1225_v19 = vld [vmem:[%s1703_s26 + $0x74] sm:$0xf] }
  0x1a   : > { %v1227_v20 = vld [vmem:[%s1703_s26 + $0x98] sm:$0xf]  ;;  %1224 = vst [vmem:[%s1708_s27 + $0x20] sm:$0xf] %v1223_v18  ;;  %1226 = vst [vmem:[%s1708_s27 + $0x2c] sm:$0xf] %v1225_v19 }
  0x1b   : > { %1228 = vst [vmem:[%s1708_s27 + $0x38] sm:$0xf] %v1227_v20  ;;  %v1229_v21 = vld [vmem:[%s1703_s26 + $0xbc] sm:$0xf]  ;;  %v1231_v22 = vld [vmem:[%s1703_s26 + $0xe0] sm:$0xf] }
  0x1c   : > { %v1233_v23 = vld [vmem:[%s1703_s26 + $0x104] sm:$0xf]  ;;  %1230 = vst [vmem:[%s1708_s27 + $0x44] sm:$0xf] %v1229_v21  ;;  %1232 = vst [vmem:[%s1708_s27 + $0x50] sm:$0xf] %v1231_v22 }
  0x1d   : > { %1234 = vst [vmem:[%s1708_s27 + $0x5c] sm:$0xf] %v1233_v23  ;;  %v1235_v24 = vld [vmem:[%s1703_s26 + $0x128] sm:$0xf]  ;;  %v1237_v25 = vld [vmem:[%s1703_s26 + $0x14c] sm:$0xf] }
  0x1e   : > { %v1239_v26 = vld [vmem:[%s1703_s26 + $0x170] sm:$0xf]  ;;  %1236 = vst [vmem:[%s1708_s27 + $0x68] sm:$0xf] %v1235_v24  ;;  %1238 = vst [vmem:[%s1708_s27 + $0x74] sm:$0xf] %v1237_v25 }
  0x1f   : > { %1240 = vst [vmem:[%s1708_s27 + $0x80] sm:$0xf] %v1239_v26  ;;  %v1241_v27 = vld [vmem:[%s1703_s26 + $0x194] sm:$0xf]  ;;  %v1243_v28 = vld [vmem:[%s1703_s26 + $0x1b8] sm:$0xf] }
  0x20   : > { %v1245_v29 = vld [vmem:[%s1703_s26 + $0x1dc] sm:$0xf]  ;;  %1242 = vst [vmem:[%s1708_s27 + $0x8c] sm:$0xf] %v1241_v27  ;;  %1244 = vst [vmem:[%s1708_s27 + $0x98] sm:$0xf] %v1243_v28 }
  0x21   : > { %1246 = vst [vmem:[%s1708_s27 + $0xa4] sm:$0xf] %v1245_v29  ;;  %v1247_v30 = vld [vmem:[%s1703_s26 + $0x200] sm:$0xf]  ;;  %v1249_v31 = vld [vmem:[%s1703_s26 + $0x224] sm:$0xf] }
  0x22   : > { %1248 = vst [vmem:[%s1708_s27 + $0xb0] sm:$0xf] %v1247_v30  ;;  %1250 = vst [vmem:[%s1708_s27 + $0xbc] sm:$0xf] %v1249_v31 }
  0x23 PF: > { %p1251_p6 = scmp.ge.s32.totalorder %s1637_s16, 1  ;;  %p278_p7 = scmp.lt.s32.totalorder %s1637_s16, 4 }
  0x25   : > { %p279_p8 = pnand %p1251_p6, %p278_p7 }
  0x26   : > { %s285_s28 = sand.u32 (!%p279_p8), 1, %s1621_s12   ;;  %s324_s29 = smul.u32 (!%p279_p8), 48, %s1629_s14 }
  0x27   : > { %282 = sbr.rel (%p279_p8) target bundleno = 369 (0x171), region = 54  ;;  %p1253_p10 = scmp.ne.s32.totalorder (!%p279_p8), %s1629_s14, 0 }
  0x28   : > { %s1501_s30 = smul.u32 (!%p279_p8), 192, %s285_s28  ;;  %p325_p9 = scmp.lt.s32.totalorder (!%p279_p8), %s324_s29, 143 }
  0x2a   : > { %s1780_s8 = scalar_lea.vmem (!%p279_p8), [#allocation3], %s1501_s30 }
  0x2c   : > { %s1885_s29 = smov (!%p325_p9, %s324_s29), 143  ;;  %349 = sbr.rel (%p1253_p10) target bundleno = 58 (0x3a), region = 62 }
  0x2d   : > { %s1252_s4 = sshll.u32 %s1885_s29, 2 }
  0x2e   : > { %s1778_s7 = scalar_lea.vmem %s1875_s1, %s1252_s4 }
  0x31   : > { %v1639_v32 = vmov 0.0  }
  0x32   : > { %350 = vst [vmem:[#allocation2 + $0x30] sm:$0xff] %v1639_v32  ;;  %351 = vst [vmem:[#allocation2] sm:$0xff] %v1639_v32 }
  0x33   : > { %352 = vst [vmem:[#allocation2 + $0x58] sm:$0xff] %v1639_v32  ;;  %353 = vst [vmem:[#allocation2 + $0x18] sm:$0xff] %v1639_v32 }
  0x34   : > { %354 = vst [vmem:[#allocation2 + $0x50] sm:$0xff] %v1639_v32  ;;  %355 = vst [vmem:[#allocation2 + $0x68] sm:$0xff] %v1639_v32 }
  0x35   : > { %356 = vst [vmem:[#allocation2 + $0x8] sm:$0xff] %v1639_v32  ;;  %357 = vst [vmem:[#allocation2 + $0x48] sm:$0xff] %v1639_v32 }
  0x36   : > { %358 = vst [vmem:[#allocation2 + $0x40] sm:$0xff] %v1639_v32  ;;  %359 = vst [vmem:[#allocation2 + $0x20] sm:$0xff] %v1639_v32 }
  0x37   : > { %360 = vst [vmem:[#allocation2 + $0x10] sm:$0xff] %v1639_v32  ;;  %361 = vst [vmem:[#allocation2 + $0x38] sm:$0xff] %v1639_v32 }
  0x38   : > { %362 = vst [vmem:[#allocation2 + $0x60] sm:$0xff] %v1639_v32  ;;  %363 = vst [vmem:[#allocation2 + $0x70] sm:$0xff] %v1639_v32 }
  0x39   : > { %364 = vst [vmem:[#allocation2 + $0x78] sm:$0xff] %v1639_v32  ;;  %365 = vst [vmem:[#allocation2 + $0x28] sm:$0xff] %v1639_v32 }
  0x3a PF: > { %v1543_v33 = vld [vmem:[%s1778_s7 + $0x78] sm:$0xff]   ;;  %v1546_v36 = vld [vmem:[%s1778_s7 + $0x70] sm:$0xff]   ;;  %v1549_v39 = vld [vmem:[%s1778_s7 + $0x68] sm:$0xff]   ;;  %p1302_p11 = scmp.ne.s32.totalorder %s1629_s14, 2 }
  0x3b   : > { %v1544_v34 = vld [vmem:[%s1778_s7 + $0x38] sm:$0xff]   ;;  %1388 = vmatprep.subr.bf16.mxu0 %v1543_v33  ;;  %v1547_v37 = vld [vmem:[%s1778_s7 + $0x30] sm:$0xff]   ;;  %v1550_v40 = vld [vmem:[%s1778_s7 + $0x28] sm:$0xff]  }
  0x3c   : > { %v1545_v35 = vld [vmem:[%s1778_s7 + $0xb8] sm:$0xff]   ;;  %1389 = vmatpush3.bf16.msra.mxu0 %v1544_v34  ;;  %v1548_v38 = vld [vmem:[%s1778_s7 + $0xb0] sm:$0xff]   ;;  %v1551_v41 = vld [vmem:[%s1778_s7 + $0xa8] sm:$0xff]  }
  0x3d   : > { %1468 = vmatprep.subr.bf16.mxu1 %v1545_v35  ;;  %1390 = vmatprep.subr.bf16.mxu0 %v1546_v36  ;;  %v1552_v42 = vld [vmem:[%s1778_s7 + $0x60] sm:$0xff]   ;;  %v1555_v45 = vld [vmem:[%s1778_s7 + $0x58] sm:$0xff]   ;;  %v1558_v48 = vld [vmem:[%s1778_s7 + $0x50] sm:$0xff]  }
  0x3e   : > { %1469 = vmatpush3.bf16.msra.mxu1 %v1545_v35  ;;  %v1553_v43 = vld [vmem:[%s1778_s7 + $0x20] sm:$0xff]   ;;  %v1557_v46 = vld [vmem:[%s1778_s7 + $0x98] sm:$0xff]   ;;  %v1560_v49 = vld [vmem:[%s1778_s7 + $0x90] sm:$0xff]  }
  0x3f   : > { %1470 = vmatprep.subr.bf16.mxu1 %v1548_v38  ;;  %v1554_v44 = vld [vmem:[%s1778_s7 + $0xa0] sm:$0xff]   ;;  %v1556_v47 = vld [vmem:[%s1778_s7 + $0x18] sm:$0xff]   ;;  %v1559_v50 = vld [vmem:[%s1778_s7 + $0x10] sm:$0xff]  }
  0x40   : > { %1391 = vmatpush3.bf16.msra.mxu0 %v1547_v37  ;;  %v1561_v51 = vld [vmem:[%s1778_s7 + $0x48] sm:$0xff]   ;;  %v1564_v54 = vld [vmem:[%s1778_s7 + $0x40] sm:$0xff]   ;;  %v1579_v1 = vld [vmem:[%s1780_s8 + $0x50] ss:$12 sps:$4 sm:$0xff]  }
  0x41   : > { %1392 = vmatprep.subr.bf16.mxu0 %v1549_v39  ;;  %v1562_v52 = vld [vmem:[%s1778_s7 + $0x8] sm:$0xff]   ;;  %v1566_v55 = vld [vmem:[%s1778_s7 + $0x80] sm:$0xff]   ;;  %v1577_v3 = vld [vmem:[%s1780_s8 + $0x30] ss:$12 sps:$4 sm:$0xff]  }
  0x42   : > { %1471 = vmatpush3.bf16.msra.mxu1 %v1548_v38  ;;  %v1563_v53 = vld [vmem:[%s1778_s7 + $0x88] sm:$0xff]   ;;  %v1569_v56 = vld [vmem:[%s1780_s8 + $0x4] ss:$12 sps:$4 sm:$0xff]   ;;  %v1575_v0 = vld [vmem:[%s1780_s8 + $0x34] ss:$12 sps:$4 sm:$0xff]  }
  0x43   : > { %1472 = vmatprep.subr.bf16.mxu1 %v1551_v41  ;;  %v1570_v57 = vld [vmem:[%s1780_s8 + $0x8] ss:$12 sps:$4 sm:$0xff]   ;;  %v1565_v58 = vld [vmem:[%s1778_s7] sm:$0xff]   ;;  %766 = vmatprep.mubr.bf16.mxu0 %v1569_v56  ;;  %v1580_v4 = vld [vmem:[%s1780_s8 + $0x4c] ss:$12 sps:$4 sm:$0xff]  }
  0x44   : > { %1393 = vmatpush3.bf16.msra.mxu0 %v1550_v40  ;;  %1484 = vmatprep.mubr.bf16.mxu1 %v1570_v57  ;;  %v1567_v59 = vld [vmem:[%s1780_s8] ss:$12 sps:$4 sm:$0xff]   ;;  %v1572_v60 = vld [vmem:[%s1780_s8 + $0x1c] ss:$12 sps:$4 sm:$0xff]   ;;  %v1578_v62 = vld [vmem:[%s1780_s8 + $0x38] ss:$12 sps:$4 sm:$0xff]  }
  0x45   : > { %1394 = vmatprep.subr.bf16.mxu0 %v1552_v42  ;;  %v1571_v61 = vld [vmem:[%s1780_s8 + $0x20] ss:$12 sps:$4 sm:$0xff]   ;;  %v1574_v63 = vld [vmem:[%s1780_s8 + $0x18] ss:$12 sps:$4 sm:$0xff]   ;;  %v1586_v2 = vld [vmem:[%s1780_s8 + $0x68] ss:$12 sps:$4 sm:$0xff]  }
  0x46   : > { %1473 = vmatpush3.bf16.msra.mxu1 %v1551_v41  ;;  %v1587_v5 = vld [vmem:[%s1780_s8 + $0x80] ss:$12 sps:$4 sm:$0xff]   ;;  %v1594_v6 = vld [vmem:[%s1780_s8 + $0x98] ss:$12 sps:$4 sm:$0xff]   ;;  %v1582_v7 = vld [vmem:[%s1780_s8 + $0x48] ss:$12 sps:$4 sm:$0xff]  }
  0x47   : > { %1474 = vmatprep.subr.bf16.mxu1 %v1554_v44  ;;  %v1583_v8 = vld [vmem:[%s1780_s8 + $0x64] ss:$12 sps:$4 sm:$0xff]   ;;  %v1585_v10 = vld [vmem:[%s1780_s8 + $0x60] ss:$12 sps:$4 sm:$0xff]   ;;  %v1588_v11 = vld [vmem:[%s1780_s8 + $0x7c] ss:$12 sps:$4 sm:$0xff]  }
  0x48   : > { %1395 = vmatpush3.bf16.msra.mxu0 %v1553_v43  ;;  %v1595_v9 = vld [vmem:[%s1780_s8 + $0xb0] ss:$12 sps:$4 sm:$0xff]   ;;  %v1590_v12 = vld [vmem:[%s1780_s8 + $0x78] ss:$12 sps:$4 sm:$0xff]   ;;  %v1591_v13 = vld [vmem:[%s1780_s8 + $0x94] ss:$12 sps:$4 sm:$0xff]  }
  0x49   : > { %1396 = vmatprep.subr.bf16.mxu0 %v1555_v45  ;;  %v1593_v14 = vld [vmem:[%s1780_s8 + $0x90] ss:$12 sps:$4 sm:$0xff]   ;;  %v1596_v15 = vld [vmem:[%s1780_s8 + $0xac] ss:$12 sps:$4 sm:$0xff]   ;;  %v1598_v16 = vld [vmem:[%s1780_s8 + $0xa8] ss:$12 sps:$4 sm:$0xff]  }
  0x4a   : > { %1475 = vmatpush3.bf16.msra.mxu1 %v1554_v44  ;;  %v366_v22 = vld [vmem:[#allocation2 + $0x30] sm:$0xff]  ;;  %v367_v30 = vld [vmem:[#allocation2] sm:$0xff]  ;;  %v368_v37 = vld [vmem:[#allocation2 + $0x58] sm:$0xff] }
  0x4b   : > { %1476 = vmatprep.subr.bf16.mxu1 %v1557_v46  ;;  %v369_v44 = vld [vmem:[#allocation2 + $0x18] sm:$0xff] }
  0x4c   : > { %1397 = vmatpush3.bf16.msra.mxu0 %v1556_v47 }
  0x4d   : > { %1398 = vmatprep.subr.bf16.mxu0 %v1558_v48 }
  0x4e   : > { %1477 = vmatpush3.bf16.msra.mxu1 %v1557_v46 }
  0x4f   : > { %1478 = vmatprep.subr.bf16.mxu1 %v1560_v49 }
  0x50   : > { %1399 = vmatpush3.bf16.msra.mxu0 %v1559_v50 }
  0x51   : > { %1400 = vmatprep.subr.bf16.mxu0 %v1561_v51 }
  0x52   : > { %1479 = vmatpush3.bf16.msra.mxu1 %v1560_v49 }
  0x53   : > { %1480 = vmatprep.subr.bf16.mxu1 %v1563_v53 }
  0x54   : > { %1401 = vmatpush3.bf16.msra.mxu0 %v1562_v52  ;;  %v370_v52 = vld [vmem:[#allocation2 + $0x50] sm:$0xff] }
  0x55   : > { %1402 = vmatprep.subr.bf16.mxu0 %v1564_v54 }
  0x56   : > { %1481 = vmatpush3.bf16.msra.mxu1 %v1563_v53 }
  0x57   : > { %1482 = vmatprep.subr.bf16.mxu1 %v1566_v55 }
  0x58   : > { %1403 = vmatpush3.bf16.msra.mxu0 %v1565_v58 }
  0x5a   : > { %1483 = vmatpush3.bf16.msra.mxu1 %v1566_v55 }
  0x5b   : > { %767 = vmatmul.mubr.bf16.vlgmr.msra.gmra.mxu0 %v1567_v59  ;;  %v371_v59 = vld [vmem:[#allocation2 + $0x68] sm:$0xff] }
  0x5c   : > { %774 = vmatprep.mubr.bf16.mxu0 %v1572_v60 }
  0x5d   : > { %1485 = vmatmul.mubr.bf16.vlgmr.msra.gmra.mxu1 %v1571_v61 }
  0x5e   : > { %1488 = vmatprep.mubr.bf16.mxu1 %v1578_v62 }
  0x63   : > { %775 = vmatmul.mubr.bf16.gmra.mxu0 %v1574_v63 }
  0x64   : > { %782 = vmatprep.mubr.bf16.mxu0 %v1575_v0 }
  0x65   : > { %1489 = vmatmul.mubr.bf16.gmra.mxu1 %v1579_v1  ;;  %v372_v1 = vld [vmem:[#allocation2 + $0x8] sm:$0xff] }
  0x66   : > { %1492 = vmatprep.mubr.bf16.mxu1 %v1586_v2 }
  0x6b   : > { %783 = vmatmul.mubr.bf16.gmra.mxu0 %v1577_v3 }
  0x6c   : > { %790 = vmatprep.mubr.bf16.mxu0 %v1580_v4 }
  0x6d   : > { %1493 = vmatmul.mubr.bf16.gmra.mxu1 %v1587_v5 }
  0x6e   : > { %1496 = vmatprep.mubr.bf16.mxu1 %v1594_v6 }
  0x73   : > { %791 = vmatmul.mubr.bf16.gmra.mxu0 %v1582_v7 }
  0x74   : > { %798 = vmatprep.mubr.bf16.mxu0 %v1583_v8  ;;  %v373_v8 = vld [vmem:[#allocation2 + $0x48] sm:$0xff] }
  0x75   : > { %1497 = vmatmul.mubr.bf16.gmra.mxu1 %v1595_v9 }
  0x7b   : > { %799 = vmatmul.mubr.bf16.gmra.mxu0 %v1585_v10 }
  0x7c   : > { %806 = vmatprep.mubr.bf16.mxu0 %v1588_v11 }
  0x83   : > { %807 = vmatmul.mubr.bf16.gmra.mxu0 %v1590_v12 }
  0x84   : > { %814 = vmatprep.mubr.bf16.mxu0 %v1591_v13 }
  0x8b   : > { %815 = vmatmul.mubr.bf16.gmra.mxu0 %v1593_v14 }
  0x8c   : > { %822 = vmatprep.mubr.bf16.mxu0 %v1596_v15 }
  0x93   : > { %823 = vmatmul.mubr.bf16.gmra.mxu0 %v1598_v16  ;;  %v374_v16 = vld [vmem:[#allocation2 + $0x40] sm:$0xff] }
 0x11b   : > { %v1404_v17 = vpop.f32.mrf.mxu0 }
 0x11d   : > { %v1405_v18 = vpop.f32.mrf.mxu0  ;;  %v1486_v19 = vpop.f32.mrf.mxu1 }
 0x11e   : > { %v1406_v20 = vadd.f32 %v1405_v18, %v1404_v17 }
 0x11f   : > { %v1407_v21 = vpop.f32.mrf.mxu0  ;;  %v865_v23 = vpop.f32.mrf.mxu1 }
 0x120   : > { %v866_v24 = vadd.f32 %v1406_v20, %v865_v23  ;;  %v375_v23 = vld [vmem:[#allocation2 + $0x20] sm:$0xff] }
 0x121   : > { %v1408_v25 = vpop.f32.mrf.mxu0  ;;  %v1487_v26 = vpop.f32.mrf.mxu1 }
 0x122   : > { %v928_v27 = vadd.f32 %v866_v24, %v366_v22  ;;  %v1409_v28 = vadd.f32 %v1408_v25, %v1407_v21 }
 0x123   : > { %v1410_v29 = vpop.f32.mrf.mxu0  ;;  %v868_v31 = vpop.f32.mrf.mxu1 }
 0x124   : > { %944 = vst [vmem:[#allocation2 + $0x30] sm:$0xff] %v928_v27  ;;  %v869_v32 = vadd.f32 %v1409_v28, %v868_v31 }
 0x125   : > { %v1411_v33 = vpop.f32.mrf.mxu0  ;;  %v1490_v34 = vpop.f32.mrf.mxu1 }
 0x126   : > { %v929_v35 = vadd.f32 %v869_v32, %v367_v30  ;;  %v1412_v36 = vadd.f32 %v1411_v33, %v1410_v29  ;;  %v376_v29 = vld [vmem:[#allocation2 + $0x10] sm:$0xff] }
 0x127   : > { %v1413_v38 = vpop.f32.mrf.mxu0  ;;  %v881_v41 = vpop.f32.mrf.mxu1 }
 0x128   : > { %945 = vst [vmem:[#allocation2] sm:$0xff] %v929_v35  ;;  %v874_v39 = vadd.f32 %v1486_v19, %v1412_v36  ;;  %v377_v36 = vld [vmem:[#allocation2 + $0x38] sm:$0xff] }
 0x129   : > { %v1414_v40 = vpop.f32.mrf.mxu0  ;;  %v1491_v48 = vpop.f32.mrf.mxu1 }
 0x12a   : > { %v930_v42 = vadd.f32 %v874_v39, %v368_v37  ;;  %v1415_v43 = vadd.f32 %v1414_v40, %v1413_v38 }
 0x12b   : > { %v1416_v45 = vpop.f32.mrf.mxu0  ;;  %v884_v55 = vpop.f32.mrf.mxu1 }
 0x12c   : > { %946 = vst [vmem:[#allocation2 + $0x58] sm:$0xff] %v930_v42  ;;  %v877_v46 = vadd.f32 %v1487_v26, %v1415_v43 }
 0x12d   : > { %v1417_v47 = vpop.f32.mrf.mxu0  ;;  %v1494_v62 = vpop.f32.mrf.mxu1 }
 0x12e   : > { %v931_v49 = vadd.f32 %v877_v46, %v369_v44  ;;  %v1418_v50 = vadd.f32 %v1417_v47, %v1416_v45  ;;  %v378_v44 = vld [vmem:[#allocation2 + $0x60] sm:$0xff] }
 0x12f   : > { %v1419_v51 = vpop.f32.mrf.mxu0  ;;  %v897_v5 = vpop.f32.mrf.mxu1 }
 0x130   : > { %947 = vst [vmem:[#allocation2 + $0x18] sm:$0xff] %v931_v49  ;;  %v882_v53 = vadd.f32 %v1418_v50, %v881_v41 }
 0x131   : > { %v1420_v54 = vpop.f32.mrf.mxu0  ;;  %v1495_v12 = vpop.f32.mrf.mxu1 }
 0x132   : > { %v932_v56 = vadd.f32 %v882_v53, %v370_v52  ;;  %v1421_v57 = vadd.f32 %v1420_v54, %v1419_v51  ;;  %v379_v51 = vld [vmem:[#allocation2 + $0x70] sm:$0xff] }
 0x133   : > { %v1422_v58 = vpop.f32.mrf.mxu0  ;;  %v900_v19 = vpop.f32.mrf.mxu1 }
 0x134   : > { %948 = vst [vmem:[#allocation2 + $0x50] sm:$0xff] %v932_v56  ;;  %v885_v60 = vadd.f32 %v1421_v57, %v884_v55  ;;  %v380_v56 = vld [vmem:[#allocation2 + $0x78] sm:$0xff] }
 0x135   : > { %v1423_v61 = vpop.f32.mrf.mxu0  ;;  %v1498_v26 = vpop.f32.mrf.mxu1 }
 0x136   : > { %v933_v63 = vadd.f32 %v885_v60, %v371_v59  ;;  %v1424_v0 = vadd.f32 %v1423_v61, %v1422_v58 }
 0x137   : > { %v1425_v2 = vpop.f32.mrf.mxu0  ;;  %v913_v33 = vpop.f32.mrf.mxu1 }
 0x138   : > { %949 = vst [vmem:[#allocation2 + $0x68] sm:$0xff] %v933_v63  ;;  %v890_v3 = vadd.f32 %v1490_v34, %v1424_v0 }
 0x139   : > { %v1426_v4 = vpop.f32.mrf.mxu0  ;;  %v1499_v40 = vpop.f32.mrf.mxu1 }
 0x13a   : > { %v934_v6 = vadd.f32 %v890_v3, %v372_v1  ;;  %v1427_v7 = vadd.f32 %v1426_v4, %v1425_v2 }
 0x13b   : > { %v1428_v9 = vpop.f32.mrf.mxu0  ;;  %v916_v47 = vpop.f32.mrf.mxu1 }
 0x13c   : > { %950 = vst [vmem:[#allocation2 + $0x8] sm:$0xff] %v934_v6  ;;  %v893_v10 = vadd.f32 %v1491_v48, %v1427_v7 }
 0x13d   : > { %v1429_v11 = vpop.f32.mrf.mxu0 }
 0x13e   : > { %v935_v13 = vadd.f32 %v893_v10, %v373_v8  ;;  %v1430_v14 = vadd.f32 %v1429_v11, %v1428_v9 }
 0x13f   : > { %v1431_v15 = vpop.f32.mrf.mxu0 }
 0x140   : > { %951 = vst [vmem:[#allocation2 + $0x48] sm:$0xff] %v935_v13  ;;  %v898_v17 = vadd.f32 %v1430_v14, %v897_v5 }
 0x141   : > { %v1432_v18 = vpop.f32.mrf.mxu0 }
 0x142   : > { %v936_v20 = vadd.f32 %v898_v17, %v374_v16  ;;  %v1433_v21 = vadd.f32 %v1432_v18, %v1431_v15 }
 0x143   : > { %v1434_v22 = vpop.f32.mrf.mxu0 }
 0x144   : > { %952 = vst [vmem:[#allocation2 + $0x40] sm:$0xff] %v936_v20  ;;  %v901_v24 = vadd.f32 %v1433_v21, %v900_v19 }
 0x145   : > { %v1435_v25 = vpop.f32.mrf.mxu0 }
 0x146   : > { %v937_v27 = vadd.f32 %v901_v24, %v375_v23  ;;  %v1436_v28 = vadd.f32 %v1435_v25, %v1434_v22 }
 0x147   : > { %v1437_v30 = vpop.f32.mrf.mxu0 }
 0x148   : > { %953 = vst [vmem:[#allocation2 + $0x20] sm:$0xff] %v937_v27  ;;  %v906_v31 = vadd.f32 %v1494_v62, %v1436_v28  ;;  %v381_v62 = vld [vmem:[#allocation2 + $0x28] sm:$0xff] }
 0x149   : > { %v1438_v32 = vpop.f32.mrf.mxu0 }
 0x14a   : > { %v938_v34 = vadd.f32 %v906_v31, %v376_v29  ;;  %v1439_v35 = vadd.f32 %v1438_v32, %v1437_v30 }
 0x14b   : > { %v1440_v37 = vpop.f32.mrf.mxu0 }
 0x14c   : > { %954 = vst [vmem:[#allocation2 + $0x10] sm:$0xff] %v938_v34  ;;  %v909_v38 = vadd.f32 %v1495_v12, %v1439_v35 }
 0x14d   : > { %v1441_v39 = vpop.f32.mrf.mxu0 }
 0x14e   : > { %v939_v41 = vadd.f32 %v909_v38, %v377_v36  ;;  %v1442_v42 = vadd.f32 %v1441_v39, %v1440_v37 }
 0x14f   : > { %v1443_v43 = vpop.f32.mrf.mxu0 }
 0x150   : > { %955 = vst [vmem:[#allocation2 + $0x38] sm:$0xff] %v939_v41  ;;  %v914_v45 = vadd.f32 %v1442_v42, %v913_v33 }
 0x151   : > { %v1444_v46 = vpop.f32.mrf.mxu0 }
 0x152   : > { %v940_v48 = vadd.f32 %v914_v45, %v378_v44  ;;  %v1445_v49 = vadd.f32 %v1444_v46, %v1443_v43 }
 0x153   : > { %v1446_v50 = vpop.f32.mrf.mxu0 }
 0x154   : > { %956 = vst [vmem:[#allocation2 + $0x60] sm:$0xff] %v940_v48  ;;  %v917_v52 = vadd.f32 %v1445_v49, %v916_v47 }
 0x155   : > { %v1447_v53 = vpop.f32.mrf.mxu0 }
 0x156   : > { %v941_v54 = vadd.f32 %v917_v52, %v379_v51  ;;  %v1448_v55 = vadd.f32 %v1447_v53, %v1446_v50 }
 0x157   : > { %v1449_v57 = vpop.f32.mrf.mxu0 }
 0x158   : > { %957 = vst [vmem:[#allocation2 + $0x70] sm:$0xff] %v941_v54  ;;  %v922_v58 = vadd.f32 %v1498_v26, %v1448_v55 }
 0x159   : > { %v1450_v59 = vpop.f32.mrf.mxu0 }
 0x15a   : > { %v942_v60 = vadd.f32 %v922_v58, %v380_v56  ;;  %v1451_v61 = vadd.f32 %v1450_v59, %v1449_v57 }
 0x15c   : > { %958 = vst [vmem:[#allocation2 + $0x78] sm:$0xff] %v942_v60  ;;  %v925_v63 = vadd.f32 %v1499_v40, %v1451_v61  ;;  %963 = sbr.rel (%p1302_p11) target bundleno = 369 (0x171), region = 66 }
 0x15e   : > { %v943_v0 = vadd.f32 %v925_v63, %v381_v62 }
 0x160   : > { %959 = vst [vmem:[#allocation2 + $0x28] sm:$0xff] %v943_v0 }
 0x161   : > { %v964_v1 = vld [vmem:[#allocation2 + $0x30] sm:$0xff]  ;;  %v965_v2 = vld [vmem:[#allocation2] sm:$0xff]  ;;  %v966_v6 = vld [vmem:[#allocation2 + $0x58] sm:$0xff] }
 0x162   : > { %v1303_v3 = vld [vmem:[%s1876_s2] ss:$0 sm:$0xff]  ;;  %v967_v7 = vld [vmem:[#allocation2 + $0x18] sm:$0xff]  ;;  %v968_v8 = vld [vmem:[#allocation2 + $0x50] sm:$0xff] }
 0x163   : > { %v987_v4 = vadd.f32 %v1303_v3, %v964_v1  ;;  %v988_v5 = vadd.f32 %v1303_v3, %v965_v2  ;;  %v989_v9 = vadd.f32 %v1303_v3, %v966_v6  ;;  %v990_v10 = vadd.f32 %v1303_v3, %v967_v7  ;;  %v969_v11 = vld [vmem:[#allocation2 + $0x68] sm:$0xff]  ;;  %v972_v19 = vld [vmem:[#allocation2 + $0x40] sm:$0xff]  ;;  %v974_v21 = vld [vmem:[#allocation2 + $0x10] sm:$0xff] }
 0x164   : > { %v991_v12 = vadd.f32 %v1303_v3, %v968_v8  ;;  %v970_v13 = vld [vmem:[#allocation2 + $0x8] sm:$0xff]  ;;  %v992_v17 = vadd.f32 %v1303_v3, %v969_v11  ;;  %v973_v20 = vld [vmem:[#allocation2 + $0x20] sm:$0xff]  ;;  %v975_v26 = vld [vmem:[#allocation2 + $0x38] sm:$0xff]  ;;  %v995_v31 = vadd.f32 %v1303_v3, %v972_v19  ;;  %v997_v36 = vadd.f32 %v1303_v3, %v974_v21 }
 0x165   : > { %v971_v14 = vld [vmem:[#allocation2 + $0x48] sm:$0xff]  ;;  %v1003_v15 = vmax.f32 %v987_v4, 0.0  ;;  %v1004_v16 = vmax.f32 %v988_v5, 0.0  ;;  %v993_v18 = vadd.f32 %v1303_v3, %v970_v13  ;;  %v1005_v22 = vmax.f32 %v989_v9, 0.0  ;;  %v976_v27 = vld [vmem:[#allocation2 + $0x60] sm:$0xff]  ;;  %v977_v32 = vld [vmem:[#allocation2 + $0x70] sm:$0xff] }
 0x166   : > { %v1006_v23 = vmax.f32 %v990_v10, 0.0  ;;  %v1007_v24 = vmax.f32 %v991_v12, 0.0  ;;  %v994_v25 = vadd.f32 %v1303_v3, %v971_v14  ;;  %v1008_v29 = vmax.f32 %v992_v17, 0.0  ;;  %v978_v37 = vld [vmem:[#allocation2 + $0x78] sm:$0xff] }
 0x167   : > { %v1344_v28 = vpack.c.bf16 %v1004_v16, %v1003_v15  ;;  %v1009_v30 = vmax.f32 %v993_v18, 0.0  ;;  %v996_v35 = vadd.f32 %v1303_v3, %v973_v20  ;;  %v979_v38 = vld [vmem:[#allocation2 + $0x28] sm:$0xff]  ;;  %v1011_v40 = vmax.f32 %v995_v31, 0.0 }
 0x168   : > { %v1349_v33 = vpack.c.bf16 %v1006_v23, %v1005_v22  ;;  %v1010_v34 = vmax.f32 %v994_v25, 0.0  ;;  %v1354_v39 = vpack.c.bf16 %v1008_v29, %v1007_v24  ;;  %v998_v41 = vadd.f32 %v1303_v3, %v975_v26 }
 0x169   : > { %1345 = vst [vmem:[%s1877_s3] sm:$0xff] %v1344_v28   ;;  %v999_v42 = vadd.f32 %v1303_v3, %v976_v27  ;;  %v1012_v44 = vmax.f32 %v996_v35, 0.0  ;;  %v1013_v45 = vmax.f32 %v997_v36, 0.0  ;;  %v1000_v46 = vadd.f32 %v1303_v3, %v977_v32 }
 0x16a   : > { %1381 = vst [vmem:[%s1877_s3 + $0x8] sm:$0xff] %v1349_v33   ;;  %v1359_v43 = vpack.c.bf16 %v1010_v34, %v1009_v30  ;;  %1382 = vst [vmem:[%s1877_s3 + $0x10] sm:$0xff] %v1354_v39   ;;  %v1014_v47 = vmax.f32 %v998_v41, 0.0  ;;  %v1001_v49 = vadd.f32 %v1303_v3, %v978_v37  ;;  %v1002_v50 = vadd.f32 %v1303_v3, %v979_v38 }
 0x16b   : > { %v1015_v48 = vmax.f32 %v999_v42, 0.0  ;;  %v1364_v51 = vpack.c.bf16 %v1012_v44, %v1011_v40  ;;  %v1016_v52 = vmax.f32 %v1000_v46, 0.0 }
 0x16c   : > { %1383 = vst [vmem:[%s1877_s3 + $0x18] sm:$0xff] %v1359_v43   ;;  %v1369_v53 = vpack.c.bf16 %v1014_v47, %v1013_v45  ;;  %v1017_v54 = vmax.f32 %v1001_v49, 0.0  ;;  %v1018_v55 = vmax.f32 %v1002_v50, 0.0 }
 0x16d   : > { %1384 = vst [vmem:[%s1877_s3 + $0x20] sm:$0xff] %v1364_v51   ;;  %v1374_v56 = vpack.c.bf16 %v1016_v52, %v1015_v48 }
 0x16e   : > { %1385 = vst [vmem:[%s1877_s3 + $0x28] sm:$0xff] %v1369_v53   ;;  %v1379_v57 = vpack.c.bf16 %v1018_v55, %v1017_v54 }
 0x16f   : > { %1386 = vst [vmem:[%s1877_s3 + $0x30] sm:$0xff] %v1374_v56  }
 0x170   : > { %1387 = vst [vmem:[%s1877_s3 + $0x38] sm:$0xff] %v1379_v57  }
 0x171 PF: > { %s13_s16 = sadd.s32 1, %s1637_s16   ;;  %s1878_s12 = smov %s1625_s13 }
 0x172   : > { %p10_p12 = scmp.ge.s32.totalorder %s13_s16, 5   ;;  %s1879_s13 = smov %s1695_s20 }
 0x173   : > { %s1880_s14 = smov %s1633_s15  ;;  %s1881_s15 = smov %s1883_s17 }
 0x174   :  { %12 = sbr.rel (!%p10_p12) target bundleno = 3 (0x3), region = 113 }

// kernel: clip_with_labels_forward.36
= control target key start
LH: loop header
LB: loop body
LE: loop exit
PB: predicated region body
PF: predicated region fallthrough
CT: control target
= control target key end

     0   :  { %v181_v0 = vmov 0.0   ;;  %vm182_vm0 = vmmov 0   ;;  %s236_s1 = inlined_call_operand.vmem [shape: bf16[128,128], index: 1, kind: input, shape index: {}]   ;;  %s237_s0 = inlined_call_operand.vmem [shape: bf16[8,128], index: 0, kind: input, shape index: {}]   ;;  %s238_s2 = inlined_call_operand.vmem [shape: f32[1,128], index: 2, kind: input, shape index: {}]   ;;  %s239_s3 = inlined_call_operand.vmem [shape: bf16[8,128], index: 3, kind: output, shape index: {}]  }
   0x1   :  { %151 = vmatprep.subr.bf16.mxu0 %v181_v0  ;;  %v173_v1 = vld [vmem:[%s236_s1 + $0x38] sm:$0xff]   ;;  %167 = vmatprep.mubr.msk.bf16.mxu0 %vm182_vm0, %v181_v0  ;;  %v174_v2 = vld [vmem:[%s236_s1 + $0x30] sm:$0xff]   ;;  %v175_v3 = vld [vmem:[%s236_s1 + $0x28] sm:$0xff]  }
   0x2   :  { %152 = vmatpush3.bf16.msra.mxu0 %v173_v1  ;;  %v176_v4 = vld [vmem:[%s236_s1 + $0x20] sm:$0xff]   ;;  %v177_v5 = vld [vmem:[%s236_s1 + $0x18] sm:$0xff]   ;;  %v178_v6 = vld [vmem:[%s236_s1 + $0x10] sm:$0xff]  }
   0x3   :  { %153 = vmatprep.subr.bf16.mxu0 %v181_v0  ;;  %v179_v7 = vld [vmem:[%s236_s1 + $0x8] sm:$0xff]   ;;  %v180_v8 = vld [vmem:[%s236_s1] sm:$0xff]  }
   0x4   :  { %v15_v9 = vld [vmem:[%s237_s0] sm:$0xf] }
   0x5   :  { %v133_v10 = vld [vmem:[%s238_s2] ss:$0 sm:$0xff] }
   0x6   :  { %154 = vmatpush3.bf16.msra.mxu0 %v174_v2 }
   0x7   :  { %155 = vmatprep.subr.bf16.mxu0 %v181_v0 }
   0xa   :  { %156 = vmatpush3.bf16.msra.mxu0 %v175_v3 }
   0xb   :  { %157 = vmatprep.subr.bf16.mxu0 %v181_v0 }
   0xe   :  { %158 = vmatpush3.bf16.msra.mxu0 %v176_v4 }
   0xf   :  { %159 = vmatprep.subr.bf16.mxu0 %v181_v0 }
  0x12   :  { %160 = vmatpush3.bf16.msra.mxu0 %v177_v5 }
  0x13   :  { %161 = vmatprep.subr.bf16.mxu0 %v181_v0 }
  0x16   :  { %162 = vmatpush3.bf16.msra.mxu0 %v178_v6 }
  0x17   :  { %163 = vmatprep.subr.bf16.mxu0 %v181_v0 }
  0x1a   :  { %164 = vmatpush3.bf16.msra.mxu0 %v179_v7 }
  0x1b   :  { %165 = vmatprep.subr.bf16.mxu0 %v181_v0 }
  0x1e   :  { %166 = vmatpush3.bf16.msra.mxu0 %v180_v8 }
  0x21   :  { %168 = vmatmul.mubr.bf16.vlgmr.msra.gmra.mxu0 %v15_v9 }
  0xe1   :  { %v121_v11 = vpop.f32.mrf.mxu0 }
  0xe2   :  { %v122_v12 = vadd.f32 %v133_v10, %v121_v11 }
  0xe3   :  { %v169_v13 = vpop.f32.mrf.mxu0 }
  0xe4   :  { %v127_v14 = vpack.c.bf16 %v122_v12, %v122_v12 }
  0xe5   :  { %v124_v15 = vpop.f32.mrf.mxu0 }
  0xe6   :  { %128 = vst [vmem:[%s239_s3] sm:$0xf] %v127_v14 }
  0xe7   :  { %v170_v16 = vpop.f32.mrf.mxu0 }

// kernel: clip_with_labels_forward.38
= control target key start
LH: loop header
LB: loop body
LE: loop exit
PB: predicated region body
PF: predicated region fallthrough
CT: control target
= control target key end

     0   :  { %v182_v0 = vmov 0.0   ;;  %vm183_vm0 = vmmov 0   ;;  %s237_s1 = inlined_call_operand.vmem [shape: bf16[128,128], index: 1, kind: input, shape index: {}]   ;;  %s238_s0 = inlined_call_operand.vmem [shape: bf16[8,128], index: 0, kind: input, shape index: {}]   ;;  %s239_s2 = inlined_call_operand.vmem [shape: f32[1,128], index: 2, kind: input, shape index: {}]   ;;  %s240_s3 = inlined_call_operand.vmem [shape: bf16[8,128], index: 3, kind: output, shape index: {}]  }
   0x1   :  { %152 = vmatprep.subr.bf16.mxu0 %v182_v0  ;;  %v174_v1 = vld [vmem:[%s237_s1 + $0x38] sm:$0xff]   ;;  %168 = vmatprep.mubr.msk.bf16.mxu0 %vm183_vm0, %v182_v0  ;;  %v175_v2 = vld [vmem:[%s237_s1 + $0x30] sm:$0xff]   ;;  %v176_v3 = vld [vmem:[%s237_s1 + $0x28] sm:$0xff]  }
   0x2   :  { %153 = vmatpush3.bf16.msra.mxu0 %v174_v1  ;;  %v177_v4 = vld [vmem:[%s237_s1 + $0x20] sm:$0xff]   ;;  %v178_v5 = vld [vmem:[%s237_s1 + $0x18] sm:$0xff]   ;;  %v179_v6 = vld [vmem:[%s237_s1 + $0x10] sm:$0xff]  }
   0x3   :  { %154 = vmatprep.subr.bf16.mxu0 %v182_v0  ;;  %v180_v7 = vld [vmem:[%s237_s1 + $0x8] sm:$0xff]   ;;  %v181_v8 = vld [vmem:[%s237_s1] sm:$0xff]  }
   0x4   :  { %v15_v9 = vld [vmem:[%s238_s0] sm:$0xf] }
   0x5   :  { %v134_v10 = vld [vmem:[%s239_s2] ss:$0 sm:$0xff] }
   0x6   :  { %155 = vmatpush3.bf16.msra.mxu0 %v175_v2 }
   0x7   :  { %156 = vmatprep.subr.bf16.mxu0 %v182_v0 }
   0xa   :  { %157 = vmatpush3.bf16.msra.mxu0 %v176_v3 }
   0xb   :  { %158 = vmatprep.subr.bf16.mxu0 %v182_v0 }
   0xe   :  { %159 = vmatpush3.bf16.msra.mxu0 %v177_v4 }
   0xf   :  { %160 = vmatprep.subr.bf16.mxu0 %v182_v0 }
  0x12   :  { %161 = vmatpush3.bf16.msra.mxu0 %v178_v5 }
  0x13   :  { %162 = vmatprep.subr.bf16.mxu0 %v182_v0 }
  0x16   :  { %163 = vmatpush3.bf16.msra.mxu0 %v179_v6 }
  0x17   :  { %164 = vmatprep.subr.bf16.mxu0 %v182_v0 }
  0x1a   :  { %165 = vmatpush3.bf16.msra.mxu0 %v180_v7 }
  0x1b   :  { %166 = vmatprep.subr.bf16.mxu0 %v182_v0 }
  0x1e   :  { %167 = vmatpush3.bf16.msra.mxu0 %v181_v8 }
  0x21   :  { %169 = vmatmul.mubr.bf16.vlgmr.msra.gmra.mxu0 %v15_v9 }
  0xe1   :  { %v121_v11 = vpop.f32.mrf.mxu0 }
  0xe2   :  { %v122_v12 = vadd.f32 %v134_v10, %v121_v11 }
  0xe3   :  { %v170_v13 = vpop.f32.mrf.mxu0 }
  0xe4   :  { %v127_v14 = vmax.f32 %v122_v12, 0.0 }
  0xe5   :  { %v124_v15 = vpop.f32.mrf.mxu0 }
  0xe6   :  { %v128_v16 = vpack.c.bf16 %v127_v14, %v127_v14 }
  0xe7   :  { %v171_v17 = vpop.f32.mrf.mxu0 }
  0xe8   :  { %129 = vst [vmem:[%s240_s3] sm:$0xf] %v128_v16 }

// kernel: clip_with_labels_forward.37
= control target key start
LH: loop header
LB: loop body
LE: loop exit
PB: predicated region body
PF: predicated region fallthrough
CT: control target
= control target key end

     0   :  { %v188_v0 = vmov 0.0   ;;  %vm189_vm0 = vmmov 0   ;;  %s251_s1 = inlined_call_operand.vmem [shape: bf16[128,128], index: 1, kind: input, shape index: {}]   ;;  %s252_s0 = inlined_call_operand.vmem [shape: bf16[8,128], index: 0, kind: input, shape index: {}]   ;;  %s253_s3 = inlined_call_operand.vmem [shape: bf16[8,128], index: 3, kind: input, shape index: {}]   ;;  %s254_s2 = inlined_call_operand.vmem [shape: f32[1,128], index: 2, kind: input, shape index: {}]   ;;  %s255_s4 = inlined_call_operand.vmem [shape: bf16[8,128], index: 4, kind: output, shape index: {}]  }
   0x1   :  { %158 = vmatprep.subr.bf16.mxu0 %v188_v0  ;;  %v180_v1 = vld [vmem:[%s251_s1 + $0x38] sm:$0xff]   ;;  %174 = vmatprep.mubr.msk.bf16.mxu0 %vm189_vm0, %v188_v0  ;;  %v181_v2 = vld [vmem:[%s251_s1 + $0x30] sm:$0xff]   ;;  %v182_v3 = vld [vmem:[%s251_s1 + $0x28] sm:$0xff]  }
   0x2   :  { %159 = vmatpush3.bf16.msra.mxu0 %v180_v1  ;;  %v183_v4 = vld [vmem:[%s251_s1 + $0x20] sm:$0xff]   ;;  %v184_v5 = vld [vmem:[%s251_s1 + $0x18] sm:$0xff]   ;;  %v185_v6 = vld [vmem:[%s251_s1 + $0x10] sm:$0xff]  }
   0x3   :  { %160 = vmatprep.subr.bf16.mxu0 %v188_v0  ;;  %v186_v7 = vld [vmem:[%s251_s1 + $0x8] sm:$0xff]   ;;  %v187_v8 = vld [vmem:[%s251_s1] sm:$0xff]  }
   0x4   :  { %v18_v9 = vld [vmem:[%s252_s0] sm:$0xf] }
   0x5   :  { %v130_v10 = vld [vmem:[%s253_s3] sm:$0xf] }
   0x6   :  { %161 = vmatpush3.bf16.msra.mxu0 %v181_v2  ;;  %v140_v11 = vld [vmem:[%s254_s2] ss:$0 sm:$0xff]  ;;  %v131_v12 = vunpack.c.l.bf16 %v130_v10 }
   0x7   :  { %162 = vmatprep.subr.bf16.mxu0 %v188_v0 }
   0xa   :  { %163 = vmatpush3.bf16.msra.mxu0 %v182_v3 }
   0xb   :  { %164 = vmatprep.subr.bf16.mxu0 %v188_v0 }
   0xe   :  { %165 = vmatpush3.bf16.msra.mxu0 %v183_v4 }
   0xf   :  { %166 = vmatprep.subr.bf16.mxu0 %v188_v0 }
  0x12   :  { %167 = vmatpush3.bf16.msra.mxu0 %v184_v5 }
  0x13   :  { %168 = vmatprep.subr.bf16.mxu0 %v188_v0 }
  0x16   :  { %169 = vmatpush3.bf16.msra.mxu0 %v185_v6 }
  0x17   :  { %170 = vmatprep.subr.bf16.mxu0 %v188_v0 }
  0x1a   :  { %171 = vmatpush3.bf16.msra.mxu0 %v186_v7 }
  0x1b   :  { %172 = vmatprep.subr.bf16.mxu0 %v188_v0 }
  0x1e   :  { %173 = vmatpush3.bf16.msra.mxu0 %v187_v8 }
  0x21   :  { %175 = vmatmul.mubr.bf16.vlgmr.msra.gmra.mxu0 %v18_v9 }
  0xe1   :  { %v124_v13 = vpop.f32.mrf.mxu0 }
  0xe2   :  { %v125_v14 = vadd.f32 %v140_v11, %v124_v13 }
  0xe3   :  { %v176_v15 = vpop.f32.mrf.mxu0 }
  0xe4   :  { %v132_v16 = vadd.f32 %v131_v12, %v125_v14 }
  0xe5   :  { %v127_v17 = vpop.f32.mrf.mxu0 }
  0xe6   :  { %v133_v18 = vmax.f32 %v132_v16, 0.0 }
  0xe7   :  { %v177_v19 = vpop.f32.mrf.mxu0 }
  0xe8   :  { %v134_v20 = vpack.c.bf16 %v133_v18, %v133_v18 }
  0xea   :  { %135 = vst [vmem:[%s255_s4] sm:$0xf] %v134_v20 }

// kernel: clip_with_labels_forward.35
= control target key start
LH: loop header
LB: loop body
LE: loop exit
PB: predicated region body
PF: predicated region fallthrough
CT: control target
= control target key end

     0   :  { %s1072_s12 = smov 0   ;;  %s1074_s13 = smov 0   ;;  %s1182_s0 = inlined_call_operand.vmem [shape: bf16[32,1152], index: 0, kind: input, shape index: {}]   ;;  %s1183_s1 = inlined_call_operand.vmem [shape: bf16[1152,128], index: 1, kind: input, shape index: {}]   ;;  %s1184_s2 = inlined_call_operand.vmem [shape: f32[1,128], index: 2, kind: input, shape index: {}]   ;;  %s1185_s3 = inlined_call_operand.vmem [shape: bf16[32,128], index: 3, kind: output, shape index: {}]  }
   0x1   :  { %s1076_s14 = smov 0   ;;  %s1078_s15 = smov 0  }
   0x2   :  { %s1080_s16 = smov 0  }
   0x3 LB: > { %s25_s17 = sadd.s32 1, %s1045_s15  ;;  %p48_p1 = scmp.ne.s32.totalorder %s1037_s13, %s1033_s12  ;;  %s1049_s16 = sphi %s1080_s16, %s13_s16   ;;  %s1045_s15 = sphi %s1078_s15, %s1189_s15   ;;  %s1041_s14 = sphi %s1076_s14, %s1188_s14   ;;  %s1037_s13 = sphi %s1074_s13, %s1187_s13   ;;  %s1033_s12 = sphi %s1072_s12, %s1186_s12  }
   0x4   : > { %p26_p0 = scmp.ge.s32.totalorder %s25_s17, 3  ;;  %p49_p2 = scmp.eq.s32.totalorder %s1049_s16, 0 }
   0x5   : > { %s41_s19 = sadd.s32 1, %s1037_s13  ;;  %p809_p5 = scmp.ge.s32.totalorder %s1049_s16, 3 }
   0x6   : > { %s1191_s17 = smov (%p26_p0, %s25_s17), 0  ;;  %p50_p3 = por %p49_p2, %p48_p1 }
   0x7   : > { %s37_s18 = ssub.s32 %s1045_s15, %s1191_s17  ;;  %162 = sbr.rel (%p809_p5) target bundleno = 21 (0x15), region = 20 }
   0x8   : > { %p39_p4 = scmp.eq.s32.totalorder %s37_s18, 0 }
   0xa   : > { %s1107_s20 = scalar_select %p39_p4, %s1037_s13, %s41_s19  }
   0xc   : > { %165 = sbr.rel (!%p50_p3) target bundleno = 21 (0x15), region = 24  ;;  %s167_s21 = sand.u32 (%p50_p3), 1, %s1037_s13  }
   0xd   : > { %s862_s22 = smul.u32 (%p50_p3), 12, %s1045_s15 }
   0xe   : > { %s936_s23 = smul.u32 (%p50_p3), 48, %s167_s21 }
   0xf   : > { %s175_s26 = scalar_lea.vmem (%p50_p3), %s1182_s0, %s862_s22 }
  0x10   : > { %v190_v0 = vld [vmem:[%s175_s26] sm:$0xff] (%p50_p3)  ;;  %v194_v2 = vld [vmem:[%s175_s26 + $0x48] sm:$0xff] (%p50_p3)  ;;  %s169_s27 = scalar_lea.vmem (%p50_p3), [#allocation3], %s936_s23  ;;  %v815_v6 = vld [vmem:[%s175_s26 + $0x50] sm:$0xf] (%p50_p3) }
  0x11   : > { %v192_v1 = vld [vmem:[%s175_s26 + $0x24] sm:$0xff]  ;;  %191 = vst [vmem:[%s169_s27] sm:$0xff] %v190_v0  ;;  %195 = vst [vmem:[%s169_s27 + $0x18] sm:$0xff] %v194_v2  ;;  %v196_v3 = vld [vmem:[%s175_s26 + $0x6c] sm:$0xff] }
  0x12   : > { %193 = vst [vmem:[%s169_s27 + $0xc] sm:$0xff] %v192_v1  ;;  %v811_v4 = vld [vmem:[%s175_s26 + $0x8] sm:$0xf]  ;;  %v813_v5 = vld [vmem:[%s175_s26 + $0x2c] sm:$0xf]  ;;  %197 = vst [vmem:[%s169_s27 + $0x24] sm:$0xff] %v196_v3 }
  0x13   : > { %812 = vst [vmem:[%s169_s27 + $0x8] sm:$0xf] %v811_v4  ;;  %814 = vst [vmem:[%s169_s27 + $0x14] sm:$0xf] %v813_v5  ;;  %v817_v7 = vld [vmem:[%s175_s26 + $0x74] sm:$0xf] }
  0x14   : > { %816 = vst [vmem:[%s169_s27 + $0x20] sm:$0xf] %v815_v6  ;;  %818 = vst [vmem:[%s169_s27 + $0x2c] sm:$0xf] %v817_v7 }
  0x15 PF: > { %p819_p6 = scmp.ge.s32.totalorder %s1049_s16, 1  ;;  %p230_p7 = scmp.lt.s32.totalorder %s1049_s16, 4 }
  0x17   : > { %p231_p8 = pnand %p819_p6, %p230_p7 }
  0x18   : > { %s237_s28 = sand.u32 (!%p231_p8), 1, %s1033_s12   ;;  %s276_s29 = smul.u32 (!%p231_p8), 48, %s1041_s14 }
  0x19   : > { %234 = sbr.rel (%p231_p8) target bundleno = 299 (0x12b), region = 54  ;;  %p821_p10 = scmp.ne.s32.totalorder (!%p231_p8), %s1041_s14, 0 }
  0x1a   : > { %s937_s30 = smul.u32 (!%p231_p8), 48, %s237_s28  ;;  %p277_p9 = scmp.lt.s32.totalorder (!%p231_p8), %s276_s29, 143 }
  0x1c   : > { %s1124_s8 = scalar_lea.vmem (!%p231_p8), [#allocation3], %s937_s30 }
  0x1e   : > { %s1193_s29 = smov (!%p277_p9, %s276_s29), 143  ;;  %301 = sbr.rel (%p821_p10) target bundleno = 38 (0x26), region = 62 }
  0x1f   : > { %s820_s4 = sshll.u32 %s1193_s29, 2 }
  0x20   : > { %s1122_s7 = scalar_lea.vmem %s1183_s1, %s820_s4 }
  0x23   : > { %v1051_v8 = vmov 0.0  }
  0x24   : > { %302 = vst [vmem:[#allocation2 + $0x10] sm:$0xff] %v1051_v8  ;;  %303 = vst [vmem:[#allocation2] sm:$0xff] %v1051_v8 }
  0x25   : > { %304 = vst [vmem:[#allocation2 + $0x18] sm:$0xff] %v1051_v8  ;;  %305 = vst [vmem:[#allocation2 + $0x8] sm:$0xff] %v1051_v8 }
  0x26 PF: > { %v979_v9 = vld [vmem:[%s1122_s7 + $0x78] sm:$0xff]   ;;  %v982_v12 = vld [vmem:[%s1122_s7 + $0x70] sm:$0xff]   ;;  %v985_v15 = vld [vmem:[%s1122_s7 + $0x68] sm:$0xff]   ;;  %p852_p11 = scmp.ne.s32.totalorder %s1041_s14, 2 }
  0x27   : > { %v980_v10 = vld [vmem:[%s1122_s7 + $0x38] sm:$0xff]   ;;  %878 = vmatprep.subr.bf16.mxu0 %v979_v9  ;;  %v983_v13 = vld [vmem:[%s1122_s7 + $0x30] sm:$0xff]   ;;  %v986_v16 = vld [vmem:[%s1122_s7 + $0x28] sm:$0xff]  }
  0x28   : > { %v981_v11 = vld [vmem:[%s1122_s7 + $0xb8] sm:$0xff]   ;;  %879 = vmatpush3.bf16.msra.mxu0 %v980_v10  ;;  %v984_v14 = vld [vmem:[%s1122_s7 + $0xb0] sm:$0xff]   ;;  %v987_v17 = vld [vmem:[%s1122_s7 + $0xa8] sm:$0xff]  }
  0x29   : > { %916 = vmatprep.subr.bf16.mxu1 %v981_v11  ;;  %880 = vmatprep.subr.bf16.mxu0 %v982_v12  ;;  %v988_v18 = vld [vmem:[%s1122_s7 + $0x60] sm:$0xff]   ;;  %v991_v21 = vld [vmem:[%s1122_s7 + $0x58] sm:$0xff]   ;;  %v994_v24 = vld [vmem:[%s1122_s7 + $0x50] sm:$0xff]  }
  0x2a   : > { %917 = vmatpush3.bf16.msra.mxu1 %v981_v11  ;;  %v989_v19 = vld [vmem:[%s1122_s7 + $0x20] sm:$0xff]   ;;  %v993_v22 = vld [vmem:[%s1122_s7 + $0x98] sm:$0xff]   ;;  %v996_v25 = vld [vmem:[%s1122_s7 + $0x90] sm:$0xff]  }
  0x2b   : > { %918 = vmatprep.subr.bf16.mxu1 %v984_v14  ;;  %v990_v20 = vld [vmem:[%s1122_s7 + $0xa0] sm:$0xff]   ;;  %v992_v23 = vld [vmem:[%s1122_s7 + $0x18] sm:$0xff]   ;;  %v995_v26 = vld [vmem:[%s1122_s7 + $0x10] sm:$0xff]  }
  0x2c   : > { %881 = vmatpush3.bf16.msra.mxu0 %v983_v13  ;;  %v997_v27 = vld [vmem:[%s1122_s7 + $0x48] sm:$0xff]   ;;  %v1000_v30 = vld [vmem:[%s1122_s7 + $0x40] sm:$0xff]   ;;  %v306_v44 = vld [vmem:[#allocation2 + $0x10] sm:$0xff] }
  0x2d   : > { %882 = vmatprep.subr.bf16.mxu0 %v985_v15  ;;  %v998_v28 = vld [vmem:[%s1122_s7 + $0x8] sm:$0xff]   ;;  %v1002_v31 = vld [vmem:[%s1122_s7 + $0x80] sm:$0xff]   ;;  %v308_v58 = vld [vmem:[#allocation2 + $0x18] sm:$0xff] }
  0x2e   : > { %919 = vmatpush3.bf16.msra.mxu1 %v984_v14  ;;  %v999_v29 = vld [vmem:[%s1122_s7 + $0x88] sm:$0xff]   ;;  %v1005_v32 = vld [vmem:[%s1124_s8 + $0x4] ss:$12 sps:$4 sm:$0xff]  }
  0x2f   : > { %920 = vmatprep.subr.bf16.mxu1 %v987_v17  ;;  %v1006_v33 = vld [vmem:[%s1124_s8 + $0x8] ss:$12 sps:$4 sm:$0xff]   ;;  %574 = vmatprep.mubr.bf16.mxu0 %v1005_v32  ;;  %v1003_v35 = vld [vmem:[%s1124_s8] ss:$12 sps:$4 sm:$0xff]   ;;  %v1010_v38 = vld [vmem:[%s1124_s8 + $0x18] ss:$12 sps:$4 sm:$0xff]  }
  0x30   : > { %883 = vmatpush3.bf16.msra.mxu0 %v986_v16  ;;  %v1001_v34 = vld [vmem:[%s1122_s7] sm:$0xff]   ;;  %932 = vmatprep.mubr.bf16.mxu1 %v1006_v33  ;;  %v1008_v36 = vld [vmem:[%s1124_s8 + $0x1c] ss:$12 sps:$4 sm:$0xff]  }
  0x31   : > { %884 = vmatprep.subr.bf16.mxu0 %v988_v18  ;;  %v1007_v37 = vld [vmem:[%s1124_s8 + $0x20] ss:$12 sps:$4 sm:$0xff]  }
  0x32   : > { %921 = vmatpush3.bf16.msra.mxu1 %v987_v17  ;;  %v307_v52 = vld [vmem:[#allocation2] sm:$0xff]  ;;  %v309_v0 = vld [vmem:[#allocation2 + $0x8] sm:$0xff] }
  0x33   : > { %922 = vmatprep.subr.bf16.mxu1 %v990_v20 }
  0x34   : > { %885 = vmatpush3.bf16.msra.mxu0 %v989_v19 }
  0x35   : > { %886 = vmatprep.subr.bf16.mxu0 %v991_v21 }
  0x36   : > { %923 = vmatpush3.bf16.msra.mxu1 %v990_v20 }
  0x37   : > { %924 = vmatprep.subr.bf16.mxu1 %v993_v22 }
  0x38   : > { %887 = vmatpush3.bf16.msra.mxu0 %v992_v23 }
  0x39   : > { %888 = vmatprep.subr.bf16.mxu0 %v994_v24 }
  0x3a   : > { %925 = vmatpush3.bf16.msra.mxu1 %v993_v22 }
  0x3b   : > { %926 = vmatprep.subr.bf16.mxu1 %v996_v25 }
  0x3c   : > { %889 = vmatpush3.bf16.msra.mxu0 %v995_v26 }
  0x3d   : > { %890 = vmatprep.subr.bf16.mxu0 %v997_v27 }
  0x3e   : > { %927 = vmatpush3.bf16.msra.mxu1 %v996_v25 }
  0x3f   : > { %928 = vmatprep.subr.bf16.mxu1 %v999_v29 }
  0x40   : > { %891 = vmatpush3.bf16.msra.mxu0 %v998_v28 }
  0x41   : > { %892 = vmatprep.subr.bf16.mxu0 %v1000_v30 }
  0x42   : > { %929 = vmatpush3.bf16.msra.mxu1 %v999_v29 }
  0x43   : > { %930 = vmatprep.subr.bf16.mxu1 %v1002_v31 }
  0x44   : > { %893 = vmatpush3.bf16.msra.mxu0 %v1001_v34 }
  0x46   : > { %931 = vmatpush3.bf16.msra.mxu1 %v1002_v31 }
  0x47   : > { %575 = vmatmul.mubr.bf16.vlgmr.msra.gmra.mxu0 %v1003_v35 }
  0x48   : > { %582 = vmatprep.mubr.bf16.mxu0 %v1008_v36 }
  0x49   : > { %933 = vmatmul.mubr.bf16.vlgmr.msra.gmra.mxu1 %v1007_v37 }
  0x4f   : > { %583 = vmatmul.mubr.bf16.gmra.mxu0 %v1010_v38 }
 0x107   : > { %v894_v39 = vpop.f32.mrf.mxu0 }
 0x109   : > { %v895_v40 = vpop.f32.mrf.mxu0  ;;  %v934_v41 = vpop.f32.mrf.mxu1 }
 0x10a   : > { %v896_v42 = vadd.f32 %v895_v40, %v894_v39 }
 0x10b   : > { %v897_v43 = vpop.f32.mrf.mxu0  ;;  %v625_v45 = vpop.f32.mrf.mxu1 }
 0x10c   : > { %v626_v46 = vadd.f32 %v896_v42, %v625_v45 }
 0x10d   : > { %v898_v47 = vpop.f32.mrf.mxu0  ;;  %v935_v48 = vpop.f32.mrf.mxu1 }
 0x10e   : > { %v640_v49 = vadd.f32 %v626_v46, %v306_v44  ;;  %v899_v50 = vadd.f32 %v898_v47, %v897_v43 }
 0x10f   : > { %v900_v51 = vpop.f32.mrf.mxu0  ;;  %v628_v53 = vpop.f32.mrf.mxu1 }
 0x110   : > { %644 = vst [vmem:[#allocation2 + $0x10] sm:$0xff] %v640_v49  ;;  %v629_v54 = vadd.f32 %v899_v50, %v628_v53 }
 0x111   : > { %v901_v55 = vpop.f32.mrf.mxu0 }
 0x112   : > { %v641_v56 = vadd.f32 %v629_v54, %v307_v52  ;;  %v902_v57 = vadd.f32 %v901_v55, %v900_v51 }
 0x113   : > { %v903_v59 = vpop.f32.mrf.mxu0 }
 0x114   : > { %645 = vst [vmem:[#allocation2] sm:$0xff] %v641_v56  ;;  %v634_v60 = vadd.f32 %v934_v41, %v902_v57 }
 0x115   : > { %v904_v61 = vpop.f32.mrf.mxu0 }
 0x116   : > { %v642_v62 = vadd.f32 %v634_v60, %v308_v58  ;;  %v905_v63 = vadd.f32 %v904_v61, %v903_v59 }
 0x118   : > { %646 = vst [vmem:[#allocation2 + $0x18] sm:$0xff] %v642_v62  ;;  %v637_v1 = vadd.f32 %v935_v48, %v905_v63  ;;  %651 = sbr.rel (%p852_p11) target bundleno = 299 (0x12b), region = 66 }
 0x11a   : > { %v643_v2 = vadd.f32 %v637_v1, %v309_v0 }
 0x11c   : > { %647 = vst [vmem:[#allocation2 + $0x8] sm:$0xff] %v643_v2 }
 0x11d   : > { %v652_v3 = vld [vmem:[#allocation2 + $0x10] sm:$0xff]  ;;  %v653_v4 = vld [vmem:[#allocation2] sm:$0xff] }
 0x11e   : > { %v853_v5 = vld [vmem:[%s1184_s2] ss:$0 sm:$0xff] }
 0x11f   : > { %v663_v6 = vadd.f32 %v853_v5, %v652_v3  ;;  %v664_v7 = vadd.f32 %v853_v5, %v653_v4  ;;  %v654_v8 = vld [vmem:[#allocation2 + $0x18] sm:$0xff] }
 0x120   : > { %v665_v10 = vadd.f32 %v853_v5, %v654_v8 }
 0x121   : > { %v667_v12 = vmax.f32 %v663_v6, 0.0  ;;  %v668_v13 = vmax.f32 %v664_v7, 0.0 }
 0x122   : > { %v669_v14 = vmax.f32 %v665_v10, 0.0 }
 0x123   : > { %v655_v9 = vld [vmem:[#allocation2 + $0x8] sm:$0xff]  ;;  %v870_v16 = vpack.c.bf16 %v668_v13, %v667_v12 }
 0x124   : > { %v666_v11 = vadd.f32 %v853_v5, %v655_v9 }
 0x125   : > { %871 = vst [vmem:[%s1185_s3] sm:$0xff] %v870_v16  }
 0x126   : > { %v670_v15 = vmax.f32 %v666_v11, 0.0 }
 0x128   : > { %v875_v17 = vpack.c.bf16 %v670_v15, %v669_v14 }
 0x12a   : > { %877 = vst [vmem:[%s1185_s3 + $0x8] sm:$0xff] %v875_v17  }
 0x12b PF: > { %s13_s16 = sadd.s32 1, %s1049_s16   ;;  %s1186_s12 = smov %s1037_s13 }
 0x12c   : > { %p10_p12 = scmp.ge.s32.totalorder %s13_s16, 5   ;;  %s1187_s13 = smov %s1107_s20 }
 0x12d   : > { %s1188_s14 = smov %s1045_s15  ;;  %s1189_s15 = smov %s1191_s17 }
 0x12e   :  { %12 = sbr.rel (!%p10_p12) target bundleno = 3 (0x3), region = 113 }

// kernel: clip_with_labels_forward.40
= control target key start
LH: loop header
LB: loop body
LE: loop exit
PB: predicated region body
PF: predicated region fallthrough
CT: control target
= control target key end

     0   :  { %v234_v1 = vmov 0   ;;  %v34_v18 = vlaneseq  ;;  %v235_v22 = vmov 1966171168   ;;  %s313_s1 = inlined_call_operand.vmem [shape: bf16[128,256], index: 1, kind: input, shape index: {}]   ;;  %s314_s0 = inlined_call_operand.vmem [shape: bf16[2,128], index: 0, kind: input, shape index: {}]   ;;  %s315_s2 = inlined_call_operand.vmem [shape: f32[1,256], index: 2, kind: input, shape index: {}]   ;;  %s316_s3 = inlined_call_operand.vmem [shape: bf16[2,256], index: 3, kind: output, shape index: {}]  }
   0x1   :  { %v210_v0 = vld [vmem:[%s313_s1 + $0x74] ss:$8 sps:$4 sm:$0xff]   ;;  %156 = vmatprep.mubr.bf16.mxu0 %v234_v1  ;;  %v212_v2 = vld [vmem:[%s313_s1 + $0x70] ss:$8 sps:$4 sm:$0xff]   ;;  %v213_v3 = vld [vmem:[%s313_s1 + $0x64] ss:$8 sps:$4 sm:$0xff]   ;;  %v171_v23 = vunpack.c.l.s4 %v235_v22 }
   0x2   :  { %124 = vmatprep.subr.bf16.mxu0 %v210_v0  ;;  %v215_v4 = vld [vmem:[%s313_s1 + $0x60] ss:$8 sps:$4 sm:$0xff]   ;;  %v216_v5 = vld [vmem:[%s313_s1 + $0x54] ss:$8 sps:$4 sm:$0xff]   ;;  %v218_v6 = vld [vmem:[%s313_s1 + $0x50] ss:$8 sps:$4 sm:$0xff]  }
   0x3   :  { %125 = vmatpush1.bf16.msra.mxu0 %v212_v2  ;;  %v219_v7 = vld [vmem:[%s313_s1 + $0x44] ss:$8 sps:$4 sm:$0xff]   ;;  %v221_v8 = vld [vmem:[%s313_s1 + $0x40] ss:$8 sps:$4 sm:$0xff]   ;;  %v222_v9 = vld [vmem:[%s313_s1 + $0x34] ss:$8 sps:$4 sm:$0xff]   ;;  %v172_v27 = vunpack.c.0.s8 %v171_v23 }
   0x4   :  { %126 = vmatprep.subr.bf16.mxu0 %v213_v3  ;;  %v224_v10 = vld [vmem:[%s313_s1 + $0x30] ss:$8 sps:$4 sm:$0xff]   ;;  %v225_v11 = vld [vmem:[%s313_s1 + $0x24] ss:$8 sps:$4 sm:$0xff]   ;;  %v227_v12 = vld [vmem:[%s313_s1 + $0x20] ss:$8 sps:$4 sm:$0xff]  }
   0x5   :  { %v228_v13 = vld [vmem:[%s313_s1 + $0x14] ss:$8 sps:$4 sm:$0xff]   ;;  %v230_v14 = vld [vmem:[%s313_s1 + $0x10] ss:$8 sps:$4 sm:$0xff]   ;;  %v231_v15 = vld [vmem:[%s313_s1 + $0x4] ss:$8 sps:$4 sm:$0xff]  }
   0x6   :  { %v233_v16 = vld [vmem:[%s313_s1] ss:$8 sps:$4 sm:$0xff]   ;;  %v35_v19 = vshrl.u32 %v34_v18, 7 }
   0x7   :  { %127 = vmatpush1.bf16.msra.mxu0 %v215_v4  ;;  %v15_v17 = vld [vmem:[%s314_s0] sm:$0x1] }
   0x8   :  { %128 = vmatprep.subr.bf16.mxu0 %v216_v5  ;;  %v36_v20 = vsub.s32 0, %v35_v19  ;;  %v40_v21 = vsub.s32 1, %v35_v19  ;;  %v32_v24 = vld [vmem:[%s315_s2] sm:$0x3]  ;;  %v175_v32 = vsub.s32 %v172_v27, %v35_v19 }
   0xa   :  { %v37_v25 = vrot.slane %v32_v24, %v36_v20  ;;  %v41_v26 = vrot.slane %v32_v24, %v40_v21 }
   0xb   :  { %129 = vmatpush1.bf16.msra.mxu0 %v218_v6 }
   0xc   :  { %130 = vmatprep.subr.bf16.mxu0 %v219_v7 }
   0xf   :  { %131 = vmatpush1.bf16.msra.mxu0 %v221_v8 }
  0x10   :  { %132 = vmatprep.subr.bf16.mxu0 %v222_v9 }
  0x13   :  { %133 = vmatpush1.bf16.msra.mxu0 %v224_v10 }
  0x14   :  { %134 = vmatprep.subr.bf16.mxu0 %v225_v11 }
  0x17   :  { %135 = vmatpush1.bf16.msra.mxu0 %v227_v12 }
  0x18   :  { %136 = vmatprep.subr.bf16.mxu0 %v228_v13 }
  0x1b   :  { %137 = vmatpush1.bf16.msra.mxu0 %v230_v14 }
  0x1c   :  { %138 = vmatprep.subr.bf16.mxu0 %v231_v15 }
  0x1f   :  { %139 = vmatpush1.bf16.msra.mxu0 %v233_v16 }
  0x22   :  { %157 = vmatmul.mubr.bf16.vlgmr.msra.gmra.mxu0 %v15_v17 }
  0xe2   :  { %v158_v28 = vpop.f32.mrf.mxu0 }
  0xe3   :  { %v159_v30 = vadd.f32 %v158_v28, %v37_v25 }
  0xe4   :  { %v160_v29 = vpop.f32.mrf.mxu0 }
  0xe5   :  { %v161_v31 = vadd.f32 %v160_v29, %v41_v26 }
  0xe6   :  { %v162_v33 = vpop.f32.mrf.mxu0 }
  0xe7   :  { %v206_v34 = vpack.c.bf16 %v161_v31, %v159_v30 }
  0xe8   :  { %v163_v35 = vpop.f32.mrf.mxu0 }
  0xe9   :  { %v176_v36 = vrot.slane %v206_v34, %v175_v32 }
  0xeb   :  { %207 = vst.sshfl [vmem:[%s316_s3] sm:$0x5 pattern:$0x73625140] %v176_v36 }

// kernel: clip_with_labels_forward.39
= control target key start
LH: loop header
LB: loop body
LE: loop exit
PB: predicated region body
PF: predicated region fallthrough
CT: control target
= control target key end

     0   :  { %s866_s12 = smov 0   ;;  %s868_s13 = smov 0   ;;  %s941_s0 = inlined_call_operand.vmem [shape: bf16[8,1152], index: 0, kind: input, shape index: {}]   ;;  %s942_s1 = inlined_call_operand.vmem [shape: bf16[1152,128], index: 1, kind: input, shape index: {}]   ;;  %s943_s2 = inlined_call_operand.vmem [shape: f32[1,128], index: 2, kind: input, shape index: {}]   ;;  %s944_s3 = inlined_call_operand.vmem [shape: bf16[8,128], index: 3, kind: output, shape index: {}]  }
   0x1   :  { %s870_s14 = smov 0  }
   0x2 LB: > { %s25_s15 = sadd.s32 1, %s837_s13  ;;  %p678_p0 = scmp.ge.s32.totalorder %s841_s14, 1  ;;  %s841_s14 = sphi %s870_s14, %s13_s14   ;;  %s837_s13 = sphi %s868_s13, %s946_s13   ;;  %s833_s12 = sphi %s866_s12, %s945_s12  }
   0x3   : > { %p26_p1 = scmp.ge.s32.totalorder %s25_s15, 3  ;;  %p189_p2 = scmp.lt.s32.totalorder %s841_s14, 4 }
   0x5   : > { %s948_s15 = smov (%p26_p1, %s25_s15), 0  ;;  %p190_p3 = pnand %p678_p0, %p189_p2 }
   0x6   : > { %s230_s16 = smul.u32 (!%p190_p3), 3, %s833_s12  ;;  %p681_p6 = scmp.ne.s32.totalorder (!%p190_p3), %s833_s12, 0 }
   0x7   : > { %193 = sbr.rel (%p190_p3) target bundleno = 272 (0x110), region = 32 }
   0x8   : > { %s240_s17 = smul.u32 (!%p190_p3), 48, %s833_s12  ;;  %p233_p4 = scmp.lt.s32.totalorder (!%p190_p3), %s230_s16, 8 }
   0xa   : > { %p241_p5 = scmp.lt.s32.totalorder (!%p190_p3), %s240_s17, 143 }
   0xc   : > { %s950_s16 = smov (!%p233_p4, %s230_s16), 8  ;;  %s952_s17 = smov (!%p241_p5, %s240_s17), 143 }
   0xd   : > { %s679_s18 = sshll.u32 %s950_s16, 2  ;;  %s680_s22 = sshll.u32 %s952_s17, 2 }
   0xe   : > { %s891_s21 = scalar_lea.vmem %s941_s0, %s679_s18  ;;  %s896_s25 = scalar_lea.vmem %s942_s1, %s680_s22 }
   0xf   : > { %263 = sbr.rel (%p681_p6) target bundleno = 22 (0x16), region = 36 }
  0x14   : > { %v843_v0 = vmov 0.0  }
  0x15   : > { %264 = vst [vmem:[#allocation2] sm:$0xff] %v843_v0 }
  0x16 PF: > { %v792_v1 = vld [vmem:[%s896_s25 + $0x78] sm:$0xff]   ;;  %v844_v2 = vmov 0.0   ;;  %vm845_vm0 = vmmov 0   ;;  %v795_v5 = vld [vmem:[%s896_s25 + $0x70] sm:$0xff]   ;;  %v798_v8 = vld [vmem:[%s896_s25 + $0x68] sm:$0xff]   ;;  %p709_p7 = scmp.ne.s32.totalorder %s833_s12, 2 }
  0x17   : > { %745 = vmatprep.subr.bf16.mxu1 %v844_v2  ;;  %v793_v3 = vld [vmem:[%s896_s25 + $0xb8] sm:$0xff]   ;;  %714 = vmatprep.subr.bf16.mxu0 %v792_v1  ;;  %v796_v6 = vld [vmem:[%s896_s25 + $0xb0] sm:$0xff]   ;;  %v799_v9 = vld [vmem:[%s896_s25 + $0xa8] sm:$0xff]  }
  0x18   : > { %v794_v4 = vld [vmem:[%s896_s25 + $0x38] sm:$0xff]   ;;  %761 = vmatprep.mubr.msk.bf16.mxu1 %vm845_vm0, %v844_v2  ;;  %746 = vmatpush3.bf16.msra.mxu1 %v793_v3  ;;  %v797_v7 = vld [vmem:[%s896_s25 + $0x30] sm:$0xff]   ;;  %v800_v10 = vld [vmem:[%s896_s25 + $0x28] sm:$0xff]  }
  0x19   : > { %715 = vmatpush3.bf16.msra.mxu0 %v794_v4  ;;  %747 = vmatprep.subr.bf16.mxu1 %v844_v2  ;;  %v801_v11 = vld [vmem:[%s896_s25 + $0x60] sm:$0xff]   ;;  %v804_v14 = vld [vmem:[%s896_s25 + $0x58] sm:$0xff]   ;;  %v807_v17 = vld [vmem:[%s896_s25 + $0x50] sm:$0xff]  }
  0x1a   : > { %716 = vmatprep.subr.bf16.mxu0 %v795_v5  ;;  %v802_v12 = vld [vmem:[%s896_s25 + $0xa0] sm:$0xff]   ;;  %v805_v15 = vld [vmem:[%s896_s25 + $0x98] sm:$0xff]   ;;  %v808_v18 = vld [vmem:[%s896_s25 + $0x90] sm:$0xff]  }
  0x1b   : > { %v803_v13 = vld [vmem:[%s896_s25 + $0x20] sm:$0xff]   ;;  %v806_v16 = vld [vmem:[%s896_s25 + $0x18] sm:$0xff]   ;;  %v809_v19 = vld [vmem:[%s896_s25 + $0x10] sm:$0xff]  }
  0x1c   : > { %748 = vmatpush3.bf16.msra.mxu1 %v796_v6  ;;  %v810_v20 = vld [vmem:[%s896_s25 + $0x48] sm:$0xff]   ;;  %v266_v23 = vld [vmem:[%s891_s21] sm:$0xff] }
  0x1d   : > { %717 = vmatpush3.bf16.msra.mxu0 %v797_v7  ;;  %749 = vmatprep.subr.bf16.mxu1 %v844_v2  ;;  %v811_v21 = vld [vmem:[%s896_s25 + $0x88] sm:$0xff]   ;;  %v813_v24 = vld [vmem:[%s896_s25 + $0x40] sm:$0xff]   ;;  %v683_v25 = vcombine.high %v266_v23, %v266_v23  ;;  %v682_v29 = vcombine.low %v266_v23, %v266_v23 }
  0x1e   : > { %718 = vmatprep.subr.bf16.mxu0 %v798_v8  ;;  %v812_v22 = vld [vmem:[%s896_s25 + $0x8] sm:$0xff]   ;;  %v814_v26 = vld [vmem:[%s896_s25 + $0x80] sm:$0xff]  }
  0x1f   : > { %503 = vmatprep.mubr.bf16.mxu0 %v683_v25  ;;  %v815_v27 = vld [vmem:[%s896_s25] sm:$0xff]   ;;  %v818_v28 = vld [vmem:[%s891_s21 + $0x8] ss:$0 sps:$4 sm:$0xff]  }
  0x20   : > { %750 = vmatpush3.bf16.msra.mxu1 %v799_v9  ;;  %v265_v36 = vld [vmem:[#allocation2] sm:$0xff] }
  0x21   : > { %719 = vmatpush3.bf16.msra.mxu0 %v800_v10  ;;  %751 = vmatprep.subr.bf16.mxu1 %v844_v2 }
  0x22   : > { %720 = vmatprep.subr.bf16.mxu0 %v801_v11 }
  0x24   : > { %752 = vmatpush3.bf16.msra.mxu1 %v802_v12 }
  0x25   : > { %721 = vmatpush3.bf16.msra.mxu0 %v803_v13  ;;  %753 = vmatprep.subr.bf16.mxu1 %v844_v2 }
  0x26   : > { %722 = vmatprep.subr.bf16.mxu0 %v804_v14 }
  0x28   : > { %754 = vmatpush3.bf16.msra.mxu1 %v805_v15 }
  0x29   : > { %723 = vmatpush3.bf16.msra.mxu0 %v806_v16  ;;  %755 = vmatprep.subr.bf16.mxu1 %v844_v2 }
  0x2a   : > { %724 = vmatprep.subr.bf16.mxu0 %v807_v17 }
  0x2c   : > { %756 = vmatpush3.bf16.msra.mxu1 %v808_v18 }
  0x2d   : > { %725 = vmatpush3.bf16.msra.mxu0 %v809_v19  ;;  %757 = vmatprep.subr.bf16.mxu1 %v844_v2 }
  0x2e   : > { %726 = vmatprep.subr.bf16.mxu0 %v810_v20 }
  0x30   : > { %758 = vmatpush3.bf16.msra.mxu1 %v811_v21 }
  0x31   : > { %727 = vmatpush3.bf16.msra.mxu0 %v812_v22  ;;  %759 = vmatprep.subr.bf16.mxu1 %v844_v2 }
  0x32   : > { %728 = vmatprep.subr.bf16.mxu0 %v813_v24 }
  0x34   : > { %760 = vmatpush3.bf16.msra.mxu1 %v814_v26 }
  0x35   : > { %729 = vmatpush3.bf16.msra.mxu0 %v815_v27 }
  0x37   : > { %762 = vmatmul.mubr.bf16.vlgmr.msra.gmra.mxu1 %v818_v28 }
  0x38   : > { %504 = vmatmul.mubr.bf16.vlgmr.msra.gmra.mxu0 %v682_v29 }
  0xf7   : > { %v545_v30 = vpop.f32.mrf.mxu1 }
  0xf8   : > { %v730_v31 = vpop.f32.mrf.mxu0 }
  0xf9   : > { %v763_v32 = vpop.f32.mrf.mxu1 }
  0xfa   : > { %v731_v33 = vpop.f32.mrf.mxu0 }
  0xfb   : > { %v732_v34 = vadd.f32 %v731_v33, %v730_v31  ;;  %v548_v35 = vpop.f32.mrf.mxu1 }
  0xfc   : > { %v733_v37 = vpop.f32.mrf.mxu0 }
  0xfd   : > { %v546_v38 = vadd.f32 %v732_v34, %v545_v30  ;;  %v764_v39 = vpop.f32.mrf.mxu1  ;;  %556 = sbr.rel (%p709_p7) target bundleno = 272 (0x110), region = 40 }
  0xfe   : > { %v734_v40 = vpop.f32.mrf.mxu0 }
  0xff   : > { %v551_v41 = vadd.f32 %v546_v38, %v265_v36 }
 0x101   : > { %552 = vst [vmem:[#allocation2] sm:$0xff] %v551_v41 }
 0x102   : > { %v710_v43 = vld [vmem:[%s943_s2] ss:$0 sm:$0xff] }
 0x108   : > { %v557_v42 = vld [vmem:[#allocation2] sm:$0xff] }
 0x109   : > { %v565_v44 = vadd.f32 %v710_v43, %v557_v42 }
 0x10b   : > { %v566_v45 = vmax.f32 %v565_v44, 0.0 }
 0x10d   : > { %v567_v46 = vpack.c.bf16 %v566_v45, %v566_v45 }
 0x10f   : > { %568 = vst [vmem:[%s944_s3] sm:$0xf] %v567_v46 }
 0x110 PF: > { %s13_s14 = sadd.s32 1, %s841_s14   ;;  %s945_s12 = smov %s837_s13 }
 0x111   : > { %p10_p8 = scmp.ge.s32.totalorder %s13_s14, 5   ;;  %s946_s13 = smov %s948_s15 }
 0x113   :  { %12 = sbr.rel (!%p10_p8) target bundleno = 2 (0x2), region = 76 }

// kernel: clip_with_labels_forward.41
= control target key start
LH: loop header
LB: loop body
LE: loop exit
PB: predicated region body
PF: predicated region fallthrough
CT: control target
= control target key end

     0   :  { %v255_v1 = vmov 0   ;;  %v37_v18 = vlaneseq  ;;  %v256_v19 = vmov 1983009808   ;;  %v257_v32 = vmov 1966171168   ;;  %s343_s1 = inlined_call_operand.vmem [shape: bf16[128,256], index: 1, kind: input, shape index: {}]   ;;  %s344_s0 = inlined_call_operand.vmem [shape: bf16[2,128], index: 0, kind: input, shape index: {}]   ;;  %s345_s3 = inlined_call_operand.vmem [shape: bf16[2,256], index: 3, kind: input, shape index: {}]   ;;  %s346_s2 = inlined_call_operand.vmem [shape: f32[1,256], index: 2, kind: input, shape index: {}]   ;;  %s347_s4 = inlined_call_operand.vmem [shape: bf16[2,256], index: 4, kind: output, shape index: {}]  }
   0x1   :  { %v231_v0 = vld [vmem:[%s343_s1 + $0x74] ss:$8 sps:$4 sm:$0xff]   ;;  %159 = vmatprep.mubr.bf16.mxu0 %v255_v1  ;;  %v233_v2 = vld [vmem:[%s343_s1 + $0x70] ss:$8 sps:$4 sm:$0xff]   ;;  %v234_v3 = vld [vmem:[%s343_s1 + $0x64] ss:$8 sps:$4 sm:$0xff]   ;;  %v172_v20 = vunpack.c.l.s4 %v256_v19  ;;  %v191_v33 = vunpack.c.l.s4 %v257_v32 }
   0x2   :  { %127 = vmatprep.subr.bf16.mxu0 %v231_v0  ;;  %v236_v4 = vld [vmem:[%s343_s1 + $0x60] ss:$8 sps:$4 sm:$0xff]   ;;  %v237_v5 = vld [vmem:[%s343_s1 + $0x54] ss:$8 sps:$4 sm:$0xff]   ;;  %v239_v6 = vld [vmem:[%s343_s1 + $0x50] ss:$8 sps:$4 sm:$0xff]  }
   0x3   :  { %128 = vmatpush1.bf16.msra.mxu0 %v233_v2  ;;  %v240_v7 = vld [vmem:[%s343_s1 + $0x44] ss:$8 sps:$4 sm:$0xff]   ;;  %v242_v8 = vld [vmem:[%s343_s1 + $0x40] ss:$8 sps:$4 sm:$0xff]   ;;  %v243_v9 = vld [vmem:[%s343_s1 + $0x34] ss:$8 sps:$4 sm:$0xff]   ;;  %v173_v22 = vunpack.c.0.s8 %v172_v20  ;;  %v192_v40 = vunpack.c.0.s8 %v191_v33 }
   0x4   :  { %129 = vmatprep.subr.bf16.mxu0 %v234_v3  ;;  %v245_v10 = vld [vmem:[%s343_s1 + $0x30] ss:$8 sps:$4 sm:$0xff]   ;;  %v246_v11 = vld [vmem:[%s343_s1 + $0x24] ss:$8 sps:$4 sm:$0xff]   ;;  %v248_v12 = vld [vmem:[%s343_s1 + $0x20] ss:$8 sps:$4 sm:$0xff]  }
   0x5   :  { %v249_v13 = vld [vmem:[%s343_s1 + $0x14] ss:$8 sps:$4 sm:$0xff]   ;;  %v251_v14 = vld [vmem:[%s343_s1 + $0x10] ss:$8 sps:$4 sm:$0xff]   ;;  %v252_v15 = vld [vmem:[%s343_s1 + $0x4] ss:$8 sps:$4 sm:$0xff]  }
   0x6   :  { %v254_v16 = vld [vmem:[%s343_s1] ss:$8 sps:$4 sm:$0xff]   ;;  %v38_v21 = vshrl.u32 %v37_v18, 7 }
   0x7   :  { %130 = vmatpush1.bf16.msra.mxu0 %v236_v4  ;;  %v18_v17 = vld [vmem:[%s344_s0] sm:$0x1] }
   0x8   :  { %131 = vmatprep.subr.bf16.mxu0 %v237_v5  ;;  %v168_v23 = vld [vmem:[%s345_s3] sm:$0x3]  ;;  %v39_v24 = vsub.s32 0, %v38_v21  ;;  %v176_v26 = vsub.s32 %v173_v22, %v38_v21  ;;  %v43_v28 = vsub.s32 1, %v38_v21  ;;  %v195_v46 = vsub.s32 %v192_v40, %v38_v21 }
   0x9   :  { %v169_v25 = vunpack.c.l.bf16 %v168_v23  ;;  %v35_v27 = vld [vmem:[%s346_s2] sm:$0x3] }
   0xa   :  { %v40_v29 = vrot.slane %v35_v27, %v39_v24  ;;  %v44_v31 = vrot.slane %v35_v27, %v43_v28 }
   0xb   :  { %132 = vmatpush1.bf16.msra.mxu0 %v239_v6  ;;  %v177_v30 = vrot.slane %v169_v25, %v176_v26 }
   0xc   :  { %133 = vmatprep.subr.bf16.mxu0 %v240_v7 }
   0xd   :  { %v178_v36 = vcombine.high %v177_v30, %v177_v30 }
   0xf   :  { %134 = vmatpush1.bf16.msra.mxu0 %v242_v8 }
  0x10   :  { %135 = vmatprep.subr.bf16.mxu0 %v243_v9 }
  0x13   :  { %136 = vmatpush1.bf16.msra.mxu0 %v245_v10 }
  0x14   :  { %137 = vmatprep.subr.bf16.mxu0 %v246_v11 }
  0x17   :  { %138 = vmatpush1.bf16.msra.mxu0 %v248_v12 }
  0x18   :  { %139 = vmatprep.subr.bf16.mxu0 %v249_v13 }
  0x1b   :  { %140 = vmatpush1.bf16.msra.mxu0 %v251_v14 }
  0x1c   :  { %141 = vmatprep.subr.bf16.mxu0 %v252_v15 }
  0x1f   :  { %142 = vmatpush1.bf16.msra.mxu0 %v254_v16 }
  0x22   :  { %160 = vmatmul.mubr.bf16.vlgmr.msra.gmra.mxu0 %v18_v17 }
  0xe2   :  { %v161_v34 = vpop.f32.mrf.mxu0 }
  0xe3   :  { %v162_v35 = vadd.f32 %v161_v34, %v40_v29 }
  0xe4   :  { %v163_v37 = vpop.f32.mrf.mxu0 }
  0xe5   :  { %v181_v38 = vadd.f32 %v177_v30, %v162_v35  ;;  %v164_v39 = vadd.f32 %v163_v37, %v44_v31 }
  0xe6   :  { %v165_v41 = vpop.f32.mrf.mxu0 }
  0xe7   :  { %v182_v42 = vadd.f32 %v178_v36, %v164_v39  ;;  %v183_v44 = vmax.f32 %v181_v38, 0.0 }
  0xe8   :  { %v166_v43 = vpop.f32.mrf.mxu0 }
  0xe9   :  { %v184_v45 = vmax.f32 %v182_v42, 0.0 }
  0xeb   :  { %v226_v47 = vpack.c.bf16 %v184_v45, %v183_v44 }
  0xed   :  { %v196_v48 = vrot.slane %v226_v47, %v195_v46 }
  0xef   :  { %227 = vst.sshfl [vmem:[%s347_s4] sm:$0x5 pattern:$0x73625140] %v196_v48 }

// kernel: clip_with_labels_forward.42
= control target key start
LH: loop header
LB: loop body
LE: loop exit
PB: predicated region body
PF: predicated region fallthrough
CT: control target
= control target key end

     0   :  { %v49_v9 = vlaneseq  ;;  %v394_v10 = vmov 1966171168   ;;  %s520_s1 = inlined_call_operand.vmem [shape: bf16[256,256], index: 1, kind: input, shape index: {}]   ;;  %s521_s0 = inlined_call_operand.vmem [shape: bf16[2,256], index: 0, kind: input, shape index: {}]   ;;  %s522_s2 = inlined_call_operand.vmem [shape: f32[1,256], index: 2, kind: input, shape index: {}]   ;;  %s523_s3 = inlined_call_operand.vmem [shape: bf16[2,256], index: 3, kind: output, shape index: {}]  }
   0x1   :  { %v346_v0 = vld [vmem:[%s520_s1 + $0x74] ss:$8 sps:$4 sm:$0xff]   ;;  %v348_v1 = vld [vmem:[%s520_s1 + $0x70] ss:$8 sps:$4 sm:$0xff]   ;;  %v349_v2 = vld [vmem:[%s520_s1 + $0x64] ss:$8 sps:$4 sm:$0xff]   ;;  %v69_v11 = vunpack.c.l.s4 %v394_v10 }
   0x2   :  { %244 = vmatprep.subr.bf16.mxu0 %v346_v0  ;;  %v351_v3 = vld [vmem:[%s520_s1 + $0x60] ss:$8 sps:$4 sm:$0xff]   ;;  %v352_v4 = vld [vmem:[%s520_s1 + $0x54] ss:$8 sps:$4 sm:$0xff]   ;;  %v354_v5 = vld [vmem:[%s520_s1 + $0x50] ss:$8 sps:$4 sm:$0xff]  }
   0x3   :  { %245 = vmatpush1.bf16.msra.mxu0 %v348_v1  ;;  %v355_v6 = vld [vmem:[%s520_s1 + $0x44] ss:$8 sps:$4 sm:$0xff]   ;;  %v357_v7 = vld [vmem:[%s520_s1 + $0x40] ss:$8 sps:$4 sm:$0xff]   ;;  %v358_v8 = vld [vmem:[%s520_s1 + $0x34] ss:$8 sps:$4 sm:$0xff]   ;;  %v70_v15 = vunpack.c.0.s8 %v69_v11 }
   0x4   :  { %246 = vmatprep.subr.bf16.mxu0 %v349_v2  ;;  %v360_v12 = vld [vmem:[%s520_s1 + $0x30] ss:$8 sps:$4 sm:$0xff]   ;;  %v361_v13 = vld [vmem:[%s520_s1 + $0x24] ss:$8 sps:$4 sm:$0xff]   ;;  %v50_v14 = vshrl.u32 %v49_v9, 7 }
   0x5   :  { %v363_v16 = vld [vmem:[%s520_s1 + $0x20] ss:$8 sps:$4 sm:$0xff]   ;;  %v364_v17 = vld [vmem:[%s520_s1 + $0x14] ss:$8 sps:$4 sm:$0xff]   ;;  %v366_v21 = vld [vmem:[%s520_s1 + $0x10] ss:$8 sps:$4 sm:$0xff]  }
   0x6   :  { %v73_v18 = vsub.s32 %v70_v15, %v50_v14  ;;  %v310_v19 = vld.sshfl [vmem:[%s521_s0] sm:$0x11 pattern:$0x75316420]  ;;  %v367_v22 = vld [vmem:[%s520_s1 + $0x4] ss:$8 sps:$4 sm:$0xff]  }
   0x7   :  { %247 = vmatpush1.bf16.msra.mxu0 %v351_v3  ;;  %v67_v20 = vcombine.high %v310_v19, %v310_v19  ;;  %v369_v24 = vld [vmem:[%s520_s1] ss:$8 sps:$4 sm:$0xff]   ;;  %v370_v25 = vld [vmem:[%s520_s1 + $0xf4] ss:$8 sps:$4 sm:$0xff]   ;;  %v372_v26 = vld [vmem:[%s520_s1 + $0xf0] ss:$8 sps:$4 sm:$0xff]  }
   0x8   :  { %248 = vmatprep.subr.bf16.mxu0 %v352_v4  ;;  %v373_v27 = vld [vmem:[%s520_s1 + $0xe4] ss:$8 sps:$4 sm:$0xff]   ;;  %v375_v28 = vld [vmem:[%s520_s1 + $0xe0] ss:$8 sps:$4 sm:$0xff]   ;;  %v376_v29 = vld [vmem:[%s520_s1 + $0xd4] ss:$8 sps:$4 sm:$0xff]   ;;  %v74_v41 = vrot.slane %v310_v19, %v73_v18 }
   0x9   :  { %v81_v23 = vrot.slane %v67_v20, %v73_v18  ;;  %v378_v30 = vld [vmem:[%s520_s1 + $0xd0] ss:$8 sps:$4 sm:$0xff]   ;;  %v379_v31 = vld [vmem:[%s520_s1 + $0xc4] ss:$8 sps:$4 sm:$0xff]   ;;  %v381_v32 = vld [vmem:[%s520_s1 + $0xc0] ss:$8 sps:$4 sm:$0xff]  }
   0xa   :  { %v382_v33 = vld [vmem:[%s520_s1 + $0xb4] ss:$8 sps:$4 sm:$0xff]   ;;  %v384_v34 = vld [vmem:[%s520_s1 + $0xb0] ss:$8 sps:$4 sm:$0xff]   ;;  %v385_v35 = vld [vmem:[%s520_s1 + $0xa4] ss:$8 sps:$4 sm:$0xff]  }
   0xb   :  { %249 = vmatpush1.bf16.msra.mxu0 %v354_v5  ;;  %276 = vmatprep.mubr.bf16.mxu0 %v81_v23  ;;  %v387_v36 = vld [vmem:[%s520_s1 + $0xa0] ss:$8 sps:$4 sm:$0xff]   ;;  %v388_v37 = vld [vmem:[%s520_s1 + $0x94] ss:$8 sps:$4 sm:$0xff]   ;;  %v390_v38 = vld [vmem:[%s520_s1 + $0x90] ss:$8 sps:$4 sm:$0xff]  }
   0xc   :  { %250 = vmatprep.subr.bf16.mxu0 %v355_v6  ;;  %v391_v39 = vld [vmem:[%s520_s1 + $0x84] ss:$8 sps:$4 sm:$0xff]   ;;  %v393_v40 = vld [vmem:[%s520_s1 + $0x80] ss:$8 sps:$4 sm:$0xff]   ;;  %v51_v42 = vsub.s32 0, %v50_v14  ;;  %v55_v43 = vsub.s32 1, %v50_v14 }
   0xd   :  { %v47_v44 = vld [vmem:[%s522_s2] sm:$0x3] }
   0xe   :  { %v52_v45 = vrot.slane %v47_v44, %v51_v42  ;;  %v56_v46 = vrot.slane %v47_v44, %v55_v43 }
   0xf   :  { %251 = vmatpush1.bf16.msra.mxu0 %v357_v7 }
  0x10   :  { %252 = vmatprep.subr.bf16.mxu0 %v358_v8 }
  0x13   :  { %253 = vmatpush1.bf16.msra.mxu0 %v360_v12 }
  0x14   :  { %254 = vmatprep.subr.bf16.mxu0 %v361_v13 }
  0x17   :  { %255 = vmatpush1.bf16.msra.mxu0 %v363_v16 }
  0x18   :  { %256 = vmatprep.subr.bf16.mxu0 %v364_v17 }
  0x1b   :  { %257 = vmatpush1.bf16.msra.mxu0 %v366_v21 }
  0x1c   :  { %258 = vmatprep.subr.bf16.mxu0 %v367_v22 }
  0x1f   :  { %259 = vmatpush1.bf16.msra.mxu0 %v369_v24 }
  0x20   :  { %260 = vmatprep.subr.bf16.mxu0 %v370_v25 }
  0x23   :  { %261 = vmatpush2.bf16.msra.mxu0 %v372_v26 }
  0x24   :  { %262 = vmatprep.subr.bf16.mxu0 %v373_v27 }
  0x27   :  { %263 = vmatpush2.bf16.msra.mxu0 %v375_v28 }
  0x28   :  { %264 = vmatprep.subr.bf16.mxu0 %v376_v29 }
  0x2b   :  { %265 = vmatpush2.bf16.msra.mxu0 %v378_v30 }
  0x2c   :  { %266 = vmatprep.subr.bf16.mxu0 %v379_v31 }
  0x2f   :  { %267 = vmatpush2.bf16.msra.mxu0 %v381_v32 }
  0x30   :  { %268 = vmatprep.subr.bf16.mxu0 %v382_v33 }
  0x33   :  { %269 = vmatpush2.bf16.msra.mxu0 %v384_v34 }
  0x34   :  { %270 = vmatprep.subr.bf16.mxu0 %v385_v35 }
  0x37   :  { %271 = vmatpush2.bf16.msra.mxu0 %v387_v36 }
  0x38   :  { %272 = vmatprep.subr.bf16.mxu0 %v388_v37 }
  0x3b   :  { %273 = vmatpush2.bf16.msra.mxu0 %v390_v38 }
  0x3c   :  { %274 = vmatprep.subr.bf16.mxu0 %v391_v39 }
  0x3f   :  { %275 = vmatpush2.bf16.msra.mxu0 %v393_v40 }
  0x42   :  { %277 = vmatmul.mubr.bf16.vlgmr.msra.gmra.mxu0 %v74_v41 }
 0x102   :  { %v278_v47 = vpop.f32.mrf.mxu0 }
 0x103   :  { %v279_v49 = vadd.f32 %v278_v47, %v52_v45 }
 0x104   :  { %v280_v48 = vpop.f32.mrf.mxu0 }
 0x105   :  { %v281_v50 = vadd.f32 %v280_v48, %v56_v46 }
 0x106   :  { %v282_v51 = vpop.f32.mrf.mxu0 }
 0x107   :  { %v343_v52 = vpack.c.bf16 %v281_v50, %v279_v49 }
 0x108   :  { %v283_v53 = vpop.f32.mrf.mxu0 }
 0x109   :  { %v296_v54 = vrot.slane %v343_v52, %v73_v18 }
 0x10b   :  { %344 = vst.sshfl [vmem:[%s523_s3] sm:$0x5 pattern:$0x73625140] %v296_v54 }

// kernel: clip_with_labels_forward.44
= control target key start
LH: loop header
LB: loop body
LE: loop exit
PB: predicated region body
PF: predicated region fallthrough
CT: control target
= control target key end

     0   :  { %v279_v6 = vmov 1966171168   ;;  %v67_v8 = vlaneseq  ;;  %s357_s1 = inlined_call_operand.vmem [shape: bf16[256,128], index: 1, kind: input, shape index: {}]   ;;  %s358_s0 = inlined_call_operand.vmem [shape: bf16[2,256], index: 0, kind: input, shape index: {}]   ;;  %s359_s2 = inlined_call_operand.vmem [shape: f32[1,128], index: 2, kind: input, shape index: {}]   ;;  %s360_s3 = inlined_call_operand.vmem [shape: bf16[2,128], index: 3, kind: output, shape index: {}]  }
   0x1   :  { %v263_v0 = vld [vmem:[%s357_s1 + $0x78] sm:$0xff]   ;;  %v265_v2 = vld [vmem:[%s357_s1 + $0x70] sm:$0xff]   ;;  %v267_v4 = vld [vmem:[%s357_s1 + $0x68] sm:$0xff]   ;;  %v65_v7 = vunpack.c.l.s4 %v279_v6 }
   0x2   :  { %v264_v1 = vld [vmem:[%s357_s1 + $0x38] sm:$0xff]   ;;  %240 = vmatprep.subr.bf16.mxu0 %v263_v0  ;;  %v266_v3 = vld [vmem:[%s357_s1 + $0x30] sm:$0xff]   ;;  %v268_v5 = vld [vmem:[%s357_s1 + $0x28] sm:$0xff]   ;;  %v68_v12 = vshrl.u32 %v67_v8, 7 }
   0x3   :  { %241 = vmatpush3.bf16.msra.mxu0 %v264_v1  ;;  %v269_v9 = vld [vmem:[%s357_s1 + $0x60] sm:$0xff]   ;;  %v66_v11 = vunpack.c.0.s8 %v65_v7  ;;  %v271_v13 = vld [vmem:[%s357_s1 + $0x58] sm:$0xff]   ;;  %v273_v16 = vld [vmem:[%s357_s1 + $0x50] sm:$0xff]  }
   0x4   :  { %242 = vmatprep.subr.bf16.mxu0 %v265_v2  ;;  %v270_v10 = vld [vmem:[%s357_s1 + $0x20] sm:$0xff]   ;;  %v272_v14 = vld [vmem:[%s357_s1 + $0x18] sm:$0xff]   ;;  %v274_v19 = vld [vmem:[%s357_s1 + $0x10] sm:$0xff]  }
   0x5   :  { %v69_v15 = vsub.s32 %v66_v11, %v68_v12  ;;  %v223_v17 = vld.sshfl [vmem:[%s358_s0] sm:$0x11 pattern:$0x75316420]  ;;  %v275_v21 = vld [vmem:[%s357_s1 + $0x48] sm:$0xff]  }
   0x6   :  { %v63_v18 = vcombine.high %v223_v17, %v223_v17  ;;  %v276_v22 = vld [vmem:[%s357_s1 + $0x8] sm:$0xff]   ;;  %v277_v23 = vld [vmem:[%s357_s1 + $0x40] sm:$0xff]  }
   0x7   :  { %243 = vmatpush3.bf16.msra.mxu0 %v266_v3  ;;  %v278_v24 = vld [vmem:[%s357_s1] sm:$0xff]   ;;  %v70_v25 = vrot.slane %v223_v17, %v69_v15 }
   0x8   :  { %244 = vmatprep.subr.bf16.mxu0 %v267_v4  ;;  %v77_v20 = vrot.slane %v63_v18, %v69_v15  ;;  %v222_v27 = vld [vmem:[%s359_s2] ss:$0 sm:$0xff] }
   0xa   :  { %208 = vmatprep.mubr.bf16.mxu0 %v77_v20 }
   0xb   :  { %245 = vmatpush3.bf16.msra.mxu0 %v268_v5 }
   0xc   :  { %246 = vmatprep.subr.bf16.mxu0 %v269_v9 }
   0xf   :  { %247 = vmatpush3.bf16.msra.mxu0 %v270_v10 }
  0x10   :  { %248 = vmatprep.subr.bf16.mxu0 %v271_v13 }
  0x13   :  { %249 = vmatpush3.bf16.msra.mxu0 %v272_v14 }
  0x14   :  { %250 = vmatprep.subr.bf16.mxu0 %v273_v16 }
  0x17   :  { %251 = vmatpush3.bf16.msra.mxu0 %v274_v19 }
  0x18   :  { %252 = vmatprep.subr.bf16.mxu0 %v275_v21 }
  0x1b   :  { %253 = vmatpush3.bf16.msra.mxu0 %v276_v22 }
  0x1c   :  { %254 = vmatprep.subr.bf16.mxu0 %v277_v23 }
  0x1f   :  { %255 = vmatpush3.bf16.msra.mxu0 %v278_v24 }
  0x22   :  { %209 = vmatmul.mubr.bf16.vlgmr.msra.gmra.mxu0 %v70_v25 }
  0xe2   :  { %v256_v26 = vpop.f32.mrf.mxu0 }
  0xe4   :  { %v257_v28 = vpop.f32.mrf.mxu0 }
  0xe5   :  { %v258_v29 = vadd.f32 %v257_v28, %v256_v26 }
  0xe6   :  { %v259_v30 = vpop.f32.mrf.mxu0 }
  0xe7   :  { %v211_v31 = vadd.f32 %v258_v29, %v222_v27 }
  0xe8   :  { %v260_v32 = vpop.f32.mrf.mxu0 }
  0xe9   :  { %v216_v33 = vpack.c.bf16 %v211_v31, %v211_v31 }
  0xeb   :  { %217 = vst [vmem:[%s360_s3] sm:$0x1] %v216_v33 }

// kernel: clip_with_labels_forward.45
= control target key start
LH: loop header
LB: loop body
LE: loop exit
PB: predicated region body
PF: predicated region fallthrough
CT: control target
= control target key end

     0   :  { %v215_v2 = vmov 0.0   ;;  %vm16_vm0 = vcmask 1041408   ;;  %s263_s0 = inlined_call_operand.vmem [shape: bf16[2,128], index: 0, kind: input, shape index: {}]   ;;  %s264_s1 = inlined_call_operand.vmem [shape: bf16[128,128], index: 1, kind: input, shape index: {}]   ;;  %s265_s2 = inlined_call_operand.hbm [shape: f32[2,128], index: 2, kind: output, shape index: {}]  }
   0x1   :  { %v13_v0 = vld [vmem:[%s263_s0] sm:$0x1]  ;;  %160 = vmatprep.subr.bf16.mxu0 %v215_v2  ;;  %v183_v3 = vld [vmem:[%s264_s1 + $0x38] sm:$0xff]   ;;  %v184_v5 = vld [vmem:[%s264_s1 + $0x30] sm:$0xff]  }
   0x2   :  { %v14_v1 = vunpack.c.l.bf16 %v13_v0  ;;  %161 = vmatpush3.bf16.msra.mxu0 %v183_v3  ;;  %v185_v7 = vld [vmem:[%s264_s1 + $0x28] sm:$0xff]  }
   0x3   :  { %162 = vmatprep.subr.bf16.mxu0 %v215_v2 }
   0x4   :  { %v15_v4 = vmul.f32 %v14_v1, %v14_v1 }
   0x6   :  { %v17_v6 = vsel %vm16_vm0, %v15_v4, 0.0  ;;  %163 = vmatpush3.bf16.msra.mxu0 %v184_v5 }
   0x7   :  { %18 = vadd.xlane.f32.xlu0 %v17_v6 }
   0x8   :  { %7 = vsyncpa [#allocation3], 0  ;;  %164 = vmatprep.subr.bf16.mxu0 %v215_v2  ;;  %v186_v8 = vld [vmem:[%s264_s1 + $0x20] sm:$0xff]   ;;  %v187_v9 = vld [vmem:[%s264_s1 + $0x18] sm:$0xff]   ;;  %vm216_vm1 = vmmov 0   ;;  %s217_s26 = smov [#allocation2]  }
   0x9   :  { %176 = vmatprep.mubr.msk.bf16.mxu0 %vm216_vm1, %v215_v2  ;;  %v188_v10 = vld [vmem:[%s264_s1 + $0x10] sm:$0xff]   ;;  %v189_v11 = vld [vmem:[%s264_s1 + $0x8] sm:$0xff]   ;;  %v190_v12 = vld [vmem:[%s264_s1] sm:$0xff]   ;;  %s135_s27 = sshll.u32 %s217_s26, 4  ;;  %s136_s27 = int_to_ptr.vmem [resolvable:$true] %s135_s27 }
   0xa   :  { %165 = vmatpush3.bf16.msra.mxu0 %v185_v7  ;;  %s193_s28 = scalar_lea.vmem %s136_s27, 32  ;;  %p198_p1 = scmp.lt.s32.totalorder %s136_s27, %s136_s27 }
   0xb   :  { %166 = vmatprep.subr.bf16.mxu0 %v215_v2  ;;  %p194_p0 = scmp.ne.s32.totalorder %s136_s27, %s193_s28  ;;  %p199_p2 = scmp.lt.s32.totalorder %s193_s28, %s193_s28 }
   0xd   :  { %p200_p3 = por %p199_p2, %p198_p1 }
   0xe   :  { %167 = vmatpush3.bf16.msra.mxu0 %v186_v8 }
   0xf   :  { %168 = vmatprep.subr.bf16.mxu0 %v215_v2  ;;  %p201_p4 = pnand %p200_p3, %p194_p0 }
  0x12   :  { %169 = vmatpush3.bf16.msra.mxu0 %v187_v9 }
  0x13   :  { %170 = vmatprep.subr.bf16.mxu0 %v215_v2 }
  0x16   :  { %171 = vmatpush3.bf16.msra.mxu0 %v188_v10 }
  0x17   :  { %172 = vmatprep.subr.bf16.mxu0 %v215_v2 }
  0x1a   :  { %173 = vmatpush3.bf16.msra.mxu0 %v189_v11 }
  0x1b   :  { %174 = vmatprep.subr.bf16.mxu0 %v215_v2 }
  0x1e   :  { %175 = vmatpush3.bf16.msra.mxu0 %v190_v12 }
  0x90   :  { %v19_v13 = vpop.xlane.xlu0 %18 }
  0x91   :  { %v20_v14 = vadd.f32 1e-12, %v19_v13 }
  0x93   :  { %191 = vrsqrt.f32 %v20_v14 }
  0xa0   :  { %v192_v15 = vpop.eup %191 }
  0xa1   :  { %v22_v16 = vmul.f32 %v192_v15, %v14_v1 }
  0xa3   :  { %v23_v17 = vpack.c.bf16 %v22_v16, %v22_v16 }
  0xa5   :  { %177 = vmatmul.mubr.bf16.vlgmr.msra.gmra.mxu0 %v23_v17 }
 0x165   :  { %v122_v18 = vpop.f32.mrf.mxu0 }
 0x166   :  { %128 = vst [vmem:[#allocation2] sm:$0x3] %v122_v18 }
 0x167   :  { %v178_v19 = vpop.f32.mrf.mxu0 }
 0x168   :  { %204 = shalt.err (!%p201_p4)
}
 0x169   :  { %138 = dma.vmem_to_hbm [thread:$0]  %s136_s27, 32, %s265_s2, [#allocation3]   ;;  %v125_v20 = vpop.f32.mrf.mxu0 }
 0x16b   :  { %v179_v21 = vpop.f32.mrf.mxu0 }
 0x16c   :  { %213 = dma.done.wait [#allocation3], 32  }
 0x16d   :  { %214 = vsyncadd [#allocation3], 4294967264 }
 0x16e   :  { %142 = vsyncpa [#allocation3], 1 }

// kernel: clip_with_labels_forward.43
= control target key start
LH: loop header
LB: loop body
LE: loop exit
PB: predicated region body
PF: predicated region fallthrough
CT: control target
= control target key end

     0   :  { %s931_s1 = inlined_call_operand.vmem [shape: bf16[256,512], index: 1, kind: input, shape index: {}]   ;;  %s932_s0 = inlined_call_operand.vmem [shape: bf16[4,256], index: 0, kind: input, shape index: {}]   ;;  %s933_s2 = inlined_call_operand.vmem [shape: f32[1,512], index: 2, kind: input, shape index: {}]   ;;  %s934_s3 = inlined_call_operand.vmem [shape: bf16[4,512], index: 3, kind: output, shape index: {}]  }
   0x1   :  { %v613_v0 = vld [vmem:[%s931_s1 + $0xe4] ss:$16 sps:$4 sm:$0xff]   ;;  %v615_v1 = vld [vmem:[%s931_s1 + $0xec] ss:$16 sps:$4 sm:$0xff]   ;;  %v617_v2 = vld [vmem:[%s931_s1 + $0xe0] ss:$16 sps:$4 sm:$0xff]  }
   0x2   :  { %432 = vmatprep.subr.bf16.mxu0 %v613_v0  ;;  %v618_v3 = vld [vmem:[%s931_s1 + $0xe8] ss:$16 sps:$4 sm:$0xff]   ;;  %473 = vmatprep.subr.bf16.mxu1 %v615_v1  ;;  %v619_v4 = vld [vmem:[%s931_s1 + $0xc4] ss:$16 sps:$4 sm:$0xff]   ;;  %v621_v5 = vld [vmem:[%s931_s1 + $0xcc] ss:$16 sps:$4 sm:$0xff]  }
   0x3   :  { %433 = vmatpush1.bf16.msra.mxu0 %v617_v2  ;;  %474 = vmatpush1.bf16.msra.mxu1 %v618_v3  ;;  %v623_v6 = vld [vmem:[%s931_s1 + $0xc0] ss:$16 sps:$4 sm:$0xff]   ;;  %v624_v7 = vld [vmem:[%s931_s1 + $0xc8] ss:$16 sps:$4 sm:$0xff]   ;;  %v625_v8 = vld [vmem:[%s931_s1 + $0xa4] ss:$16 sps:$4 sm:$0xff]   ;;  %v81_v2 = vlaneseq }
   0x4   :  { %434 = vmatprep.subr.bf16.mxu0 %v619_v4  ;;  %475 = vmatprep.subr.bf16.mxu1 %v621_v5  ;;  %v627_v9 = vld [vmem:[%s931_s1 + $0xac] ss:$16 sps:$4 sm:$0xff]   ;;  %v629_v10 = vld [vmem:[%s931_s1 + $0xa0] ss:$16 sps:$4 sm:$0xff]   ;;  %v630_v11 = vld [vmem:[%s931_s1 + $0xa8] ss:$16 sps:$4 sm:$0xff]  }
   0x5   :  { %v631_v12 = vld [vmem:[%s931_s1 + $0x84] ss:$16 sps:$4 sm:$0xff]   ;;  %v633_v13 = vld [vmem:[%s931_s1 + $0x8c] ss:$16 sps:$4 sm:$0xff]   ;;  %v635_v14 = vld [vmem:[%s931_s1 + $0x80] ss:$16 sps:$4 sm:$0xff]  }
   0x6   :  { %v636_v15 = vld [vmem:[%s931_s1 + $0x88] ss:$16 sps:$4 sm:$0xff]   ;;  %v637_v16 = vld [vmem:[%s931_s1 + $0x64] ss:$16 sps:$4 sm:$0xff]   ;;  %v639_v17 = vld [vmem:[%s931_s1 + $0x6c] ss:$16 sps:$4 sm:$0xff]  }
   0x7   :  { %435 = vmatpush1.bf16.msra.mxu0 %v623_v6  ;;  %476 = vmatpush1.bf16.msra.mxu1 %v624_v7  ;;  %v641_v18 = vld [vmem:[%s931_s1 + $0x60] ss:$16 sps:$4 sm:$0xff]   ;;  %v642_v19 = vld [vmem:[%s931_s1 + $0x68] ss:$16 sps:$4 sm:$0xff]   ;;  %v643_v20 = vld [vmem:[%s931_s1 + $0x44] ss:$16 sps:$4 sm:$0xff]  }
   0x8   :  { %436 = vmatprep.subr.bf16.mxu0 %v625_v8  ;;  %477 = vmatprep.subr.bf16.mxu1 %v627_v9  ;;  %v645_v21 = vld [vmem:[%s931_s1 + $0x4c] ss:$16 sps:$4 sm:$0xff]   ;;  %v647_v22 = vld [vmem:[%s931_s1 + $0x40] ss:$16 sps:$4 sm:$0xff]   ;;  %v648_v23 = vld [vmem:[%s931_s1 + $0x48] ss:$16 sps:$4 sm:$0xff]  }
   0x9   :  { %v649_v24 = vld [vmem:[%s931_s1 + $0x24] ss:$16 sps:$4 sm:$0xff]   ;;  %v651_v25 = vld [vmem:[%s931_s1 + $0x2c] ss:$16 sps:$4 sm:$0xff]   ;;  %v653_v26 = vld [vmem:[%s931_s1 + $0x20] ss:$16 sps:$4 sm:$0xff]  }
   0xa   :  { %v654_v27 = vld [vmem:[%s931_s1 + $0x28] ss:$16 sps:$4 sm:$0xff]   ;;  %v655_v28 = vld [vmem:[%s931_s1 + $0x4] ss:$16 sps:$4 sm:$0xff]   ;;  %v657_v29 = vld [vmem:[%s931_s1 + $0xc] ss:$16 sps:$4 sm:$0xff]  }
   0xb   :  { %437 = vmatpush1.bf16.msra.mxu0 %v629_v10  ;;  %478 = vmatpush1.bf16.msra.mxu1 %v630_v11  ;;  %v659_v30 = vld [vmem:[%s931_s1] ss:$16 sps:$4 sm:$0xff]   ;;  %v660_v31 = vld [vmem:[%s931_s1 + $0x8] ss:$16 sps:$4 sm:$0xff]   ;;  %v661_v32 = vld [vmem:[%s931_s1 + $0x1e4] ss:$16 sps:$4 sm:$0xff]  }
   0xc   :  { %438 = vmatprep.subr.bf16.mxu0 %v631_v12  ;;  %479 = vmatprep.subr.bf16.mxu1 %v633_v13  ;;  %v663_v33 = vld [vmem:[%s931_s1 + $0x1ec] ss:$16 sps:$4 sm:$0xff]   ;;  %v665_v34 = vld [vmem:[%s931_s1 + $0x1e0] ss:$16 sps:$4 sm:$0xff]   ;;  %v666_v35 = vld [vmem:[%s931_s1 + $0x1e8] ss:$16 sps:$4 sm:$0xff]  }
   0xd   :  { %v667_v36 = vld [vmem:[%s931_s1 + $0x1c4] ss:$16 sps:$4 sm:$0xff]   ;;  %v669_v37 = vld [vmem:[%s931_s1 + $0x1cc] ss:$16 sps:$4 sm:$0xff]   ;;  %v671_v38 = vld [vmem:[%s931_s1 + $0x1c0] ss:$16 sps:$4 sm:$0xff]  }
   0xe   :  { %v672_v39 = vld [vmem:[%s931_s1 + $0x1c8] ss:$16 sps:$4 sm:$0xff]   ;;  %v673_v40 = vld [vmem:[%s931_s1 + $0x1a4] ss:$16 sps:$4 sm:$0xff]   ;;  %v675_v41 = vld [vmem:[%s931_s1 + $0x1ac] ss:$16 sps:$4 sm:$0xff]  }
   0xf   :  { %439 = vmatpush1.bf16.msra.mxu0 %v635_v14  ;;  %480 = vmatpush1.bf16.msra.mxu1 %v636_v15  ;;  %v677_v42 = vld [vmem:[%s931_s1 + $0x1a0] ss:$16 sps:$4 sm:$0xff]   ;;  %v678_v43 = vld [vmem:[%s931_s1 + $0x1a8] ss:$16 sps:$4 sm:$0xff]   ;;  %v679_v44 = vld [vmem:[%s931_s1 + $0x184] ss:$16 sps:$4 sm:$0xff]  }
  0x10   :  { %440 = vmatprep.subr.bf16.mxu0 %v637_v16  ;;  %481 = vmatprep.subr.bf16.mxu1 %v639_v17  ;;  %v681_v45 = vld [vmem:[%s931_s1 + $0x18c] ss:$16 sps:$4 sm:$0xff]   ;;  %v545_v46 = vld.sshfl [vmem:[%s932_s0] sm:$0x33 pattern:$0x76325410] }
  0x11   :  { %v683_v47 = vld [vmem:[%s931_s1 + $0x180] ss:$16 sps:$4 sm:$0xff]   ;;  %v684_v48 = vld [vmem:[%s931_s1 + $0x188] ss:$16 sps:$4 sm:$0xff]   ;;  %v109_v49 = vcombine.high %v545_v46, %v545_v46  ;;  %v685_v50 = vld [vmem:[%s931_s1 + $0x164] ss:$16 sps:$4 sm:$0xff]  }
  0x12   :  { %v687_v51 = vld [vmem:[%s931_s1 + $0x16c] ss:$16 sps:$4 sm:$0xff]   ;;  %v689_v52 = vld [vmem:[%s931_s1 + $0x160] ss:$16 sps:$4 sm:$0xff]   ;;  %v690_v53 = vld [vmem:[%s931_s1 + $0x168] ss:$16 sps:$4 sm:$0xff]  }
  0x13   :  { %441 = vmatpush1.bf16.msra.mxu0 %v641_v18  ;;  %482 = vmatpush1.bf16.msra.mxu1 %v642_v19  ;;  %v691_v54 = vld [vmem:[%s931_s1 + $0x144] ss:$16 sps:$4 sm:$0xff]   ;;  %v693_v55 = vld [vmem:[%s931_s1 + $0x14c] ss:$16 sps:$4 sm:$0xff]   ;;  %v695_v56 = vld [vmem:[%s931_s1 + $0x140] ss:$16 sps:$4 sm:$0xff]  }
  0x14   :  { %442 = vmatprep.subr.bf16.mxu0 %v643_v20  ;;  %483 = vmatprep.subr.bf16.mxu1 %v645_v21  ;;  %v696_v57 = vld [vmem:[%s931_s1 + $0x148] ss:$16 sps:$4 sm:$0xff]   ;;  %v697_v58 = vld [vmem:[%s931_s1 + $0x124] ss:$16 sps:$4 sm:$0xff]   ;;  %v699_v59 = vld [vmem:[%s931_s1 + $0x12c] ss:$16 sps:$4 sm:$0xff]  }
  0x15   :  { %464 = vmatprep.mubr.bf16.mxu0 %v109_v49  ;;  %505 = vmatprep.mubr.bf16.mxu1 %v109_v49  ;;  %v701_v60 = vld [vmem:[%s931_s1 + $0x120] ss:$16 sps:$4 sm:$0xff]   ;;  %v702_v61 = vld [vmem:[%s931_s1 + $0x128] ss:$16 sps:$4 sm:$0xff]   ;;  %v703_v62 = vld [vmem:[%s931_s1 + $0x104] ss:$16 sps:$4 sm:$0xff]  }
  0x16   :  { %v705_v63 = vld [vmem:[%s931_s1 + $0x10c] ss:$16 sps:$4 sm:$0xff]   ;;  %v707_v0 = vld [vmem:[%s931_s1 + $0x100] ss:$16 sps:$4 sm:$0xff]   ;;  %v708_v1 = vld [vmem:[%s931_s1 + $0x108] ss:$16 sps:$4 sm:$0xff]  }
  0x17   :  { %443 = vmatpush1.bf16.msra.mxu0 %v647_v22  ;;  %484 = vmatpush1.bf16.msra.mxu1 %v648_v23  ;;  %v82_v3 = vshrl.u32 %v81_v2, 7  ;;  %v709_v4 = vmov 1983009808   ;;  %v79_v10 = vld [vmem:[%s933_s2] sm:$0xf] }
  0x18   :  { %444 = vmatprep.subr.bf16.mxu0 %v649_v24  ;;  %485 = vmatprep.subr.bf16.mxu1 %v651_v25  ;;  %v525_v5 = vunpack.c.l.s4 %v709_v4 }
  0x19   :  { %v83_v6 = vsub.s32 0, %v82_v3  ;;  %v91_v7 = vsub.s32 2, %v82_v3  ;;  %v87_v8 = vsub.s32 1, %v82_v3  ;;  %v95_v9 = vsub.s32 3, %v82_v3 }
  0x1a   :  { %v526_v11 = vunpack.c.0.s8 %v525_v5 }
  0x1b   :  { %445 = vmatpush1.bf16.msra.mxu0 %v653_v26  ;;  %486 = vmatpush1.bf16.msra.mxu1 %v654_v27  ;;  %v84_v12 = vrot.slane %v79_v10, %v83_v6  ;;  %v92_v13 = vrot.slane %v79_v10, %v91_v7  ;;  %v88_v14 = vrot.slane %v79_v10, %v87_v8 }
  0x1c   :  { %446 = vmatprep.subr.bf16.mxu0 %v655_v28  ;;  %487 = vmatprep.subr.bf16.mxu1 %v657_v29  ;;  %v96_v15 = vrot.slane %v79_v10, %v95_v9  ;;  %v529_v19 = vsub.s32 %v526_v11, %v82_v3 }
  0x1f   :  { %447 = vmatpush1.bf16.msra.mxu0 %v659_v30  ;;  %488 = vmatpush1.bf16.msra.mxu1 %v660_v31 }
  0x20   :  { %448 = vmatprep.subr.bf16.mxu0 %v661_v32  ;;  %489 = vmatprep.subr.bf16.mxu1 %v663_v33 }
  0x23   :  { %449 = vmatpush2.bf16.msra.mxu0 %v665_v34  ;;  %490 = vmatpush2.bf16.msra.mxu1 %v666_v35 }
  0x24   :  { %450 = vmatprep.subr.bf16.mxu0 %v667_v36  ;;  %491 = vmatprep.subr.bf16.mxu1 %v669_v37 }
  0x27   :  { %451 = vmatpush2.bf16.msra.mxu0 %v671_v38  ;;  %492 = vmatpush2.bf16.msra.mxu1 %v672_v39 }
  0x28   :  { %452 = vmatprep.subr.bf16.mxu0 %v673_v40  ;;  %493 = vmatprep.subr.bf16.mxu1 %v675_v41 }
  0x2b   :  { %453 = vmatpush2.bf16.msra.mxu0 %v677_v42  ;;  %494 = vmatpush2.bf16.msra.mxu1 %v678_v43 }
  0x2c   :  { %454 = vmatprep.subr.bf16.mxu0 %v679_v44  ;;  %495 = vmatprep.subr.bf16.mxu1 %v681_v45 }
  0x2f   :  { %455 = vmatpush2.bf16.msra.mxu0 %v683_v47  ;;  %496 = vmatpush2.bf16.msra.mxu1 %v684_v48 }
  0x30   :  { %456 = vmatprep.subr.bf16.mxu0 %v685_v50  ;;  %497 = vmatprep.subr.bf16.mxu1 %v687_v51 }
  0x33   :  { %457 = vmatpush2.bf16.msra.mxu0 %v689_v52  ;;  %498 = vmatpush2.bf16.msra.mxu1 %v690_v53 }
  0x34   :  { %458 = vmatprep.subr.bf16.mxu0 %v691_v54  ;;  %499 = vmatprep.subr.bf16.mxu1 %v693_v55 }
  0x37   :  { %459 = vmatpush2.bf16.msra.mxu0 %v695_v56  ;;  %500 = vmatpush2.bf16.msra.mxu1 %v696_v57 }
  0x38   :  { %460 = vmatprep.subr.bf16.mxu0 %v697_v58  ;;  %501 = vmatprep.subr.bf16.mxu1 %v699_v59 }
  0x3b   :  { %461 = vmatpush2.bf16.msra.mxu0 %v701_v60  ;;  %502 = vmatpush2.bf16.msra.mxu1 %v702_v61 }
  0x3c   :  { %462 = vmatprep.subr.bf16.mxu0 %v703_v62  ;;  %503 = vmatprep.subr.bf16.mxu1 %v705_v63 }
  0x3f   :  { %463 = vmatpush2.bf16.msra.mxu0 %v707_v0  ;;  %504 = vmatpush2.bf16.msra.mxu1 %v708_v1 }
  0x42   :  { %465 = vmatmul.mubr.bf16.vlgmr.msra.gmra.mxu0 %v545_v46  ;;  %506 = vmatmul.mubr.bf16.vlgmr.msra.gmra.mxu1 %v545_v46 }
 0x102   :  { %v466_v16 = vpop.f32.mrf.mxu0  ;;  %v507_v17 = vpop.f32.mrf.mxu1 }
 0x103   :  { %v467_v21 = vadd.f32 %v466_v16, %v84_v12  ;;  %v508_v22 = vadd.f32 %v507_v17, %v92_v13 }
 0x104   :  { %v468_v18 = vpop.f32.mrf.mxu0  ;;  %v509_v20 = vpop.f32.mrf.mxu1 }
 0x105   :  { %v469_v23 = vadd.f32 %v468_v18, %v88_v14  ;;  %v510_v24 = vadd.f32 %v509_v20, %v96_v15 }
 0x106   :  { %v470_v25 = vpop.f32.mrf.mxu0  ;;  %v511_v26 = vpop.f32.mrf.mxu1 }
 0x107   :  { %v610_v27 = vpack.c.bf16 %v469_v23, %v467_v21  ;;  %v611_v28 = vpack.c.bf16 %v510_v24, %v508_v22 }
 0x108   :  { %v471_v29 = vpop.f32.mrf.mxu0  ;;  %v512_v30 = vpop.f32.mrf.mxu1 }
 0x109   :  { %v530_v31 = vrot.slane %v610_v27, %v529_v19  ;;  %v537_v32 = vrot.slane %v611_v28, %v529_v19 }
 0x10b   :  { %v538_v33 = vcombine.low %v530_v31, %v537_v32 }
 0x10d   :  { %540 = vst [vmem:[%s934_s3] sm:$0xff] %v538_v33 }

</bundles_post_ra>
